<compile_context>
chip_gen: v5e
topology: v5e:2x2
jax: 0.10.0
libtpu: 0.0.40
codegen_flags: <defaults>
</compile_context>

<pallas_src>
import jax
import jax.numpy as jnp
from jax.experimental import pallas as pl
from jax.experimental.pallas import tpu as pltpu


# ----------------------------- fused Pallas kernel -----------------------------

def make_fused_kernel(n_layers):
    def kernel(x_ref, dem_ref, w1_ref, b1_ref, w2_ref, b2_ref, wihd0_ref, *rest):
        gru_refs = rest[:4 * n_layers]
        out_ref, ind_ref = rest[4 * n_layers:]

        x = x_ref[...]                                   # (N, L, C) f32
        N, L, C = x.shape
        x_rows = [x[:, t, :] for t in range(L)]          # per-t (N, C) rows

        # ---- dem_fc: Linear(dem,40) -> ReLU -> Dropout(identity @ eval) -> Linear(40,20) -> ReLU
        h1 = jnp.maximum(
            jnp.dot(dem_ref[...], w1_ref[...], preferred_element_type=jnp.float32)
            + b1_ref[...], 0.0)
        dem_emb = jnp.maximum(
            jnp.dot(h1, w2_ref[...], preferred_element_type=jnp.float32)
            + b2_ref[...], 0.0)                          # (N, 20)

        # ---- causal max-pool over zero-padded history (max_pool1d(L,1,return_indices))
        # index convention: position in the padded sequence, first occurrence on ties
        # (padded zeros occupy padded positions t .. L-2 of window t and come first).
        pooled_rows, ind_rows = [], []
        run_max = x_rows[0]
        run_arg = jnp.zeros((N, C), jnp.int32)
        for t in range(L):
            if t > 0:
                cur = x_rows[t]
                better = cur > run_max                   # strict '>' keeps first occurrence
                run_max = jnp.where(better, cur, run_max)
                run_arg = jnp.where(better, jnp.int32(t), run_arg)
            if t < L - 1:
                pooled_rows.append(jnp.maximum(run_max, 0.0))
                ind_rows.append(jnp.where(run_max > 0.0,
                                          run_arg + (L - 1), jnp.int32(t)))
            else:
                pooled_rows.append(run_max)
                ind_rows.append(run_arg + (L - 1))

        # ---- GRU, inputs kept 2-D with rows indexed (t*N + n)
        layer_in = jnp.concatenate(x_rows, axis=0)        # (L*N, C) time-major slab

        hs = None
        for layer in range(n_layers):
            wih = gru_refs[4 * layer + 0][...]            # (C,3H) for layer 0, (H,3H) later
            whh = gru_refs[4 * layer + 1][...]            # (H, 3H)
            bg = gru_refs[4 * layer + 2][...]             # (1, 3H)  b_ih + b_hh[r,z] (folded)
            bhn = gru_refs[4 * layer + 3][...]            # (1, H)   b_hh[n]
            H = whh.shape[0]

            # hoisted input projection: one matmul for all timesteps
            gx_all = jnp.dot(layer_in, wih,
                             preferred_element_type=jnp.float32)       # (L*N, 3H)
            if layer == 0:
                # loop-invariant dem contribution + folded biases, added per-t
                gx_add = jnp.dot(dem_emb, wihd0_ref[...],
                                 preferred_element_type=jnp.float32) + bg   # (N, 3H)
            else:
                gx_all = gx_all + bg
                gx_add = None

            h = jnp.zeros((N, H), jnp.float32)
            hs = []
            for t in range(L):                            # serial recurrence (small L, unrolled)
                gx = gx_all[t * N:(t + 1) * N, :]
                if gx_add is not None:
                    gx = gx + gx_add
                gh = jnp.dot(h, whh, preferred_element_type=jnp.float32)
                r_g = jax.nn.sigmoid(gx[:, :H] + gh[:, :H])
                z_g = jax.nn.sigmoid(gx[:, H:2 * H] + gh[:, H:2 * H])
                n_g = jnp.tanh(gx[:, 2 * H:] + r_g * (gh[:, 2 * H:] + bhn))
                h = (1.0 - z_g) * n_g + z_g * h
                hs.append(h)
            layer_in = jnp.concatenate(hs, axis=0)        # (L*N, H) feeds next layer

        # ---- single lane-dense stores: [pooled_t | h_t] concatenated over t
        out_rows = [jnp.concatenate([pooled_rows[t], hs[t]], axis=-1) for t in range(L)]
        out_ref[...] = jnp.concatenate(out_rows, axis=-1)          # (N, L*(C+H))
        ind_ref[...] = jnp.concatenate(ind_rows, axis=-1)          # (N, L*C) int32

    return kernel


# ----------------------------- wrapper -----------------------------

def patient_rnn_encoder_forward(params, dem, *timesteps):
    """Mirrors PatientRNNEncoder.forward (include_dem=True, include_demfc=True, eval mode)."""
    x = jnp.stack(timesteps, axis=-1).astype(jnp.float32)   # (N, L, C) -- mirrors torch.stack
    N, L, C = x.shape
    dem = dem.astype(jnp.float32)
    gru = params["gru"]
    n_layers = len(gru)
    H = gru[-1]["whh"].shape[0]

    # --- wrapper-side (free) weight prep: fold biases, split layer-0 W_ih ---
    wihd0 = gru[0]["wih"][C:, :]                         # (20, 3H): dem-embedding rows
    layer_weights = []
    for l, lp in enumerate(gru):
        Hl = lp["whh"].shape[0]
        bg = lp["bih"] + jnp.concatenate(
            [lp["bhh"][:, :2 * Hl], jnp.zeros((1, Hl), jnp.float32)], axis=-1)
        bhn = lp["bhh"][:, 2 * Hl:]
        wih = gru[0]["wih"][:C, :] if l == 0 else lp["wih"]
        layer_weights += [wih, lp["whh"], bg, bhn]

    weights = [params["dem_w1"], params["dem_b1"], params["dem_w2"], params["dem_b2"],
               wihd0] + layer_weights

    # Batch tiling: single block at tiny N; multiple-of-8 blocks for realistic N so
    # the "parallel" grid axis can shard across TensorCores (v7x) / pipeline (v5e/v6e).
    BN = 8 if (N > 8 and N % 8 == 0) else N
    grid = (N // BN,)

    def batch_spec(shape):
        nd = len(shape)
        return pl.BlockSpec((BN,) + tuple(shape[1:]),
                            lambda i, nd=nd: (i,) + (0,) * (nd - 1))

    def full_spec(shape):
        nd = len(shape)
        return pl.BlockSpec(tuple(shape), lambda i, nd=nd: (0,) * nd)

    out_slab, ind_slab = pl.pallas_call(
        make_fused_kernel(n_layers),
        out_shape=(jax.ShapeDtypeStruct((N, L * (C + H)), jnp.float32),
                   jax.ShapeDtypeStruct((N, L * C), jnp.int32)),
        grid=grid,
        in_specs=[batch_spec(x.shape), batch_spec(dem.shape)]
                 + [full_spec(w.shape) for w in weights],
        out_specs=(batch_spec((N, L * (C + H))), batch_spec((N, L * C))),
        compiler_params=pltpu.CompilerParams(dimension_semantics=("parallel",)),
    )(x, dem, *weights)

    out = out_slab.reshape(N, L, C + H)                           # contiguous reshape: free
    inds = jnp.transpose(ind_slab.reshape(N, L, C), (0, 2, 1))    # PyTorch (N, C, L) index layout
    return out, {"timesteps_pool_ind": inds}


# ----------------------------- params -----------------------------

def init_params(key, input_size=6, dem_size=10, hidden=32, layers=2):
    """Deterministic synthetic weights (PyTorch-style uniform init).
    Weight matrices stored pre-transposed as (in_features, out_features)."""
    keys = jax.random.split(key, 4 + 4 * layers)

    def u(k, shape, bound):
        return jax.random.uniform(k, shape, jnp.float32, -bound, bound)

    bd = 1.0 / dem_size ** 0.5
    b40 = 1.0 / 40.0 ** 0.5
    params = {
        "dem_w1": u(keys[0], (dem_size, 40), bd),
        "dem_b1": u(keys[1], (1, 40), bd),
        "dem_w2": u(keys[2], (40, 20), b40),
        "dem_b2": u(keys[3], (1, 20), b40),
        "gru": [],
    }
    d_in = input_size + 20
    bh = 1.0 / hidden ** 0.5
    for layer in range(layers):
        k0, k1, k2, k3 = jax.random.split(keys[4 + layer], 4)
        params["gru"].append({
            "wih": u(k0, (d_in, 3 * hidden), bh),
            "whh": u(k1, (hidden, 3 * hidden), bh),
            "bih": u(k2, (1, 3 * hidden), bh),
            "bhh": u(k3, (1, 3 * hidden), bh),
        })
        d_in = hidden
    return params


# ----------------------------- pure-JAX reference -----------------------------

def _gru_layer_ref(x, wih, whh, bih, bhh):
    N, L, _ = x.shape
    H = whh.shape[0]
    h = jnp.zeros((N, H), jnp.float32)
    ys = []
    for t in range(L):
        gx = x[:, t, :] @ wih + bih
        gh = h @ whh + bhh
        r = jax.nn.sigmoid(gx[:, :H] + gh[:, :H])
        z = jax.nn.sigmoid(gx[:, H:2 * H] + gh[:, H:2 * H])
        n = jnp.tanh(gx[:, 2 * H:] + r * gh[:, 2 * H:])
        h = (1.0 - z) * n + z * h
        ys.append(h)
    return jnp.stack(ys, axis=1)


def reference_forward(params, dem, *timesteps):
    x = jnp.stack(timesteps, axis=-1).astype(jnp.float32)
    N, L, C = x.shape
    padded = jnp.concatenate([jnp.zeros((N, L - 1, C), x.dtype), x], axis=1)
    pooled = jnp.stack([padded[:, t:t + L, :].max(axis=1) for t in range(L)], axis=1)
    inds = jnp.stack([t + jnp.argmax(padded[:, t:t + L, :], axis=1) for t in range(L)],
                     axis=2).astype(jnp.int32)                    # (N, C, L)
    h = jnp.maximum(dem @ params["dem_w1"] + params["dem_b1"], 0.0)
    demf = jnp.maximum(h @ params["dem_w2"] + params["dem_b2"], 0.0)
    rnn_in = jnp.concatenate(
        [x, jnp.broadcast_to(demf[:, None, :], (N, L, demf.shape[-1]))], axis=-1)
    hs = rnn_in
    for lp in params["gru"]:
        hs = _gru_layer_ref(hs, lp["wih"], lp["whh"], lp["bih"], lp["bhh"])
    return jnp.concatenate([pooled, hs], axis=-1), {"timesteps_pool_ind": inds}


# ----------------------------- main -----------------------------

if __name__ == "__main__":
    key = jax.random.PRNGKey(0)
    kp, kd, kt = jax.random.split(key, 3)

    N, L, C_in, dem_size, hidden, layers = 2, 8, 6, 10, 32, 2
    params = init_params(kp, input_size=C_in, dem_size=dem_size, hidden=hidden, layers=layers)

    dem = jax.random.normal(kd, (N, dem_size), jnp.float32)
    # *timesteps: C_in separate (N, L) tensors, stacked on the last dim inside forward.
    ts = [t for t in jax.random.normal(kt, (C_in, N, L), jnp.float32)]

    out, aux = patient_rnn_encoder_forward(params, dem, *ts)
    out = jax.block_until_ready(out)
    inds = jax.block_until_ready(aux["timesteps_pool_ind"])

    assert out.shape == (N, L, C_in + hidden)
    assert inds.shape == (N, C_in, L)

    ref_out, ref_aux = reference_forward(params, dem, *ts)
    assert jnp.allclose(out, ref_out, atol=5e-3, rtol=5e-3)
    assert jnp.array_equal(inds, ref_aux["timesteps_pool_ind"])

    print("KERNEL_OK")
</pallas_src>

<mosaic_0001>
module attributes {stable_mosaic.version = 11 : i64} {
  func.func @kernel(%arg0: i32, %arg1: memref<2x8x6xf32, #tpu.memory_space<vmem>>, %arg2: memref<2x10xf32, #tpu.memory_space<vmem>>, %arg3: memref<10x40xf32, #tpu.memory_space<vmem>>, %arg4: memref<1x40xf32, #tpu.memory_space<vmem>>, %arg5: memref<40x20xf32, #tpu.memory_space<vmem>>, %arg6: memref<1x20xf32, #tpu.memory_space<vmem>>, %arg7: memref<20x96xf32, #tpu.memory_space<vmem>>, %arg8: memref<6x96xf32, #tpu.memory_space<vmem>>, %arg9: memref<32x96xf32, #tpu.memory_space<vmem>>, %arg10: memref<1x96xf32, #tpu.memory_space<vmem>>, %arg11: memref<1x32xf32, #tpu.memory_space<vmem>>, %arg12: memref<32x96xf32, #tpu.memory_space<vmem>>, %arg13: memref<32x96xf32, #tpu.memory_space<vmem>>, %arg14: memref<1x96xf32, #tpu.memory_space<vmem>>, %arg15: memref<1x32xf32, #tpu.memory_space<vmem>>, %arg16: memref<2x304xf32, #tpu.memory_space<vmem>>, %arg17: memref<2x48xi32, #tpu.memory_space<vmem>>) attributes {dimension_semantics = [#tpu.dimension_semantics<parallel>], iteration_bounds = array<i64: 1>, scalar_prefetch = 0 : i64, scratch_operands = 0 : i64, tpu.core_type = #tpu.core_type<tc>, window_params = [{transform_indices = @transform_0, window_bounds = array<i64: 2, 8, 6>}, {transform_indices = @transform_1, window_bounds = array<i64: 2, 10>}, {pipeline_mode = #tpu.pipeline_mode<synchronous>, transform_indices = @transform_2, window_bounds = array<i64: 10, 40>}, {pipeline_mode = #tpu.pipeline_mode<synchronous>, transform_indices = @transform_3, window_bounds = array<i64: 1, 40>}, {pipeline_mode = #tpu.pipeline_mode<synchronous>, transform_indices = @transform_4, window_bounds = array<i64: 40, 20>}, {pipeline_mode = #tpu.pipeline_mode<synchronous>, transform_indices = @transform_5, window_bounds = array<i64: 1, 20>}, {pipeline_mode = #tpu.pipeline_mode<synchronous>, transform_indices = @transform_6, window_bounds = array<i64: 20, 96>}, {pipeline_mode = #tpu.pipeline_mode<synchronous>, transform_indices = @transform_7, window_bounds = array<i64: 6, 96>}, {pipeline_mode = #tpu.pipeline_mode<synchronous>, transform_indices = @transform_8, window_bounds = array<i64: 32, 96>}, {pipeline_mode = #tpu.pipeline_mode<synchronous>, transform_indices = @transform_9, window_bounds = array<i64: 1, 96>}, {pipeline_mode = #tpu.pipeline_mode<synchronous>, transform_indices = @transform_10, window_bounds = array<i64: 1, 32>}, {pipeline_mode = #tpu.pipeline_mode<synchronous>, transform_indices = @transform_11, window_bounds = array<i64: 32, 96>}, {pipeline_mode = #tpu.pipeline_mode<synchronous>, transform_indices = @transform_12, window_bounds = array<i64: 32, 96>}, {pipeline_mode = #tpu.pipeline_mode<synchronous>, transform_indices = @transform_13, window_bounds = array<i64: 1, 96>}, {pipeline_mode = #tpu.pipeline_mode<synchronous>, transform_indices = @transform_14, window_bounds = array<i64: 1, 32>}, {transform_indices = @transform_15, window_bounds = array<i64: 2, 304>}, {transform_indices = @transform_16, window_bounds = array<i64: 2, 48>}]} {
    %c0 = arith.constant 0 : index
    %c0_0 = arith.constant 0 : index
    %c0_1 = arith.constant 0 : index
    %0 = vector.load %arg1[%c0, %c0_0, %c0_1] : memref<2x8x6xf32, #tpu.memory_space<vmem>>, vector<2x8x6xf32>
    %1 = vector.extract_strided_slice %0 {offsets = [0, 0, 0], sizes = [2, 1, 6], strides = [1, 1, 1]} : vector<2x8x6xf32> to vector<2x1x6xf32>
    %2 = vector.shape_cast %1 : vector<2x1x6xf32> to vector<2x6xf32>
    %3 = vector.extract_strided_slice %0 {offsets = [0, 1, 0], sizes = [2, 1, 6], strides = [1, 1, 1]} : vector<2x8x6xf32> to vector<2x1x6xf32>
    %4 = vector.shape_cast %3 : vector<2x1x6xf32> to vector<2x6xf32>
    %5 = vector.extract_strided_slice %0 {offsets = [0, 2, 0], sizes = [2, 1, 6], strides = [1, 1, 1]} : vector<2x8x6xf32> to vector<2x1x6xf32>
    %6 = vector.shape_cast %5 : vector<2x1x6xf32> to vector<2x6xf32>
    %7 = vector.extract_strided_slice %0 {offsets = [0, 3, 0], sizes = [2, 1, 6], strides = [1, 1, 1]} : vector<2x8x6xf32> to vector<2x1x6xf32>
    %8 = vector.shape_cast %7 : vector<2x1x6xf32> to vector<2x6xf32>
    %9 = vector.extract_strided_slice %0 {offsets = [0, 4, 0], sizes = [2, 1, 6], strides = [1, 1, 1]} : vector<2x8x6xf32> to vector<2x1x6xf32>
    %10 = vector.shape_cast %9 : vector<2x1x6xf32> to vector<2x6xf32>
    %11 = vector.extract_strided_slice %0 {offsets = [0, 5, 0], sizes = [2, 1, 6], strides = [1, 1, 1]} : vector<2x8x6xf32> to vector<2x1x6xf32>
    %12 = vector.shape_cast %11 : vector<2x1x6xf32> to vector<2x6xf32>
    %13 = vector.extract_strided_slice %0 {offsets = [0, 6, 0], sizes = [2, 1, 6], strides = [1, 1, 1]} : vector<2x8x6xf32> to vector<2x1x6xf32>
    %14 = vector.shape_cast %13 : vector<2x1x6xf32> to vector<2x6xf32>
    %15 = vector.extract_strided_slice %0 {offsets = [0, 7, 0], sizes = [2, 1, 6], strides = [1, 1, 1]} : vector<2x8x6xf32> to vector<2x1x6xf32>
    %16 = vector.shape_cast %15 : vector<2x1x6xf32> to vector<2x6xf32>
    %c0_2 = arith.constant 0 : index
    %c0_3 = arith.constant 0 : index
    %17 = vector.load %arg2[%c0_2, %c0_3] : memref<2x10xf32, #tpu.memory_space<vmem>>, vector<2x10xf32>
    %c0_4 = arith.constant 0 : index
    %c0_5 = arith.constant 0 : index
    %18 = vector.load %arg3[%c0_4, %c0_5] : memref<10x40xf32, #tpu.memory_space<vmem>>, vector<10x40xf32>
    %cst = arith.constant dense<0.000000e+00> : vector<2x40xf32>
    %19 = tpu.matmul %17, %18, %cst {dimension_numbers = #tpu.dot_dimension_numbers<[1], [0], [0], [1], [0, 0, 1, 1], [], []>} : vector<2x10xf32>, vector<10x40xf32>, vector<2x40xf32> -> vector<2x40xf32>
    %c0_6 = arith.constant 0 : index
    %c0_7 = arith.constant 0 : index
    %20 = vector.load %arg4[%c0_6, %c0_7] : memref<1x40xf32, #tpu.memory_space<vmem>>, vector<1x40xf32>
    %21 = vector.broadcast %20 : vector<1x40xf32> to vector<2x40xf32>
    %22 = arith.addf %19, %21 : vector<2x40xf32>
    %cst_8 = arith.constant 0.000000e+00 : f32
    %23 = vector.broadcast %cst_8 : f32 to vector<2x40xf32>
    %24 = arith.maximumf %22, %23 : vector<2x40xf32>
    %c0_9 = arith.constant 0 : index
    %c0_10 = arith.constant 0 : index
    %25 = vector.load %arg5[%c0_9, %c0_10] : memref<40x20xf32, #tpu.memory_space<vmem>>, vector<40x20xf32>
    %cst_11 = arith.constant dense<0.000000e+00> : vector<2x20xf32>
    %26 = tpu.matmul %24, %25, %cst_11 {dimension_numbers = #tpu.dot_dimension_numbers<[1], [0], [0], [1], [0, 0, 1, 1], [], []>} : vector<2x40xf32>, vector<40x20xf32>, vector<2x20xf32> -> vector<2x20xf32>
    %c0_12 = arith.constant 0 : index
    %c0_13 = arith.constant 0 : index
    %27 = vector.load %arg6[%c0_12, %c0_13] : memref<1x20xf32, #tpu.memory_space<vmem>>, vector<1x20xf32>
    %28 = vector.broadcast %27 : vector<1x20xf32> to vector<2x20xf32>
    %29 = arith.addf %26, %28 : vector<2x20xf32>
    %cst_14 = arith.constant 0.000000e+00 : f32
    %30 = vector.broadcast %cst_14 : f32 to vector<2x20xf32>
    %31 = arith.maximumf %29, %30 : vector<2x20xf32>
    %c0_i32 = arith.constant 0 : i32
    %32 = vector.broadcast %c0_i32 : i32 to vector<2x6xi32>
    %cst_15 = arith.constant 0.000000e+00 : f32
    %33 = vector.broadcast %cst_15 : f32 to vector<2x6xf32>
    %34 = arith.maximumf %2, %33 : vector<2x6xf32>
    %cst_16 = arith.constant 0.000000e+00 : f32
    %35 = vector.broadcast %cst_16 : f32 to vector<2x6xf32>
    %36 = arith.cmpf ogt, %2, %35 : vector<2x6xf32>
    %c7_i32 = arith.constant 7 : i32
    %37 = vector.broadcast %c7_i32 : i32 to vector<2x6xi32>
    %38 = arith.addi %32, %37 : vector<2x6xi32>
    %c0_i32_17 = arith.constant 0 : i32
    %39 = vector.broadcast %c0_i32_17 : i32 to vector<2x6xi32>
    %40 = arith.select %36, %38, %39 : vector<2x6xi1>, vector<2x6xi32>
    %41 = arith.cmpf ogt, %4, %2 : vector<2x6xf32>
    %42 = arith.select %41, %4, %2 : vector<2x6xi1>, vector<2x6xf32>
    %c1_i32 = arith.constant 1 : i32
    %43 = vector.broadcast %c1_i32 : i32 to vector<2x6xi32>
    %44 = arith.select %41, %43, %32 : vector<2x6xi1>, vector<2x6xi32>
    %cst_18 = arith.constant 0.000000e+00 : f32
    %45 = vector.broadcast %cst_18 : f32 to vector<2x6xf32>
    %46 = arith.maximumf %42, %45 : vector<2x6xf32>
    %cst_19 = arith.constant 0.000000e+00 : f32
    %47 = vector.broadcast %cst_19 : f32 to vector<2x6xf32>
    %48 = arith.cmpf ogt, %42, %47 : vector<2x6xf32>
    %c7_i32_20 = arith.constant 7 : i32
    %49 = vector.broadcast %c7_i32_20 : i32 to vector<2x6xi32>
    %50 = arith.addi %44, %49 : vector<2x6xi32>
    %c1_i32_21 = arith.constant 1 : i32
    %51 = vector.broadcast %c1_i32_21 : i32 to vector<2x6xi32>
    %52 = arith.select %48, %50, %51 : vector<2x6xi1>, vector<2x6xi32>
    %53 = arith.cmpf ogt, %6, %42 : vector<2x6xf32>
    %54 = arith.select %53, %6, %42 : vector<2x6xi1>, vector<2x6xf32>
    %c2_i32 = arith.constant 2 : i32
    %55 = vector.broadcast %c2_i32 : i32 to vector<2x6xi32>
    %56 = arith.select %53, %55, %44 : vector<2x6xi1>, vector<2x6xi32>
    %cst_22 = arith.constant 0.000000e+00 : f32
    %57 = vector.broadcast %cst_22 : f32 to vector<2x6xf32>
    %58 = arith.maximumf %54, %57 : vector<2x6xf32>
    %cst_23 = arith.constant 0.000000e+00 : f32
    %59 = vector.broadcast %cst_23 : f32 to vector<2x6xf32>
    %60 = arith.cmpf ogt, %54, %59 : vector<2x6xf32>
    %c7_i32_24 = arith.constant 7 : i32
    %61 = vector.broadcast %c7_i32_24 : i32 to vector<2x6xi32>
    %62 = arith.addi %56, %61 : vector<2x6xi32>
    %c2_i32_25 = arith.constant 2 : i32
    %63 = vector.broadcast %c2_i32_25 : i32 to vector<2x6xi32>
    %64 = arith.select %60, %62, %63 : vector<2x6xi1>, vector<2x6xi32>
    %65 = arith.cmpf ogt, %8, %54 : vector<2x6xf32>
    %66 = arith.select %65, %8, %54 : vector<2x6xi1>, vector<2x6xf32>
    %c3_i32 = arith.constant 3 : i32
    %67 = vector.broadcast %c3_i32 : i32 to vector<2x6xi32>
    %68 = arith.select %65, %67, %56 : vector<2x6xi1>, vector<2x6xi32>
    %cst_26 = arith.constant 0.000000e+00 : f32
    %69 = vector.broadcast %cst_26 : f32 to vector<2x6xf32>
    %70 = arith.maximumf %66, %69 : vector<2x6xf32>
    %cst_27 = arith.constant 0.000000e+00 : f32
    %71 = vector.broadcast %cst_27 : f32 to vector<2x6xf32>
    %72 = arith.cmpf ogt, %66, %71 : vector<2x6xf32>
    %c7_i32_28 = arith.constant 7 : i32
    %73 = vector.broadcast %c7_i32_28 : i32 to vector<2x6xi32>
    %74 = arith.addi %68, %73 : vector<2x6xi32>
    %c3_i32_29 = arith.constant 3 : i32
    %75 = vector.broadcast %c3_i32_29 : i32 to vector<2x6xi32>
    %76 = arith.select %72, %74, %75 : vector<2x6xi1>, vector<2x6xi32>
    %77 = arith.cmpf ogt, %10, %66 : vector<2x6xf32>
    %78 = arith.select %77, %10, %66 : vector<2x6xi1>, vector<2x6xf32>
    %c4_i32 = arith.constant 4 : i32
    %79 = vector.broadcast %c4_i32 : i32 to vector<2x6xi32>
    %80 = arith.select %77, %79, %68 : vector<2x6xi1>, vector<2x6xi32>
    %cst_30 = arith.constant 0.000000e+00 : f32
    %81 = vector.broadcast %cst_30 : f32 to vector<2x6xf32>
    %82 = arith.maximumf %78, %81 : vector<2x6xf32>
    %cst_31 = arith.constant 0.000000e+00 : f32
    %83 = vector.broadcast %cst_31 : f32 to vector<2x6xf32>
    %84 = arith.cmpf ogt, %78, %83 : vector<2x6xf32>
    %c7_i32_32 = arith.constant 7 : i32
    %85 = vector.broadcast %c7_i32_32 : i32 to vector<2x6xi32>
    %86 = arith.addi %80, %85 : vector<2x6xi32>
    %c4_i32_33 = arith.constant 4 : i32
    %87 = vector.broadcast %c4_i32_33 : i32 to vector<2x6xi32>
    %88 = arith.select %84, %86, %87 : vector<2x6xi1>, vector<2x6xi32>
    %89 = arith.cmpf ogt, %12, %78 : vector<2x6xf32>
    %90 = arith.select %89, %12, %78 : vector<2x6xi1>, vector<2x6xf32>
    %c5_i32 = arith.constant 5 : i32
    %91 = vector.broadcast %c5_i32 : i32 to vector<2x6xi32>
    %92 = arith.select %89, %91, %80 : vector<2x6xi1>, vector<2x6xi32>
    %cst_34 = arith.constant 0.000000e+00 : f32
    %93 = vector.broadcast %cst_34 : f32 to vector<2x6xf32>
    %94 = arith.maximumf %90, %93 : vector<2x6xf32>
    %cst_35 = arith.constant 0.000000e+00 : f32
    %95 = vector.broadcast %cst_35 : f32 to vector<2x6xf32>
    %96 = arith.cmpf ogt, %90, %95 : vector<2x6xf32>
    %c7_i32_36 = arith.constant 7 : i32
    %97 = vector.broadcast %c7_i32_36 : i32 to vector<2x6xi32>
    %98 = arith.addi %92, %97 : vector<2x6xi32>
    %c5_i32_37 = arith.constant 5 : i32
    %99 = vector.broadcast %c5_i32_37 : i32 to vector<2x6xi32>
    %100 = arith.select %96, %98, %99 : vector<2x6xi1>, vector<2x6xi32>
    %101 = arith.cmpf ogt, %14, %90 : vector<2x6xf32>
    %102 = arith.select %101, %14, %90 : vector<2x6xi1>, vector<2x6xf32>
    %c6_i32 = arith.constant 6 : i32
    %103 = vector.broadcast %c6_i32 : i32 to vector<2x6xi32>
    %104 = arith.select %101, %103, %92 : vector<2x6xi1>, vector<2x6xi32>
    %cst_38 = arith.constant 0.000000e+00 : f32
    %105 = vector.broadcast %cst_38 : f32 to vector<2x6xf32>
    %106 = arith.maximumf %102, %105 : vector<2x6xf32>
    %cst_39 = arith.constant 0.000000e+00 : f32
    %107 = vector.broadcast %cst_39 : f32 to vector<2x6xf32>
    %108 = arith.cmpf ogt, %102, %107 : vector<2x6xf32>
    %c7_i32_40 = arith.constant 7 : i32
    %109 = vector.broadcast %c7_i32_40 : i32 to vector<2x6xi32>
    %110 = arith.addi %104, %109 : vector<2x6xi32>
    %c6_i32_41 = arith.constant 6 : i32
    %111 = vector.broadcast %c6_i32_41 : i32 to vector<2x6xi32>
    %112 = arith.select %108, %110, %111 : vector<2x6xi1>, vector<2x6xi32>
    %113 = arith.cmpf ogt, %16, %102 : vector<2x6xf32>
    %114 = arith.select %113, %16, %102 : vector<2x6xi1>, vector<2x6xf32>
    %c7_i32_42 = arith.constant 7 : i32
    %115 = vector.broadcast %c7_i32_42 : i32 to vector<2x6xi32>
    %116 = arith.select %113, %115, %104 : vector<2x6xi1>, vector<2x6xi32>
    %c7_i32_43 = arith.constant 7 : i32
    %117 = vector.broadcast %c7_i32_43 : i32 to vector<2x6xi32>
    %118 = arith.addi %116, %117 : vector<2x6xi32>
    %119 = tpu.concatenate %2, %4, %6, %8, %10, %12, %14, %16 in 0 : vector<2x6xf32>, vector<2x6xf32>, vector<2x6xf32>, vector<2x6xf32>, vector<2x6xf32>, vector<2x6xf32>, vector<2x6xf32>, vector<2x6xf32> -> vector<16x6xf32>
    %c0_44 = arith.constant 0 : index
    %c0_45 = arith.constant 0 : index
    %120 = vector.load %arg8[%c0_44, %c0_45] : memref<6x96xf32, #tpu.memory_space<vmem>>, vector<6x96xf32>
    %c0_46 = arith.constant 0 : index
    %c0_47 = arith.constant 0 : index
    %121 = vector.load %arg9[%c0_46, %c0_47] : memref<32x96xf32, #tpu.memory_space<vmem>>, vector<32x96xf32>
    %c0_48 = arith.constant 0 : index
    %c0_49 = arith.constant 0 : index
    %122 = vector.load %arg10[%c0_48, %c0_49] : memref<1x96xf32, #tpu.memory_space<vmem>>, vector<1x96xf32>
    %c0_50 = arith.constant 0 : index
    %c0_51 = arith.constant 0 : index
    %123 = vector.load %arg11[%c0_50, %c0_51] : memref<1x32xf32, #tpu.memory_space<vmem>>, vector<1x32xf32>
    %cst_52 = arith.constant dense<0.000000e+00> : vector<16x96xf32>
    %124 = tpu.matmul %119, %120, %cst_52 {dimension_numbers = #tpu.dot_dimension_numbers<[1], [0], [0], [1], [0, 0, 1, 1], [], []>} : vector<16x6xf32>, vector<6x96xf32>, vector<16x96xf32> -> vector<16x96xf32>
    %c0_53 = arith.constant 0 : index
    %c0_54 = arith.constant 0 : index
    %125 = vector.load %arg7[%c0_53, %c0_54] : memref<20x96xf32, #tpu.memory_space<vmem>>, vector<20x96xf32>
    %cst_55 = arith.constant dense<0.000000e+00> : vector<2x96xf32>
    %126 = tpu.matmul %31, %125, %cst_55 {dimension_numbers = #tpu.dot_dimension_numbers<[1], [0], [0], [1], [0, 0, 1, 1], [], []>} : vector<2x20xf32>, vector<20x96xf32>, vector<2x96xf32> -> vector<2x96xf32>
    %127 = vector.broadcast %122 : vector<1x96xf32> to vector<2x96xf32>
    %128 = arith.addf %126, %127 : vector<2x96xf32>
    %cst_56 = arith.constant 0.000000e+00 : f32
    %129 = vector.broadcast %cst_56 : f32 to vector<2x32xf32>
    %130 = vector.extract_strided_slice %124 {offsets = [0, 0], sizes = [2, 96], strides = [1, 1]} : vector<16x96xf32> to vector<2x96xf32>
    %131 = arith.addf %130, %128 : vector<2x96xf32>
    %cst_57 = arith.constant dense<0.000000e+00> : vector<2x96xf32>
    %132 = tpu.matmul %129, %121, %cst_57 {dimension_numbers = #tpu.dot_dimension_numbers<[1], [0], [0], [1], [0, 0, 1, 1], [], []>} : vector<2x32xf32>, vector<32x96xf32>, vector<2x96xf32> -> vector<2x96xf32>
    %133 = vector.extract_strided_slice %131 {offsets = [0, 0], sizes = [2, 32], strides = [1, 1]} : vector<2x96xf32> to vector<2x32xf32>
    %134 = vector.extract_strided_slice %132 {offsets = [0, 0], sizes = [2, 32], strides = [1, 1]} : vector<2x96xf32> to vector<2x32xf32>
    %135 = arith.addf %133, %134 : vector<2x32xf32>
    %136 = arith.negf %135 : vector<2x32xf32>
    %137 = math.exp %136 : vector<2x32xf32>
    %cst_58 = arith.constant 1.000000e+00 : f32
    %138 = vector.broadcast %cst_58 : f32 to vector<2x32xf32>
    %139 = arith.addf %138, %137 : vector<2x32xf32>
    %140 = arith.divf %138, %139 : vector<2x32xf32>
    %141 = vector.extract_strided_slice %131 {offsets = [0, 32], sizes = [2, 32], strides = [1, 1]} : vector<2x96xf32> to vector<2x32xf32>
    %142 = vector.extract_strided_slice %132 {offsets = [0, 32], sizes = [2, 32], strides = [1, 1]} : vector<2x96xf32> to vector<2x32xf32>
    %143 = arith.addf %141, %142 : vector<2x32xf32>
    %144 = arith.negf %143 : vector<2x32xf32>
    %145 = math.exp %144 : vector<2x32xf32>
    %cst_59 = arith.constant 1.000000e+00 : f32
    %146 = vector.broadcast %cst_59 : f32 to vector<2x32xf32>
    %147 = arith.addf %146, %145 : vector<2x32xf32>
    %148 = arith.divf %146, %147 : vector<2x32xf32>
    %149 = vector.extract_strided_slice %131 {offsets = [0, 64], sizes = [2, 32], strides = [1, 1]} : vector<2x96xf32> to vector<2x32xf32>
    %150 = vector.extract_strided_slice %132 {offsets = [0, 64], sizes = [2, 32], strides = [1, 1]} : vector<2x96xf32> to vector<2x32xf32>
    %151 = vector.broadcast %123 : vector<1x32xf32> to vector<2x32xf32>
    %152 = arith.addf %150, %151 : vector<2x32xf32>
    %153 = arith.mulf %140, %152 : vector<2x32xf32>
    %154 = arith.addf %149, %153 : vector<2x32xf32>
    %155 = math.tanh %154 : vector<2x32xf32>
    %cst_60 = arith.constant 1.000000e+00 : f32
    %156 = vector.broadcast %cst_60 : f32 to vector<2x32xf32>
    %157 = arith.subf %156, %148 : vector<2x32xf32>
    %158 = arith.mulf %157, %155 : vector<2x32xf32>
    %159 = arith.mulf %148, %129 : vector<2x32xf32>
    %160 = arith.addf %158, %159 : vector<2x32xf32>
    %161 = vector.extract_strided_slice %124 {offsets = [2, 0], sizes = [2, 96], strides = [1, 1]} : vector<16x96xf32> to vector<2x96xf32>
    %162 = arith.addf %161, %128 : vector<2x96xf32>
    %cst_61 = arith.constant dense<0.000000e+00> : vector<2x96xf32>
    %163 = tpu.matmul %160, %121, %cst_61 {dimension_numbers = #tpu.dot_dimension_numbers<[1], [0], [0], [1], [0, 0, 1, 1], [], []>} : vector<2x32xf32>, vector<32x96xf32>, vector<2x96xf32> -> vector<2x96xf32>
    %164 = vector.extract_strided_slice %162 {offsets = [0, 0], sizes = [2, 32], strides = [1, 1]} : vector<2x96xf32> to vector<2x32xf32>
    %165 = vector.extract_strided_slice %163 {offsets = [0, 0], sizes = [2, 32], strides = [1, 1]} : vector<2x96xf32> to vector<2x32xf32>
    %166 = arith.addf %164, %165 : vector<2x32xf32>
    %167 = arith.negf %166 : vector<2x32xf32>
    %168 = math.exp %167 : vector<2x32xf32>
    %cst_62 = arith.constant 1.000000e+00 : f32
    %169 = vector.broadcast %cst_62 : f32 to vector<2x32xf32>
    %170 = arith.addf %169, %168 : vector<2x32xf32>
    %171 = arith.divf %169, %170 : vector<2x32xf32>
    %172 = vector.extract_strided_slice %162 {offsets = [0, 32], sizes = [2, 32], strides = [1, 1]} : vector<2x96xf32> to vector<2x32xf32>
    %173 = vector.extract_strided_slice %163 {offsets = [0, 32], sizes = [2, 32], strides = [1, 1]} : vector<2x96xf32> to vector<2x32xf32>
    %174 = arith.addf %172, %173 : vector<2x32xf32>
    %175 = arith.negf %174 : vector<2x32xf32>
    %176 = math.exp %175 : vector<2x32xf32>
    %cst_63 = arith.constant 1.000000e+00 : f32
    %177 = vector.broadcast %cst_63 : f32 to vector<2x32xf32>
    %178 = arith.addf %177, %176 : vector<2x32xf32>
    %179 = arith.divf %177, %178 : vector<2x32xf32>
    %180 = vector.extract_strided_slice %162 {offsets = [0, 64], sizes = [2, 32], strides = [1, 1]} : vector<2x96xf32> to vector<2x32xf32>
    %181 = vector.extract_strided_slice %163 {offsets = [0, 64], sizes = [2, 32], strides = [1, 1]} : vector<2x96xf32> to vector<2x32xf32>
    %182 = vector.broadcast %123 : vector<1x32xf32> to vector<2x32xf32>
    %183 = arith.addf %181, %182 : vector<2x32xf32>
    %184 = arith.mulf %171, %183 : vector<2x32xf32>
    %185 = arith.addf %180, %184 : vector<2x32xf32>
    %186 = math.tanh %185 : vector<2x32xf32>
    %cst_64 = arith.constant 1.000000e+00 : f32
    %187 = vector.broadcast %cst_64 : f32 to vector<2x32xf32>
    %188 = arith.subf %187, %179 : vector<2x32xf32>
    %189 = arith.mulf %188, %186 : vector<2x32xf32>
    %190 = arith.mulf %179, %160 : vector<2x32xf32>
    %191 = arith.addf %189, %190 : vector<2x32xf32>
    %192 = vector.extract_strided_slice %124 {offsets = [4, 0], sizes = [2, 96], strides = [1, 1]} : vector<16x96xf32> to vector<2x96xf32>
    %193 = arith.addf %192, %128 : vector<2x96xf32>
    %cst_65 = arith.constant dense<0.000000e+00> : vector<2x96xf32>
    %194 = tpu.matmul %191, %121, %cst_65 {dimension_numbers = #tpu.dot_dimension_numbers<[1], [0], [0], [1], [0, 0, 1, 1], [], []>} : vector<2x32xf32>, vector<32x96xf32>, vector<2x96xf32> -> vector<2x96xf32>
    %195 = vector.extract_strided_slice %193 {offsets = [0, 0], sizes = [2, 32], strides = [1, 1]} : vector<2x96xf32> to vector<2x32xf32>
    %196 = vector.extract_strided_slice %194 {offsets = [0, 0], sizes = [2, 32], strides = [1, 1]} : vector<2x96xf32> to vector<2x32xf32>
    %197 = arith.addf %195, %196 : vector<2x32xf32>
    %198 = arith.negf %197 : vector<2x32xf32>
    %199 = math.exp %198 : vector<2x32xf32>
    %cst_66 = arith.constant 1.000000e+00 : f32
    %200 = vector.broadcast %cst_66 : f32 to vector<2x32xf32>
    %201 = arith.addf %200, %199 : vector<2x32xf32>
    %202 = arith.divf %200, %201 : vector<2x32xf32>
    %203 = vector.extract_strided_slice %193 {offsets = [0, 32], sizes = [2, 32], strides = [1, 1]} : vector<2x96xf32> to vector<2x32xf32>
    %204 = vector.extract_strided_slice %194 {offsets = [0, 32], sizes = [2, 32], strides = [1, 1]} : vector<2x96xf32> to vector<2x32xf32>
    %205 = arith.addf %203, %204 : vector<2x32xf32>
    %206 = arith.negf %205 : vector<2x32xf32>
    %207 = math.exp %206 : vector<2x32xf32>
    %cst_67 = arith.constant 1.000000e+00 : f32
    %208 = vector.broadcast %cst_67 : f32 to vector<2x32xf32>
    %209 = arith.addf %208, %207 : vector<2x32xf32>
    %210 = arith.divf %208, %209 : vector<2x32xf32>
    %211 = vector.extract_strided_slice %193 {offsets = [0, 64], sizes = [2, 32], strides = [1, 1]} : vector<2x96xf32> to vector<2x32xf32>
    %212 = vector.extract_strided_slice %194 {offsets = [0, 64], sizes = [2, 32], strides = [1, 1]} : vector<2x96xf32> to vector<2x32xf32>
    %213 = vector.broadcast %123 : vector<1x32xf32> to vector<2x32xf32>
    %214 = arith.addf %212, %213 : vector<2x32xf32>
    %215 = arith.mulf %202, %214 : vector<2x32xf32>
    %216 = arith.addf %211, %215 : vector<2x32xf32>
    %217 = math.tanh %216 : vector<2x32xf32>
    %cst_68 = arith.constant 1.000000e+00 : f32
    %218 = vector.broadcast %cst_68 : f32 to vector<2x32xf32>
    %219 = arith.subf %218, %210 : vector<2x32xf32>
    %220 = arith.mulf %219, %217 : vector<2x32xf32>
    %221 = arith.mulf %210, %191 : vector<2x32xf32>
    %222 = arith.addf %220, %221 : vector<2x32xf32>
    %223 = vector.extract_strided_slice %124 {offsets = [6, 0], sizes = [2, 96], strides = [1, 1]} : vector<16x96xf32> to vector<2x96xf32>
    %224 = arith.addf %223, %128 : vector<2x96xf32>
    %cst_69 = arith.constant dense<0.000000e+00> : vector<2x96xf32>
    %225 = tpu.matmul %222, %121, %cst_69 {dimension_numbers = #tpu.dot_dimension_numbers<[1], [0], [0], [1], [0, 0, 1, 1], [], []>} : vector<2x32xf32>, vector<32x96xf32>, vector<2x96xf32> -> vector<2x96xf32>
    %226 = vector.extract_strided_slice %224 {offsets = [0, 0], sizes = [2, 32], strides = [1, 1]} : vector<2x96xf32> to vector<2x32xf32>
    %227 = vector.extract_strided_slice %225 {offsets = [0, 0], sizes = [2, 32], strides = [1, 1]} : vector<2x96xf32> to vector<2x32xf32>
    %228 = arith.addf %226, %227 : vector<2x32xf32>
    %229 = arith.negf %228 : vector<2x32xf32>
    %230 = math.exp %229 : vector<2x32xf32>
    %cst_70 = arith.constant 1.000000e+00 : f32
    %231 = vector.broadcast %cst_70 : f32 to vector<2x32xf32>
    %232 = arith.addf %231, %230 : vector<2x32xf32>
    %233 = arith.divf %231, %232 : vector<2x32xf32>
    %234 = vector.extract_strided_slice %224 {offsets = [0, 32], sizes = [2, 32], strides = [1, 1]} : vector<2x96xf32> to vector<2x32xf32>
    %235 = vector.extract_strided_slice %225 {offsets = [0, 32], sizes = [2, 32], strides = [1, 1]} : vector<2x96xf32> to vector<2x32xf32>
    %236 = arith.addf %234, %235 : vector<2x32xf32>
    %237 = arith.negf %236 : vector<2x32xf32>
    %238 = math.exp %237 : vector<2x32xf32>
    %cst_71 = arith.constant 1.000000e+00 : f32
    %239 = vector.broadcast %cst_71 : f32 to vector<2x32xf32>
    %240 = arith.addf %239, %238 : vector<2x32xf32>
    %241 = arith.divf %239, %240 : vector<2x32xf32>
    %242 = vector.extract_strided_slice %224 {offsets = [0, 64], sizes = [2, 32], strides = [1, 1]} : vector<2x96xf32> to vector<2x32xf32>
    %243 = vector.extract_strided_slice %225 {offsets = [0, 64], sizes = [2, 32], strides = [1, 1]} : vector<2x96xf32> to vector<2x32xf32>
    %244 = vector.broadcast %123 : vector<1x32xf32> to vector<2x32xf32>
    %245 = arith.addf %243, %244 : vector<2x32xf32>
    %246 = arith.mulf %233, %245 : vector<2x32xf32>
    %247 = arith.addf %242, %246 : vector<2x32xf32>
    %248 = math.tanh %247 : vector<2x32xf32>
    %cst_72 = arith.constant 1.000000e+00 : f32
    %249 = vector.broadcast %cst_72 : f32 to vector<2x32xf32>
    %250 = arith.subf %249, %241 : vector<2x32xf32>
    %251 = arith.mulf %250, %248 : vector<2x32xf32>
    %252 = arith.mulf %241, %222 : vector<2x32xf32>
    %253 = arith.addf %251, %252 : vector<2x32xf32>
    %254 = vector.extract_strided_slice %124 {offsets = [8, 0], sizes = [2, 96], strides = [1, 1]} : vector<16x96xf32> to vector<2x96xf32>
    %255 = arith.addf %254, %128 : vector<2x96xf32>
    %cst_73 = arith.constant dense<0.000000e+00> : vector<2x96xf32>
    %256 = tpu.matmul %253, %121, %cst_73 {dimension_numbers = #tpu.dot_dimension_numbers<[1], [0], [0], [1], [0, 0, 1, 1], [], []>} : vector<2x32xf32>, vector<32x96xf32>, vector<2x96xf32> -> vector<2x96xf32>
    %257 = vector.extract_strided_slice %255 {offsets = [0, 0], sizes = [2, 32], strides = [1, 1]} : vector<2x96xf32> to vector<2x32xf32>
    %258 = vector.extract_strided_slice %256 {offsets = [0, 0], sizes = [2, 32], strides = [1, 1]} : vector<2x96xf32> to vector<2x32xf32>
    %259 = arith.addf %257, %258 : vector<2x32xf32>
    %260 = arith.negf %259 : vector<2x32xf32>
    %261 = math.exp %260 : vector<2x32xf32>
    %cst_74 = arith.constant 1.000000e+00 : f32
    %262 = vector.broadcast %cst_74 : f32 to vector<2x32xf32>
    %263 = arith.addf %262, %261 : vector<2x32xf32>
    %264 = arith.divf %262, %263 : vector<2x32xf32>
    %265 = vector.extract_strided_slice %255 {offsets = [0, 32], sizes = [2, 32], strides = [1, 1]} : vector<2x96xf32> to vector<2x32xf32>
    %266 = vector.extract_strided_slice %256 {offsets = [0, 32], sizes = [2, 32], strides = [1, 1]} : vector<2x96xf32> to vector<2x32xf32>
    %267 = arith.addf %265, %266 : vector<2x32xf32>
    %268 = arith.negf %267 : vector<2x32xf32>
    %269 = math.exp %268 : vector<2x32xf32>
    %cst_75 = arith.constant 1.000000e+00 : f32
    %270 = vector.broadcast %cst_75 : f32 to vector<2x32xf32>
    %271 = arith.addf %270, %269 : vector<2x32xf32>
    %272 = arith.divf %270, %271 : vector<2x32xf32>
    %273 = vector.extract_strided_slice %255 {offsets = [0, 64], sizes = [2, 32], strides = [1, 1]} : vector<2x96xf32> to vector<2x32xf32>
    %274 = vector.extract_strided_slice %256 {offsets = [0, 64], sizes = [2, 32], strides = [1, 1]} : vector<2x96xf32> to vector<2x32xf32>
    %275 = vector.broadcast %123 : vector<1x32xf32> to vector<2x32xf32>
    %276 = arith.addf %274, %275 : vector<2x32xf32>
    %277 = arith.mulf %264, %276 : vector<2x32xf32>
    %278 = arith.addf %273, %277 : vector<2x32xf32>
    %279 = math.tanh %278 : vector<2x32xf32>
    %cst_76 = arith.constant 1.000000e+00 : f32
    %280 = vector.broadcast %cst_76 : f32 to vector<2x32xf32>
    %281 = arith.subf %280, %272 : vector<2x32xf32>
    %282 = arith.mulf %281, %279 : vector<2x32xf32>
    %283 = arith.mulf %272, %253 : vector<2x32xf32>
    %284 = arith.addf %282, %283 : vector<2x32xf32>
    %285 = vector.extract_strided_slice %124 {offsets = [10, 0], sizes = [2, 96], strides = [1, 1]} : vector<16x96xf32> to vector<2x96xf32>
    %286 = arith.addf %285, %128 : vector<2x96xf32>
    %cst_77 = arith.constant dense<0.000000e+00> : vector<2x96xf32>
    %287 = tpu.matmul %284, %121, %cst_77 {dimension_numbers = #tpu.dot_dimension_numbers<[1], [0], [0], [1], [0, 0, 1, 1], [], []>} : vector<2x32xf32>, vector<32x96xf32>, vector<2x96xf32> -> vector<2x96xf32>
    %288 = vector.extract_strided_slice %286 {offsets = [0, 0], sizes = [2, 32], strides = [1, 1]} : vector<2x96xf32> to vector<2x32xf32>
    %289 = vector.extract_strided_slice %287 {offsets = [0, 0], sizes = [2, 32], strides = [1, 1]} : vector<2x96xf32> to vector<2x32xf32>
    %290 = arith.addf %288, %289 : vector<2x32xf32>
    %291 = arith.negf %290 : vector<2x32xf32>
    %292 = math.exp %291 : vector<2x32xf32>
    %cst_78 = arith.constant 1.000000e+00 : f32
    %293 = vector.broadcast %cst_78 : f32 to vector<2x32xf32>
    %294 = arith.addf %293, %292 : vector<2x32xf32>
    %295 = arith.divf %293, %294 : vector<2x32xf32>
    %296 = vector.extract_strided_slice %286 {offsets = [0, 32], sizes = [2, 32], strides = [1, 1]} : vector<2x96xf32> to vector<2x32xf32>
    %297 = vector.extract_strided_slice %287 {offsets = [0, 32], sizes = [2, 32], strides = [1, 1]} : vector<2x96xf32> to vector<2x32xf32>
    %298 = arith.addf %296, %297 : vector<2x32xf32>
    %299 = arith.negf %298 : vector<2x32xf32>
    %300 = math.exp %299 : vector<2x32xf32>
    %cst_79 = arith.constant 1.000000e+00 : f32
    %301 = vector.broadcast %cst_79 : f32 to vector<2x32xf32>
    %302 = arith.addf %301, %300 : vector<2x32xf32>
    %303 = arith.divf %301, %302 : vector<2x32xf32>
    %304 = vector.extract_strided_slice %286 {offsets = [0, 64], sizes = [2, 32], strides = [1, 1]} : vector<2x96xf32> to vector<2x32xf32>
    %305 = vector.extract_strided_slice %287 {offsets = [0, 64], sizes = [2, 32], strides = [1, 1]} : vector<2x96xf32> to vector<2x32xf32>
    %306 = vector.broadcast %123 : vector<1x32xf32> to vector<2x32xf32>
    %307 = arith.addf %305, %306 : vector<2x32xf32>
    %308 = arith.mulf %295, %307 : vector<2x32xf32>
    %309 = arith.addf %304, %308 : vector<2x32xf32>
    %310 = math.tanh %309 : vector<2x32xf32>
    %cst_80 = arith.constant 1.000000e+00 : f32
    %311 = vector.broadcast %cst_80 : f32 to vector<2x32xf32>
    %312 = arith.subf %311, %303 : vector<2x32xf32>
    %313 = arith.mulf %312, %310 : vector<2x32xf32>
    %314 = arith.mulf %303, %284 : vector<2x32xf32>
    %315 = arith.addf %313, %314 : vector<2x32xf32>
    %316 = vector.extract_strided_slice %124 {offsets = [12, 0], sizes = [2, 96], strides = [1, 1]} : vector<16x96xf32> to vector<2x96xf32>
    %317 = arith.addf %316, %128 : vector<2x96xf32>
    %cst_81 = arith.constant dense<0.000000e+00> : vector<2x96xf32>
    %318 = tpu.matmul %315, %121, %cst_81 {dimension_numbers = #tpu.dot_dimension_numbers<[1], [0], [0], [1], [0, 0, 1, 1], [], []>} : vector<2x32xf32>, vector<32x96xf32>, vector<2x96xf32> -> vector<2x96xf32>
    %319 = vector.extract_strided_slice %317 {offsets = [0, 0], sizes = [2, 32], strides = [1, 1]} : vector<2x96xf32> to vector<2x32xf32>
    %320 = vector.extract_strided_slice %318 {offsets = [0, 0], sizes = [2, 32], strides = [1, 1]} : vector<2x96xf32> to vector<2x32xf32>
    %321 = arith.addf %319, %320 : vector<2x32xf32>
    %322 = arith.negf %321 : vector<2x32xf32>
    %323 = math.exp %322 : vector<2x32xf32>
    %cst_82 = arith.constant 1.000000e+00 : f32
    %324 = vector.broadcast %cst_82 : f32 to vector<2x32xf32>
    %325 = arith.addf %324, %323 : vector<2x32xf32>
    %326 = arith.divf %324, %325 : vector<2x32xf32>
    %327 = vector.extract_strided_slice %317 {offsets = [0, 32], sizes = [2, 32], strides = [1, 1]} : vector<2x96xf32> to vector<2x32xf32>
    %328 = vector.extract_strided_slice %318 {offsets = [0, 32], sizes = [2, 32], strides = [1, 1]} : vector<2x96xf32> to vector<2x32xf32>
    %329 = arith.addf %327, %328 : vector<2x32xf32>
    %330 = arith.negf %329 : vector<2x32xf32>
    %331 = math.exp %330 : vector<2x32xf32>
    %cst_83 = arith.constant 1.000000e+00 : f32
    %332 = vector.broadcast %cst_83 : f32 to vector<2x32xf32>
    %333 = arith.addf %332, %331 : vector<2x32xf32>
    %334 = arith.divf %332, %333 : vector<2x32xf32>
    %335 = vector.extract_strided_slice %317 {offsets = [0, 64], sizes = [2, 32], strides = [1, 1]} : vector<2x96xf32> to vector<2x32xf32>
    %336 = vector.extract_strided_slice %318 {offsets = [0, 64], sizes = [2, 32], strides = [1, 1]} : vector<2x96xf32> to vector<2x32xf32>
    %337 = vector.broadcast %123 : vector<1x32xf32> to vector<2x32xf32>
    %338 = arith.addf %336, %337 : vector<2x32xf32>
    %339 = arith.mulf %326, %338 : vector<2x32xf32>
    %340 = arith.addf %335, %339 : vector<2x32xf32>
    %341 = math.tanh %340 : vector<2x32xf32>
    %cst_84 = arith.constant 1.000000e+00 : f32
    %342 = vector.broadcast %cst_84 : f32 to vector<2x32xf32>
    %343 = arith.subf %342, %334 : vector<2x32xf32>
    %344 = arith.mulf %343, %341 : vector<2x32xf32>
    %345 = arith.mulf %334, %315 : vector<2x32xf32>
    %346 = arith.addf %344, %345 : vector<2x32xf32>
    %347 = vector.extract_strided_slice %124 {offsets = [14, 0], sizes = [2, 96], strides = [1, 1]} : vector<16x96xf32> to vector<2x96xf32>
    %348 = arith.addf %347, %128 : vector<2x96xf32>
    %cst_85 = arith.constant dense<0.000000e+00> : vector<2x96xf32>
    %349 = tpu.matmul %346, %121, %cst_85 {dimension_numbers = #tpu.dot_dimension_numbers<[1], [0], [0], [1], [0, 0, 1, 1], [], []>} : vector<2x32xf32>, vector<32x96xf32>, vector<2x96xf32> -> vector<2x96xf32>
    %350 = vector.extract_strided_slice %348 {offsets = [0, 0], sizes = [2, 32], strides = [1, 1]} : vector<2x96xf32> to vector<2x32xf32>
    %351 = vector.extract_strided_slice %349 {offsets = [0, 0], sizes = [2, 32], strides = [1, 1]} : vector<2x96xf32> to vector<2x32xf32>
    %352 = arith.addf %350, %351 : vector<2x32xf32>
    %353 = arith.negf %352 : vector<2x32xf32>
    %354 = math.exp %353 : vector<2x32xf32>
    %cst_86 = arith.constant 1.000000e+00 : f32
    %355 = vector.broadcast %cst_86 : f32 to vector<2x32xf32>
    %356 = arith.addf %355, %354 : vector<2x32xf32>
    %357 = arith.divf %355, %356 : vector<2x32xf32>
    %358 = vector.extract_strided_slice %348 {offsets = [0, 32], sizes = [2, 32], strides = [1, 1]} : vector<2x96xf32> to vector<2x32xf32>
    %359 = vector.extract_strided_slice %349 {offsets = [0, 32], sizes = [2, 32], strides = [1, 1]} : vector<2x96xf32> to vector<2x32xf32>
    %360 = arith.addf %358, %359 : vector<2x32xf32>
    %361 = arith.negf %360 : vector<2x32xf32>
    %362 = math.exp %361 : vector<2x32xf32>
    %cst_87 = arith.constant 1.000000e+00 : f32
    %363 = vector.broadcast %cst_87 : f32 to vector<2x32xf32>
    %364 = arith.addf %363, %362 : vector<2x32xf32>
    %365 = arith.divf %363, %364 : vector<2x32xf32>
    %366 = vector.extract_strided_slice %348 {offsets = [0, 64], sizes = [2, 32], strides = [1, 1]} : vector<2x96xf32> to vector<2x32xf32>
    %367 = vector.extract_strided_slice %349 {offsets = [0, 64], sizes = [2, 32], strides = [1, 1]} : vector<2x96xf32> to vector<2x32xf32>
    %368 = vector.broadcast %123 : vector<1x32xf32> to vector<2x32xf32>
    %369 = arith.addf %367, %368 : vector<2x32xf32>
    %370 = arith.mulf %357, %369 : vector<2x32xf32>
    %371 = arith.addf %366, %370 : vector<2x32xf32>
    %372 = math.tanh %371 : vector<2x32xf32>
    %cst_88 = arith.constant 1.000000e+00 : f32
    %373 = vector.broadcast %cst_88 : f32 to vector<2x32xf32>
    %374 = arith.subf %373, %365 : vector<2x32xf32>
    %375 = arith.mulf %374, %372 : vector<2x32xf32>
    %376 = arith.mulf %365, %346 : vector<2x32xf32>
    %377 = arith.addf %375, %376 : vector<2x32xf32>
    %378 = tpu.concatenate %160, %191, %222, %253, %284, %315, %346, %377 in 0 : vector<2x32xf32>, vector<2x32xf32>, vector<2x32xf32>, vector<2x32xf32>, vector<2x32xf32>, vector<2x32xf32>, vector<2x32xf32>, vector<2x32xf32> -> vector<16x32xf32>
    %c0_89 = arith.constant 0 : index
    %c0_90 = arith.constant 0 : index
    %379 = vector.load %arg12[%c0_89, %c0_90] : memref<32x96xf32, #tpu.memory_space<vmem>>, vector<32x96xf32>
    %c0_91 = arith.constant 0 : index
    %c0_92 = arith.constant 0 : index
    %380 = vector.load %arg13[%c0_91, %c0_92] : memref<32x96xf32, #tpu.memory_space<vmem>>, vector<32x96xf32>
    %c0_93 = arith.constant 0 : index
    %c0_94 = arith.constant 0 : index
    %381 = vector.load %arg14[%c0_93, %c0_94] : memref<1x96xf32, #tpu.memory_space<vmem>>, vector<1x96xf32>
    %c0_95 = arith.constant 0 : index
    %c0_96 = arith.constant 0 : index
    %382 = vector.load %arg15[%c0_95, %c0_96] : memref<1x32xf32, #tpu.memory_space<vmem>>, vector<1x32xf32>
    %cst_97 = arith.constant dense<0.000000e+00> : vector<16x96xf32>
    %383 = tpu.matmul %378, %379, %cst_97 {dimension_numbers = #tpu.dot_dimension_numbers<[1], [0], [0], [1], [0, 0, 1, 1], [], []>} : vector<16x32xf32>, vector<32x96xf32>, vector<16x96xf32> -> vector<16x96xf32>
    %384 = vector.broadcast %381 : vector<1x96xf32> to vector<16x96xf32>
    %385 = arith.addf %383, %384 : vector<16x96xf32>
    %cst_98 = arith.constant 0.000000e+00 : f32
    %386 = vector.broadcast %cst_98 : f32 to vector<2x32xf32>
    %387 = vector.extract_strided_slice %385 {offsets = [0, 0], sizes = [2, 96], strides = [1, 1]} : vector<16x96xf32> to vector<2x96xf32>
    %cst_99 = arith.constant dense<0.000000e+00> : vector<2x96xf32>
    %388 = tpu.matmul %386, %380, %cst_99 {dimension_numbers = #tpu.dot_dimension_numbers<[1], [0], [0], [1], [0, 0, 1, 1], [], []>} : vector<2x32xf32>, vector<32x96xf32>, vector<2x96xf32> -> vector<2x96xf32>
    %389 = vector.extract_strided_slice %387 {offsets = [0, 0], sizes = [2, 32], strides = [1, 1]} : vector<2x96xf32> to vector<2x32xf32>
    %390 = vector.extract_strided_slice %388 {offsets = [0, 0], sizes = [2, 32], strides = [1, 1]} : vector<2x96xf32> to vector<2x32xf32>
    %391 = arith.addf %389, %390 : vector<2x32xf32>
    %392 = arith.negf %391 : vector<2x32xf32>
    %393 = math.exp %392 : vector<2x32xf32>
    %cst_100 = arith.constant 1.000000e+00 : f32
    %394 = vector.broadcast %cst_100 : f32 to vector<2x32xf32>
    %395 = arith.addf %394, %393 : vector<2x32xf32>
    %396 = arith.divf %394, %395 : vector<2x32xf32>
    %397 = vector.extract_strided_slice %387 {offsets = [0, 32], sizes = [2, 32], strides = [1, 1]} : vector<2x96xf32> to vector<2x32xf32>
    %398 = vector.extract_strided_slice %388 {offsets = [0, 32], sizes = [2, 32], strides = [1, 1]} : vector<2x96xf32> to vector<2x32xf32>
    %399 = arith.addf %397, %398 : vector<2x32xf32>
    %400 = arith.negf %399 : vector<2x32xf32>
    %401 = math.exp %400 : vector<2x32xf32>
    %cst_101 = arith.constant 1.000000e+00 : f32
    %402 = vector.broadcast %cst_101 : f32 to vector<2x32xf32>
    %403 = arith.addf %402, %401 : vector<2x32xf32>
    %404 = arith.divf %402, %403 : vector<2x32xf32>
    %405 = vector.extract_strided_slice %387 {offsets = [0, 64], sizes = [2, 32], strides = [1, 1]} : vector<2x96xf32> to vector<2x32xf32>
    %406 = vector.extract_strided_slice %388 {offsets = [0, 64], sizes = [2, 32], strides = [1, 1]} : vector<2x96xf32> to vector<2x32xf32>
    %407 = vector.broadcast %382 : vector<1x32xf32> to vector<2x32xf32>
    %408 = arith.addf %406, %407 : vector<2x32xf32>
    %409 = arith.mulf %396, %408 : vector<2x32xf32>
    %410 = arith.addf %405, %409 : vector<2x32xf32>
    %411 = math.tanh %410 : vector<2x32xf32>
    %cst_102 = arith.constant 1.000000e+00 : f32
    %412 = vector.broadcast %cst_102 : f32 to vector<2x32xf32>
    %413 = arith.subf %412, %404 : vector<2x32xf32>
    %414 = arith.mulf %413, %411 : vector<2x32xf32>
    %415 = arith.mulf %404, %386 : vector<2x32xf32>
    %416 = arith.addf %414, %415 : vector<2x32xf32>
    %417 = vector.extract_strided_slice %385 {offsets = [2, 0], sizes = [2, 96], strides = [1, 1]} : vector<16x96xf32> to vector<2x96xf32>
    %cst_103 = arith.constant dense<0.000000e+00> : vector<2x96xf32>
    %418 = tpu.matmul %416, %380, %cst_103 {dimension_numbers = #tpu.dot_dimension_numbers<[1], [0], [0], [1], [0, 0, 1, 1], [], []>} : vector<2x32xf32>, vector<32x96xf32>, vector<2x96xf32> -> vector<2x96xf32>
    %419 = vector.extract_strided_slice %417 {offsets = [0, 0], sizes = [2, 32], strides = [1, 1]} : vector<2x96xf32> to vector<2x32xf32>
    %420 = vector.extract_strided_slice %418 {offsets = [0, 0], sizes = [2, 32], strides = [1, 1]} : vector<2x96xf32> to vector<2x32xf32>
    %421 = arith.addf %419, %420 : vector<2x32xf32>
    %422 = arith.negf %421 : vector<2x32xf32>
    %423 = math.exp %422 : vector<2x32xf32>
    %cst_104 = arith.constant 1.000000e+00 : f32
    %424 = vector.broadcast %cst_104 : f32 to vector<2x32xf32>
    %425 = arith.addf %424, %423 : vector<2x32xf32>
    %426 = arith.divf %424, %425 : vector<2x32xf32>
    %427 = vector.extract_strided_slice %417 {offsets = [0, 32], sizes = [2, 32], strides = [1, 1]} : vector<2x96xf32> to vector<2x32xf32>
    %428 = vector.extract_strided_slice %418 {offsets = [0, 32], sizes = [2, 32], strides = [1, 1]} : vector<2x96xf32> to vector<2x32xf32>
    %429 = arith.addf %427, %428 : vector<2x32xf32>
    %430 = arith.negf %429 : vector<2x32xf32>
    %431 = math.exp %430 : vector<2x32xf32>
    %cst_105 = arith.constant 1.000000e+00 : f32
    %432 = vector.broadcast %cst_105 : f32 to vector<2x32xf32>
    %433 = arith.addf %432, %431 : vector<2x32xf32>
    %434 = arith.divf %432, %433 : vector<2x32xf32>
    %435 = vector.extract_strided_slice %417 {offsets = [0, 64], sizes = [2, 32], strides = [1, 1]} : vector<2x96xf32> to vector<2x32xf32>
    %436 = vector.extract_strided_slice %418 {offsets = [0, 64], sizes = [2, 32], strides = [1, 1]} : vector<2x96xf32> to vector<2x32xf32>
    %437 = vector.broadcast %382 : vector<1x32xf32> to vector<2x32xf32>
    %438 = arith.addf %436, %437 : vector<2x32xf32>
    %439 = arith.mulf %426, %438 : vector<2x32xf32>
    %440 = arith.addf %435, %439 : vector<2x32xf32>
    %441 = math.tanh %440 : vector<2x32xf32>
    %cst_106 = arith.constant 1.000000e+00 : f32
    %442 = vector.broadcast %cst_106 : f32 to vector<2x32xf32>
    %443 = arith.subf %442, %434 : vector<2x32xf32>
    %444 = arith.mulf %443, %441 : vector<2x32xf32>
    %445 = arith.mulf %434, %416 : vector<2x32xf32>
    %446 = arith.addf %444, %445 : vector<2x32xf32>
    %447 = vector.extract_strided_slice %385 {offsets = [4, 0], sizes = [2, 96], strides = [1, 1]} : vector<16x96xf32> to vector<2x96xf32>
    %cst_107 = arith.constant dense<0.000000e+00> : vector<2x96xf32>
    %448 = tpu.matmul %446, %380, %cst_107 {dimension_numbers = #tpu.dot_dimension_numbers<[1], [0], [0], [1], [0, 0, 1, 1], [], []>} : vector<2x32xf32>, vector<32x96xf32>, vector<2x96xf32> -> vector<2x96xf32>
    %449 = vector.extract_strided_slice %447 {offsets = [0, 0], sizes = [2, 32], strides = [1, 1]} : vector<2x96xf32> to vector<2x32xf32>
    %450 = vector.extract_strided_slice %448 {offsets = [0, 0], sizes = [2, 32], strides = [1, 1]} : vector<2x96xf32> to vector<2x32xf32>
    %451 = arith.addf %449, %450 : vector<2x32xf32>
    %452 = arith.negf %451 : vector<2x32xf32>
    %453 = math.exp %452 : vector<2x32xf32>
    %cst_108 = arith.constant 1.000000e+00 : f32
    %454 = vector.broadcast %cst_108 : f32 to vector<2x32xf32>
    %455 = arith.addf %454, %453 : vector<2x32xf32>
    %456 = arith.divf %454, %455 : vector<2x32xf32>
    %457 = vector.extract_strided_slice %447 {offsets = [0, 32], sizes = [2, 32], strides = [1, 1]} : vector<2x96xf32> to vector<2x32xf32>
    %458 = vector.extract_strided_slice %448 {offsets = [0, 32], sizes = [2, 32], strides = [1, 1]} : vector<2x96xf32> to vector<2x32xf32>
    %459 = arith.addf %457, %458 : vector<2x32xf32>
    %460 = arith.negf %459 : vector<2x32xf32>
    %461 = math.exp %460 : vector<2x32xf32>
    %cst_109 = arith.constant 1.000000e+00 : f32
    %462 = vector.broadcast %cst_109 : f32 to vector<2x32xf32>
    %463 = arith.addf %462, %461 : vector<2x32xf32>
    %464 = arith.divf %462, %463 : vector<2x32xf32>
    %465 = vector.extract_strided_slice %447 {offsets = [0, 64], sizes = [2, 32], strides = [1, 1]} : vector<2x96xf32> to vector<2x32xf32>
    %466 = vector.extract_strided_slice %448 {offsets = [0, 64], sizes = [2, 32], strides = [1, 1]} : vector<2x96xf32> to vector<2x32xf32>
    %467 = vector.broadcast %382 : vector<1x32xf32> to vector<2x32xf32>
    %468 = arith.addf %466, %467 : vector<2x32xf32>
    %469 = arith.mulf %456, %468 : vector<2x32xf32>
    %470 = arith.addf %465, %469 : vector<2x32xf32>
    %471 = math.tanh %470 : vector<2x32xf32>
    %cst_110 = arith.constant 1.000000e+00 : f32
    %472 = vector.broadcast %cst_110 : f32 to vector<2x32xf32>
    %473 = arith.subf %472, %464 : vector<2x32xf32>
    %474 = arith.mulf %473, %471 : vector<2x32xf32>
    %475 = arith.mulf %464, %446 : vector<2x32xf32>
    %476 = arith.addf %474, %475 : vector<2x32xf32>
    %477 = vector.extract_strided_slice %385 {offsets = [6, 0], sizes = [2, 96], strides = [1, 1]} : vector<16x96xf32> to vector<2x96xf32>
    %cst_111 = arith.constant dense<0.000000e+00> : vector<2x96xf32>
    %478 = tpu.matmul %476, %380, %cst_111 {dimension_numbers = #tpu.dot_dimension_numbers<[1], [0], [0], [1], [0, 0, 1, 1], [], []>} : vector<2x32xf32>, vector<32x96xf32>, vector<2x96xf32> -> vector<2x96xf32>
    %479 = vector.extract_strided_slice %477 {offsets = [0, 0], sizes = [2, 32], strides = [1, 1]} : vector<2x96xf32> to vector<2x32xf32>
    %480 = vector.extract_strided_slice %478 {offsets = [0, 0], sizes = [2, 32], strides = [1, 1]} : vector<2x96xf32> to vector<2x32xf32>
    %481 = arith.addf %479, %480 : vector<2x32xf32>
    %482 = arith.negf %481 : vector<2x32xf32>
    %483 = math.exp %482 : vector<2x32xf32>
    %cst_112 = arith.constant 1.000000e+00 : f32
    %484 = vector.broadcast %cst_112 : f32 to vector<2x32xf32>
    %485 = arith.addf %484, %483 : vector<2x32xf32>
    %486 = arith.divf %484, %485 : vector<2x32xf32>
    %487 = vector.extract_strided_slice %477 {offsets = [0, 32], sizes = [2, 32], strides = [1, 1]} : vector<2x96xf32> to vector<2x32xf32>
    %488 = vector.extract_strided_slice %478 {offsets = [0, 32], sizes = [2, 32], strides = [1, 1]} : vector<2x96xf32> to vector<2x32xf32>
    %489 = arith.addf %487, %488 : vector<2x32xf32>
    %490 = arith.negf %489 : vector<2x32xf32>
    %491 = math.exp %490 : vector<2x32xf32>
    %cst_113 = arith.constant 1.000000e+00 : f32
    %492 = vector.broadcast %cst_113 : f32 to vector<2x32xf32>
    %493 = arith.addf %492, %491 : vector<2x32xf32>
    %494 = arith.divf %492, %493 : vector<2x32xf32>
    %495 = vector.extract_strided_slice %477 {offsets = [0, 64], sizes = [2, 32], strides = [1, 1]} : vector<2x96xf32> to vector<2x32xf32>
    %496 = vector.extract_strided_slice %478 {offsets = [0, 64], sizes = [2, 32], strides = [1, 1]} : vector<2x96xf32> to vector<2x32xf32>
    %497 = vector.broadcast %382 : vector<1x32xf32> to vector<2x32xf32>
    %498 = arith.addf %496, %497 : vector<2x32xf32>
    %499 = arith.mulf %486, %498 : vector<2x32xf32>
    %500 = arith.addf %495, %499 : vector<2x32xf32>
    %501 = math.tanh %500 : vector<2x32xf32>
    %cst_114 = arith.constant 1.000000e+00 : f32
    %502 = vector.broadcast %cst_114 : f32 to vector<2x32xf32>
    %503 = arith.subf %502, %494 : vector<2x32xf32>
    %504 = arith.mulf %503, %501 : vector<2x32xf32>
    %505 = arith.mulf %494, %476 : vector<2x32xf32>
    %506 = arith.addf %504, %505 : vector<2x32xf32>
    %507 = vector.extract_strided_slice %385 {offsets = [8, 0], sizes = [2, 96], strides = [1, 1]} : vector<16x96xf32> to vector<2x96xf32>
    %cst_115 = arith.constant dense<0.000000e+00> : vector<2x96xf32>
    %508 = tpu.matmul %506, %380, %cst_115 {dimension_numbers = #tpu.dot_dimension_numbers<[1], [0], [0], [1], [0, 0, 1, 1], [], []>} : vector<2x32xf32>, vector<32x96xf32>, vector<2x96xf32> -> vector<2x96xf32>
    %509 = vector.extract_strided_slice %507 {offsets = [0, 0], sizes = [2, 32], strides = [1, 1]} : vector<2x96xf32> to vector<2x32xf32>
    %510 = vector.extract_strided_slice %508 {offsets = [0, 0], sizes = [2, 32], strides = [1, 1]} : vector<2x96xf32> to vector<2x32xf32>
    %511 = arith.addf %509, %510 : vector<2x32xf32>
    %512 = arith.negf %511 : vector<2x32xf32>
    %513 = math.exp %512 : vector<2x32xf32>
    %cst_116 = arith.constant 1.000000e+00 : f32
    %514 = vector.broadcast %cst_116 : f32 to vector<2x32xf32>
    %515 = arith.addf %514, %513 : vector<2x32xf32>
    %516 = arith.divf %514, %515 : vector<2x32xf32>
    %517 = vector.extract_strided_slice %507 {offsets = [0, 32], sizes = [2, 32], strides = [1, 1]} : vector<2x96xf32> to vector<2x32xf32>
    %518 = vector.extract_strided_slice %508 {offsets = [0, 32], sizes = [2, 32], strides = [1, 1]} : vector<2x96xf32> to vector<2x32xf32>
    %519 = arith.addf %517, %518 : vector<2x32xf32>
    %520 = arith.negf %519 : vector<2x32xf32>
    %521 = math.exp %520 : vector<2x32xf32>
    %cst_117 = arith.constant 1.000000e+00 : f32
    %522 = vector.broadcast %cst_117 : f32 to vector<2x32xf32>
    %523 = arith.addf %522, %521 : vector<2x32xf32>
    %524 = arith.divf %522, %523 : vector<2x32xf32>
    %525 = vector.extract_strided_slice %507 {offsets = [0, 64], sizes = [2, 32], strides = [1, 1]} : vector<2x96xf32> to vector<2x32xf32>
    %526 = vector.extract_strided_slice %508 {offsets = [0, 64], sizes = [2, 32], strides = [1, 1]} : vector<2x96xf32> to vector<2x32xf32>
    %527 = vector.broadcast %382 : vector<1x32xf32> to vector<2x32xf32>
    %528 = arith.addf %526, %527 : vector<2x32xf32>
    %529 = arith.mulf %516, %528 : vector<2x32xf32>
    %530 = arith.addf %525, %529 : vector<2x32xf32>
    %531 = math.tanh %530 : vector<2x32xf32>
    %cst_118 = arith.constant 1.000000e+00 : f32
    %532 = vector.broadcast %cst_118 : f32 to vector<2x32xf32>
    %533 = arith.subf %532, %524 : vector<2x32xf32>
    %534 = arith.mulf %533, %531 : vector<2x32xf32>
    %535 = arith.mulf %524, %506 : vector<2x32xf32>
    %536 = arith.addf %534, %535 : vector<2x32xf32>
    %537 = vector.extract_strided_slice %385 {offsets = [10, 0], sizes = [2, 96], strides = [1, 1]} : vector<16x96xf32> to vector<2x96xf32>
    %cst_119 = arith.constant dense<0.000000e+00> : vector<2x96xf32>
    %538 = tpu.matmul %536, %380, %cst_119 {dimension_numbers = #tpu.dot_dimension_numbers<[1], [0], [0], [1], [0, 0, 1, 1], [], []>} : vector<2x32xf32>, vector<32x96xf32>, vector<2x96xf32> -> vector<2x96xf32>
    %539 = vector.extract_strided_slice %537 {offsets = [0, 0], sizes = [2, 32], strides = [1, 1]} : vector<2x96xf32> to vector<2x32xf32>
    %540 = vector.extract_strided_slice %538 {offsets = [0, 0], sizes = [2, 32], strides = [1, 1]} : vector<2x96xf32> to vector<2x32xf32>
    %541 = arith.addf %539, %540 : vector<2x32xf32>
    %542 = arith.negf %541 : vector<2x32xf32>
    %543 = math.exp %542 : vector<2x32xf32>
    %cst_120 = arith.constant 1.000000e+00 : f32
    %544 = vector.broadcast %cst_120 : f32 to vector<2x32xf32>
    %545 = arith.addf %544, %543 : vector<2x32xf32>
    %546 = arith.divf %544, %545 : vector<2x32xf32>
    %547 = vector.extract_strided_slice %537 {offsets = [0, 32], sizes = [2, 32], strides = [1, 1]} : vector<2x96xf32> to vector<2x32xf32>
    %548 = vector.extract_strided_slice %538 {offsets = [0, 32], sizes = [2, 32], strides = [1, 1]} : vector<2x96xf32> to vector<2x32xf32>
    %549 = arith.addf %547, %548 : vector<2x32xf32>
    %550 = arith.negf %549 : vector<2x32xf32>
    %551 = math.exp %550 : vector<2x32xf32>
    %cst_121 = arith.constant 1.000000e+00 : f32
    %552 = vector.broadcast %cst_121 : f32 to vector<2x32xf32>
    %553 = arith.addf %552, %551 : vector<2x32xf32>
    %554 = arith.divf %552, %553 : vector<2x32xf32>
    %555 = vector.extract_strided_slice %537 {offsets = [0, 64], sizes = [2, 32], strides = [1, 1]} : vector<2x96xf32> to vector<2x32xf32>
    %556 = vector.extract_strided_slice %538 {offsets = [0, 64], sizes = [2, 32], strides = [1, 1]} : vector<2x96xf32> to vector<2x32xf32>
    %557 = vector.broadcast %382 : vector<1x32xf32> to vector<2x32xf32>
    %558 = arith.addf %556, %557 : vector<2x32xf32>
    %559 = arith.mulf %546, %558 : vector<2x32xf32>
    %560 = arith.addf %555, %559 : vector<2x32xf32>
    %561 = math.tanh %560 : vector<2x32xf32>
    %cst_122 = arith.constant 1.000000e+00 : f32
    %562 = vector.broadcast %cst_122 : f32 to vector<2x32xf32>
    %563 = arith.subf %562, %554 : vector<2x32xf32>
    %564 = arith.mulf %563, %561 : vector<2x32xf32>
    %565 = arith.mulf %554, %536 : vector<2x32xf32>
    %566 = arith.addf %564, %565 : vector<2x32xf32>
    %567 = vector.extract_strided_slice %385 {offsets = [12, 0], sizes = [2, 96], strides = [1, 1]} : vector<16x96xf32> to vector<2x96xf32>
    %cst_123 = arith.constant dense<0.000000e+00> : vector<2x96xf32>
    %568 = tpu.matmul %566, %380, %cst_123 {dimension_numbers = #tpu.dot_dimension_numbers<[1], [0], [0], [1], [0, 0, 1, 1], [], []>} : vector<2x32xf32>, vector<32x96xf32>, vector<2x96xf32> -> vector<2x96xf32>
    %569 = vector.extract_strided_slice %567 {offsets = [0, 0], sizes = [2, 32], strides = [1, 1]} : vector<2x96xf32> to vector<2x32xf32>
    %570 = vector.extract_strided_slice %568 {offsets = [0, 0], sizes = [2, 32], strides = [1, 1]} : vector<2x96xf32> to vector<2x32xf32>
    %571 = arith.addf %569, %570 : vector<2x32xf32>
    %572 = arith.negf %571 : vector<2x32xf32>
    %573 = math.exp %572 : vector<2x32xf32>
    %cst_124 = arith.constant 1.000000e+00 : f32
    %574 = vector.broadcast %cst_124 : f32 to vector<2x32xf32>
    %575 = arith.addf %574, %573 : vector<2x32xf32>
    %576 = arith.divf %574, %575 : vector<2x32xf32>
    %577 = vector.extract_strided_slice %567 {offsets = [0, 32], sizes = [2, 32], strides = [1, 1]} : vector<2x96xf32> to vector<2x32xf32>
    %578 = vector.extract_strided_slice %568 {offsets = [0, 32], sizes = [2, 32], strides = [1, 1]} : vector<2x96xf32> to vector<2x32xf32>
    %579 = arith.addf %577, %578 : vector<2x32xf32>
    %580 = arith.negf %579 : vector<2x32xf32>
    %581 = math.exp %580 : vector<2x32xf32>
    %cst_125 = arith.constant 1.000000e+00 : f32
    %582 = vector.broadcast %cst_125 : f32 to vector<2x32xf32>
    %583 = arith.addf %582, %581 : vector<2x32xf32>
    %584 = arith.divf %582, %583 : vector<2x32xf32>
    %585 = vector.extract_strided_slice %567 {offsets = [0, 64], sizes = [2, 32], strides = [1, 1]} : vector<2x96xf32> to vector<2x32xf32>
    %586 = vector.extract_strided_slice %568 {offsets = [0, 64], sizes = [2, 32], strides = [1, 1]} : vector<2x96xf32> to vector<2x32xf32>
    %587 = vector.broadcast %382 : vector<1x32xf32> to vector<2x32xf32>
    %588 = arith.addf %586, %587 : vector<2x32xf32>
    %589 = arith.mulf %576, %588 : vector<2x32xf32>
    %590 = arith.addf %585, %589 : vector<2x32xf32>
    %591 = math.tanh %590 : vector<2x32xf32>
    %cst_126 = arith.constant 1.000000e+00 : f32
    %592 = vector.broadcast %cst_126 : f32 to vector<2x32xf32>
    %593 = arith.subf %592, %584 : vector<2x32xf32>
    %594 = arith.mulf %593, %591 : vector<2x32xf32>
    %595 = arith.mulf %584, %566 : vector<2x32xf32>
    %596 = arith.addf %594, %595 : vector<2x32xf32>
    %597 = vector.extract_strided_slice %385 {offsets = [14, 0], sizes = [2, 96], strides = [1, 1]} : vector<16x96xf32> to vector<2x96xf32>
    %cst_127 = arith.constant dense<0.000000e+00> : vector<2x96xf32>
    %598 = tpu.matmul %596, %380, %cst_127 {dimension_numbers = #tpu.dot_dimension_numbers<[1], [0], [0], [1], [0, 0, 1, 1], [], []>} : vector<2x32xf32>, vector<32x96xf32>, vector<2x96xf32> -> vector<2x96xf32>
    %599 = vector.extract_strided_slice %597 {offsets = [0, 0], sizes = [2, 32], strides = [1, 1]} : vector<2x96xf32> to vector<2x32xf32>
    %600 = vector.extract_strided_slice %598 {offsets = [0, 0], sizes = [2, 32], strides = [1, 1]} : vector<2x96xf32> to vector<2x32xf32>
    %601 = arith.addf %599, %600 : vector<2x32xf32>
    %602 = arith.negf %601 : vector<2x32xf32>
    %603 = math.exp %602 : vector<2x32xf32>
    %cst_128 = arith.constant 1.000000e+00 : f32
    %604 = vector.broadcast %cst_128 : f32 to vector<2x32xf32>
    %605 = arith.addf %604, %603 : vector<2x32xf32>
    %606 = arith.divf %604, %605 : vector<2x32xf32>
    %607 = vector.extract_strided_slice %597 {offsets = [0, 32], sizes = [2, 32], strides = [1, 1]} : vector<2x96xf32> to vector<2x32xf32>
    %608 = vector.extract_strided_slice %598 {offsets = [0, 32], sizes = [2, 32], strides = [1, 1]} : vector<2x96xf32> to vector<2x32xf32>
    %609 = arith.addf %607, %608 : vector<2x32xf32>
    %610 = arith.negf %609 : vector<2x32xf32>
    %611 = math.exp %610 : vector<2x32xf32>
    %cst_129 = arith.constant 1.000000e+00 : f32
    %612 = vector.broadcast %cst_129 : f32 to vector<2x32xf32>
    %613 = arith.addf %612, %611 : vector<2x32xf32>
    %614 = arith.divf %612, %613 : vector<2x32xf32>
    %615 = vector.extract_strided_slice %597 {offsets = [0, 64], sizes = [2, 32], strides = [1, 1]} : vector<2x96xf32> to vector<2x32xf32>
    %616 = vector.extract_strided_slice %598 {offsets = [0, 64], sizes = [2, 32], strides = [1, 1]} : vector<2x96xf32> to vector<2x32xf32>
    %617 = vector.broadcast %382 : vector<1x32xf32> to vector<2x32xf32>
    %618 = arith.addf %616, %617 : vector<2x32xf32>
    %619 = arith.mulf %606, %618 : vector<2x32xf32>
    %620 = arith.addf %615, %619 : vector<2x32xf32>
    %621 = math.tanh %620 : vector<2x32xf32>
    %cst_130 = arith.constant 1.000000e+00 : f32
    %622 = vector.broadcast %cst_130 : f32 to vector<2x32xf32>
    %623 = arith.subf %622, %614 : vector<2x32xf32>
    %624 = arith.mulf %623, %621 : vector<2x32xf32>
    %625 = arith.mulf %614, %596 : vector<2x32xf32>
    %626 = arith.addf %624, %625 : vector<2x32xf32>
    %627 = tpu.concatenate %34, %416 in 1 : vector<2x6xf32>, vector<2x32xf32> -> vector<2x38xf32>
    %628 = tpu.concatenate %46, %446 in 1 : vector<2x6xf32>, vector<2x32xf32> -> vector<2x38xf32>
    %629 = tpu.concatenate %58, %476 in 1 : vector<2x6xf32>, vector<2x32xf32> -> vector<2x38xf32>
    %630 = tpu.concatenate %70, %506 in 1 : vector<2x6xf32>, vector<2x32xf32> -> vector<2x38xf32>
    %631 = tpu.concatenate %82, %536 in 1 : vector<2x6xf32>, vector<2x32xf32> -> vector<2x38xf32>
    %632 = tpu.concatenate %94, %566 in 1 : vector<2x6xf32>, vector<2x32xf32> -> vector<2x38xf32>
    %633 = tpu.concatenate %106, %596 in 1 : vector<2x6xf32>, vector<2x32xf32> -> vector<2x38xf32>
    %634 = tpu.concatenate %114, %626 in 1 : vector<2x6xf32>, vector<2x32xf32> -> vector<2x38xf32>
    %635 = tpu.concatenate %627, %628, %629, %630, %631, %632, %633, %634 in 1 : vector<2x38xf32>, vector<2x38xf32>, vector<2x38xf32>, vector<2x38xf32>, vector<2x38xf32>, vector<2x38xf32>, vector<2x38xf32>, vector<2x38xf32> -> vector<2x304xf32>
    %c0_131 = arith.constant 0 : index
    %c0_132 = arith.constant 0 : index
    %636 = vector.load %arg16[%c0_131, %c0_132] : memref<2x304xf32, #tpu.memory_space<vmem>>, vector<2x304xf32>
    tpu.vector_store %arg16[%c0_131, %c0_132], %635 {strides = array<i32>} : memref<2x304xf32, #tpu.memory_space<vmem>>, vector<2x304xf32>,
    %637 = tpu.concatenate %40, %52, %64, %76, %88, %100, %112, %118 in 1 : vector<2x6xi32>, vector<2x6xi32>, vector<2x6xi32>, vector<2x6xi32>, vector<2x6xi32>, vector<2x6xi32>, vector<2x6xi32>, vector<2x6xi32> -> vector<2x48xi32>
    %c0_133 = arith.constant 0 : index
    %c0_134 = arith.constant 0 : index
    %638 = vector.load %arg17[%c0_133, %c0_134] : memref<2x48xi32, #tpu.memory_space<vmem>>, vector<2x48xi32>
    tpu.vector_store %arg17[%c0_133, %c0_134], %637 {strides = array<i32>} : memref<2x48xi32, #tpu.memory_space<vmem>>, vector<2x48xi32>,
    return
  }
  func.func @transform_0(%arg0: i32) -> (i32, i32, i32) {
    %c0_i32 = arith.constant 0 : i32
    %c0_i32_0 = arith.constant 0 : i32
    %c0_i32_1 = arith.constant 0 : i32
    return %arg0, %c0_i32, %c0_i32_0 : i32, i32, i32
  }
  func.func @transform_1(%arg0: i32) -> (i32, i32) {
    %c0_i32 = arith.constant 0 : i32
    %c0_i32_0 = arith.constant 0 : i32
    return %arg0, %c0_i32 : i32, i32
  }
  func.func @transform_2(%arg0: i32) -> (i32, i32) {
    %c0_i32 = arith.constant 0 : i32
    %c0_i32_0 = arith.constant 0 : i32
    %c0_i32_1 = arith.constant 0 : i32
    return %c0_i32, %c0_i32_0 : i32, i32
  }
  func.func @transform_3(%arg0: i32) -> (i32, i32) {
    %c0_i32 = arith.constant 0 : i32
    %c0_i32_0 = arith.constant 0 : i32
    %c0_i32_1 = arith.constant 0 : i32
    return %c0_i32, %c0_i32_0 : i32, i32
  }
  func.func @transform_4(%arg0: i32) -> (i32, i32) {
    %c0_i32 = arith.constant 0 : i32
    %c0_i32_0 = arith.constant 0 : i32
    %c0_i32_1 = arith.constant 0 : i32
    return %c0_i32, %c0_i32_0 : i32, i32
  }
  func.func @transform_5(%arg0: i32) -> (i32, i32) {
    %c0_i32 = arith.constant 0 : i32
    %c0_i32_0 = arith.constant 0 : i32
    %c0_i32_1 = arith.constant 0 : i32
    return %c0_i32, %c0_i32_0 : i32, i32
  }
  func.func @transform_6(%arg0: i32) -> (i32, i32) {
    %c0_i32 = arith.constant 0 : i32
    %c0_i32_0 = arith.constant 0 : i32
    %c0_i32_1 = arith.constant 0 : i32
    return %c0_i32, %c0_i32_0 : i32, i32
  }
  func.func @transform_7(%arg0: i32) -> (i32, i32) {
    %c0_i32 = arith.constant 0 : i32
    %c0_i32_0 = arith.constant 0 : i32
    %c0_i32_1 = arith.constant 0 : i32
    return %c0_i32, %c0_i32_0 : i32, i32
  }
  func.func @transform_8(%arg0: i32) -> (i32, i32) {
    %c0_i32 = arith.constant 0 : i32
    %c0_i32_0 = arith.constant 0 : i32
    %c0_i32_1 = arith.constant 0 : i32
    return %c0_i32, %c0_i32_0 : i32, i32
  }
  func.func @transform_9(%arg0: i32) -> (i32, i32) {
    %c0_i32 = arith.constant 0 : i32
    %c0_i32_0 = arith.constant 0 : i32
    %c0_i32_1 = arith.constant 0 : i32
    return %c0_i32, %c0_i32_0 : i32, i32
  }
  func.func @transform_10(%arg0: i32) -> (i32, i32) {
    %c0_i32 = arith.constant 0 : i32
    %c0_i32_0 = arith.constant 0 : i32
    %c0_i32_1 = arith.constant 0 : i32
    return %c0_i32, %c0_i32_0 : i32, i32
  }
  func.func @transform_11(%arg0: i32) -> (i32, i32) {
    %c0_i32 = arith.constant 0 : i32
    %c0_i32_0 = arith.constant 0 : i32
    %c0_i32_1 = arith.constant 0 : i32
    return %c0_i32, %c0_i32_0 : i32, i32
  }
  func.func @transform_12(%arg0: i32) -> (i32, i32) {
    %c0_i32 = arith.constant 0 : i32
    %c0_i32_0 = arith.constant 0 : i32
    %c0_i32_1 = arith.constant 0 : i32
    return %c0_i32, %c0_i32_0 : i32, i32
  }
  func.func @transform_13(%arg0: i32) -> (i32, i32) {
    %c0_i32 = arith.constant 0 : i32
    %c0_i32_0 = arith.constant 0 : i32
    %c0_i32_1 = arith.constant 0 : i32
    return %c0_i32, %c0_i32_0 : i32, i32
  }
  func.func @transform_14(%arg0: i32) -> (i32, i32) {
    %c0_i32 = arith.constant 0 : i32
    %c0_i32_0 = arith.constant 0 : i32
    %c0_i32_1 = arith.constant 0 : i32
    return %c0_i32, %c0_i32_0 : i32, i32
  }
  func.func @transform_15(%arg0: i32) -> (i32, i32) {
    %c0_i32 = arith.constant 0 : i32
    %c0_i32_0 = arith.constant 0 : i32
    return %arg0, %c0_i32 : i32, i32
  }
  func.func @transform_16(%arg0: i32) -> (i32, i32) {
    %c0_i32 = arith.constant 0 : i32
    %c0_i32_0 = arith.constant 0 : i32
    return %arg0, %c0_i32 : i32, i32
  }
}

</mosaic_0001>

<bundles_post_ra>
// kernel: tpu_custom_call.1
= control target key start
LH: loop header
LB: loop body
LE: loop exit
PB: predicated region body
PF: predicated region fallthrough
CT: control target
= control target key end

     0   :  { %s3063_s0 = inlined_call_operand.vmem [shape: f32[2,8,6], index: 0, kind: input, shape index: {}]   ;;  %s3064_s1 = inlined_call_operand.hbm [shape: f32[2,10], index: 1, kind: input, shape index: {}]   ;;  %s3065_s2 = inlined_call_operand.hbm [shape: f32[10,40], index: 2, kind: input, shape index: {}]   ;;  %s3066_s3 = inlined_call_operand.vmem [shape: f32[1,40], index: 3, kind: input, shape index: {}]   ;;  %s3067_s4 = inlined_call_operand.vmem [shape: f32[40,20], index: 4, kind: input, shape index: {}]   ;;  %s3068_s5 = inlined_call_operand.hbm [shape: f32[1,20], index: 5, kind: input, shape index: {}]   ;;  %s3069_s6 = inlined_call_operand.hbm [shape: f32[20,96], index: 6, kind: input, shape index: {}]   ;;  %s3070_s7 = inlined_call_operand.vmem [shape: f32[6,96], index: 7, kind: input, shape index: {}]   ;;  %s3071_s8 = inlined_call_operand.vmem [shape: f32[32,96], index: 8, kind: input, shape index: {}]   ;;  %s3072_s9 = inlined_call_operand.vmem [shape: f32[1,96], index: 9, kind: input, shape index: {}]   ;;  %s3073_s10 = inlined_call_operand.vmem [shape: f32[1,32], index: 10, kind: input, shape index: {}]   ;;  %s3074_s11 = inlined_call_operand.vmem [shape: f32[32,96], index: 11, kind: input, shape index: {}]   ;;  %s3075_s12 = inlined_call_operand.hbm [shape: f32[32,96], index: 12, kind: input, shape index: {}]   ;;  %s3076_s13 = inlined_call_operand.vmem [shape: f32[1,96], index: 13, kind: input, shape index: {}]   ;;  %s3077_s14 = inlined_call_operand.vmem [shape: f32[1,32], index: 14, kind: input, shape index: {}]   ;;  %s3078_s15 = inlined_call_operand.hbm [shape: f32[2,304], index: 15, kind: output, shape index: {0}]   ;;  %s3079_s16 = inlined_call_operand.hbm [shape: s32[2,48], index: 16, kind: output, shape index: {1}]  }
   0x1   :  { %3085 = sst [smem:[#allocation19_spill]] %s3063_s0 }
   0x2   :  { %22 = vsyncpa [#allocation3], 0 }
   0x3   :  { %23 = vsyncpa [#allocation6], 0 }
   0x4   :  { %24 = vsyncpa [#allocation9], 0 }
   0x5   :  { %25 = vsyncpa [#allocation4], 0  ;;  %s44_s23 = sshll.u32 %s3065_s2, 4  ;;  %s45_s23 = int_to_ptr.hbm [resolvable:$true] %s44_s23 }
   0x6   :  { %26 = vsyncpa [#allocation13], 0  ;;  %s2242_s24 = smov [#allocation5]   ;;  %s72_s28 = sshll.u32 %s3069_s6, 4  ;;  %s73_s28 = int_to_ptr.hbm [resolvable:$true] %s72_s28 }
   0x7   :  { %s46_s25 = sshll.u32 %s2242_s24, 4  ;;  %s2243_s29 = smov 128   ;;  %s47_s25 = int_to_ptr.vmem [resolvable:$true] %s46_s25 }
   0x8   :  { %s2244_s30 = smov 8   ;;  %s2245_s0 = smov [#allocation8]  }
   0x9   :  { %52 = dma.hbm_to_vmem [thread:$0]  %s45_s23, 256, %s47_s25, [#allocation6], %s2243_s29, %s2243_s29, %s2244_s30  }
   0xa   :  { %s74_s17 = sshll.u32 %s2245_s0, 4  ;;  %s34_s20 = sshll.u32 %s3064_s1, 4  ;;  %s75_s17 = int_to_ptr.vmem [resolvable:$true] %s74_s17  ;;  %s35_s20 = int_to_ptr.hbm [resolvable:$true] %s34_s20 }
   0xb   :  { %80 = dma.hbm_to_vmem [thread:$0]  %s73_s28, 384, %s75_s17, [#allocation9], %s2243_s29, %s2243_s29, %s2244_s30  }
   0xc   :  { %s62_s22 = sshll.u32 %s3068_s5, 4  ;;  %s2246_s24 = smov [#allocation2]   ;;  %s63_s22 = int_to_ptr.hbm [resolvable:$true] %s62_s22 }
   0xd   :  { %s36_s26 = sshll.u32 %s2246_s24, 4  ;;  %s2247_s6 = smov [#allocation7]   ;;  %s37_s26 = int_to_ptr.vmem [resolvable:$true] %s36_s26 }
   0xe   :  { %39 = dma.hbm_to_vmem [thread:$0]  %s35_s20, 32, %s37_s26, [#allocation3]  }
   0xf   :  { %s64_s23 = sshll.u32 %s2247_s6, 4  ;;  %s95_s0 = sshll.u32 %s3075_s12, 4  ;;  %s65_s23 = int_to_ptr.vmem [resolvable:$true] %s64_s23  ;;  %s96_s0 = int_to_ptr.hbm [resolvable:$true] %s95_s0 }
  0x10   :  { %67 = dma.hbm_to_vmem [thread:$0]  %s63_s22, 16, %s65_s23, [#allocation6]  }
  0x11   :  { %s2248_s1 = smov [#allocation10]  }
  0x12   :  { %s97_s28 = sshll.u32 %s2248_s1, 4  ;;  %s98_s28 = int_to_ptr.vmem [resolvable:$true] %s97_s28 }
  0x13   :  { %103 = dma.hbm_to_vmem [thread:$0]  %s96_s0, 512, %s98_s28, [#allocation9], %s2243_s29, %s2243_s29, %s2244_s30  }
  0x14   :  { %2232 = dma.done.wait [#allocation3], 32  }
  0x15   :  { %2233 = vsyncadd [#allocation3], 4294967264 }
  0x16   :  { %2234 = dma.done.wait [#allocation6], 272  }
  0x17   :  { %2235 = vsyncadd [#allocation6], 4294967024 }
  0x18   :  { %2236 = dma.done.wait [#allocation9], 896  }
  0x19   :  { %2237 = vsyncadd [#allocation9], 4294966400  ;;  %vm3084_vm0 = vcmask 1041408   ;;  %v132_v0 = vld [vmem:[#allocation5 + $0x8] sm:$0x3]  ;;  %v131_v1 = vld [vmem:[#allocation5] sm:$0xff] }
  0x1a   :  { %v130_v2 = vld [vmem:[#allocation2] sm:$0x3]  ;;  %1893 = vmatpush.msk.msra.mxu0 %vm3084_vm0, %v132_v0  ;;  %vm3081_vm1 = vcmask 80896   ;;  %v169_v4 = vld [vmem:[%s3067_s4 + $0x18] sm:$0xff]  ;;  %v168_v5 = vld [vmem:[%s3067_s4 + $0x10] sm:$0xff]  ;;  %vm387_vm2 = vcmask 1045504  }
  0x1b   :  { %v170_v3 = vld [vmem:[%s3067_s4 + $0x20] sm:$0xff]  ;;  %v167_v6 = vld [vmem:[%s3067_s4 + $0x8] sm:$0xff]  ;;  %v2389_v8 = vld [vmem:[%s3071_s8 + $0x18] sm:$0xff]  ;;  %s3086_s12 = sld [smem:[#allocation19_spill]]  ;;  %vm352_vm3 = vcmask 1041409   ;;  %vm356_vm4 = vcmask 1043459  }
  0x1c   :  { %190 = vmatpush.msra.mxu1 %v170_v3  ;;  %160 = vmatpush.msra.mxu0 %v131_v1  ;;  %v166_v7 = vld [vmem:[%s3067_s4] sm:$0xff]  ;;  %v2394_v9 = vld [vmem:[%s3071_s8 + $0x10] sm:$0xff]  ;;  %v2400_v10 = vld [vmem:[%s3071_s8 + $0x8] sm:$0xff]  ;;  %vm361_vm5 = vcmask 1045509   ;;  %vm3082_vm6 = vcmask 1047559   ;;  %vm3083_vm7 = vcmask 1043456  }
  0x1d   :  { %1894 = vmatmul.msk.f32.vlgmr.msra.gmra.mxu0 %vm3081_vm1, %v130_v2  ;;  %v1961_v11 = vld [vmem:[%s3073_s10] ss:$0 sm:$0xff]  ;;  %vm399_vm8 = vcmask 48128   ;;  %v2250_v28 = vmov 0.0   ;;  %vm175_vm9 = vcmask 326656   ;;  %v432_v43 = vld [vmem:[#allocation8] sm:$0xff] }
  0x1e   :  { %191 = vmatpush.msra.mxu1 %v169_v4  ;;  %482 = vmatpush.msrb.mxu0 %v2389_v8  ;;  %v392_v12 = vld [vmem:[%s3070_s7] sm:$0x3f]  ;;  %s2249_s7 = smov 64   ;;  %v1962_v55 = vld [vmem:[#allocation7] ss:$0 sm:$0xff]  ;;  %vm438_vm10 = vcmask 162816  }
  0x1f   :  { %1896 = vmatpush.msk.msra.mxu2 %vm387_vm2, %v392_v12  ;;  %512 = vrot.lane.b32.xlu0 %v1961_v11, %s2249_s7  ;;  %v2433_v19 = vld [vmem:[%s3071_s8] sm:$0xff]  ;;  %vm466_vm15 = vcmask 261120   ;;  %s2253_s5 = smov 114   ;;  %s2255_s17 = smov 76  }
  0x20   :  { %192 = vmatpush.msra.mxu1 %v168_v5  ;;  %483 = vmatpush.msrb.mxu0 %v2394_v9  ;;  %v1960_v31 = vld [vmem:[%s3066_s3] ss:$0 sm:$0xff]  ;;  %v434_v35 = vld [vmem:[#allocation8 + $0x10] sm:$0xf]  ;;  %s2257_s18 = smov 6   ;;  %s2259_s10 = smov 24  }
  0x21   :  { %v2413_v13 = vld [vmem:[%s3086_s12] sm:$0xff]  ;;  %v2418_v14 = vld [vmem:[%s3086_s12 + $0x8] sm:$0xff]  ;;  %706 = vmatpush.msrb.mxu2 %v2389_v8  ;;  %1899 = vmatpush.msk.msra.mxu3 %vm3083_vm7, %v434_v35  ;;  %s2260_s29 = smov 18   ;;  %s2261_s8 = smov 30  }
  0x22   :  { %193 = vmatpush.msra.mxu1 %v167_v6  ;;  %v2423_v15 = vrot.slane %v2413_v13, 7  ;;  %v2426_v16 = vrot.slane %v2418_v14, 7  ;;  %v355_v17 = vrot.slane %v2418_v14, 6  ;;  %v359_v18 = vrot.slane %v2413_v13, 6  ;;  %484 = vmatpush.msrb.mxu0 %v2400_v10  ;;  %v433_v36 = vld [vmem:[#allocation8 + $0x8] sm:$0xff]  ;;  %s2262_s30 = smov 62  }
  0x23   :  { %v360_v20 = vrot.slane %v2418_v14, 5  ;;  %v364_v21 = vrot.slane %v2413_v13, 5  ;;  %v365_v22 = vrot.slane %v2418_v14, 4  ;;  %707 = vmatpush.msrb.mxu2 %v2394_v9  ;;  %v369_v37 = vrot.slane %v2413_v13, 4  ;;  %459 = vmatpush.msra.mxu3 %v433_v36  ;;  %v1963_v59 = vld [vmem:[%s3072_s9] ss:$0 sm:$0xff] }
  0x24   :  { %194 = vmatpush.msra.mxu1 %v166_v7  ;;  %v353_v23 = vsel %vm352_vm3, %v2426_v16, %v2413_v13  ;;  %v357_v24 = vsel %vm356_vm4, %v355_v17, %v2423_v15  ;;  %485 = vmatpush.msrb.mxu0 %v2433_v19  ;;  %v370_v38 = vrot.slane %v2418_v14, 3  ;;  %v373_v39 = vrot.slane %v2413_v13, 3  ;;  %s2251_s9 = smov 96   ;;  %s2263_s3 = smov 100  }
  0x25   :  { %v362_v25 = vsel %vm361_vm5, %v360_v20, %v359_v18  ;;  %v367_v26 = vsel %vm3082_vm6, %v365_v22, %v364_v21  ;;  %v384_v27 = vsel %vm3084_vm0, %v353_v23, %v357_v24  ;;  %486 = vmatmul.f32.vlgmr.msrb.gmra.mxu0 %v2250_v28  ;;  %708 = vmatpush.msrb.mxu2 %v2400_v10  ;;  %v374_v40 = vrot.slane %v2418_v14, 2  ;;  %s2264_s19 = smov 42   ;;  %s2266_s20 = smov 36  }
  0x26   :  { %631 = vmatpush.msrb.mxu1 %v2389_v8  ;;  %v386_v29 = vsel %vm3083_vm7, %v384_v27, %v362_v25  ;;  %779 = vmatpush.msra.mxu0 %v2389_v8  ;;  %v377_v41 = vrot.slane %v2413_v13, 2  ;;  %v378_v42 = vrot.slane %v2418_v14, 1  ;;  %v371_v44 = vsel %vm352_vm3, %v370_v38, %v369_v37  ;;  %s2267_s2 = smov [#allocation11]   ;;  %s1865_s26 = sshll.u32 %s3078_s15, 4  ;;  %s1866_s26 = int_to_ptr.hbm [resolvable:$true] %s1865_s26 }
  0x27   :  { %v388_v30 = vsel %vm387_vm2, %v386_v29, %v367_v26  ;;  %709 = vmatpush.msrb.mxu2 %v2433_v19  ;;  %v375_v45 = vsel %vm356_vm4, %v374_v40, %v373_v39  ;;  %v381_v46 = vrot.slane %v2413_v13, 1  ;;  %460 = vmatpush.msra.mxu3 %v432_v43  ;;  %s1863_s21 = sshll.u32 %s2267_s2, 4  ;;  %s2268_s6 = smov [#allocation12]   ;;  %s1864_s21 = int_to_ptr.vmem [resolvable:$true] %s1863_s21 }
  0x28   :  { %632 = vmatpush.msrb.mxu1 %v2394_v9  ;;  %1897 = vmatmul.msk.f32.vlgmr.msra.gmra.mxu2 %vm399_vm8, %v388_v30  ;;  %v379_v47 = vsel %vm361_vm5, %v378_v42, %v377_v41  ;;  %v389_v48 = vsel %vm3084_vm0, %v371_v44, %v375_v45  ;;  %s1874_s23 = sshll.u32 %s2268_s6, 4  ;;  %s1876_s25 = sshll.u32 %s3079_s16, 4  ;;  %s1875_s23 = int_to_ptr.vmem [resolvable:$true] %s1874_s23  ;;  %s1877_s25 = int_to_ptr.hbm [resolvable:$true] %s1876_s25 }
  0x29   :  { %780 = vmatpush.msra.mxu0 %v2394_v9  ;;  %992 = vmatpush.msra.mxu2 %v2389_v8  ;;  %v382_v49 = vsel %vm3082_vm6, %v2418_v14, %v381_v46  ;;  %v390_v50 = vsel %vm3083_vm7, %v389_v48, %v379_v47 }
  0x2a   :  { %633 = vmatpush.msrb.mxu1 %v2400_v10  ;;  %556 = vmatpush.msrb.mxu3 %v2389_v8  ;;  %v391_v51 = vsel %vm387_vm2, %v390_v50, %v382_v49 }
  0x2b   :  { %781 = vmatpush.msra.mxu0 %v2400_v10  ;;  %993 = vmatpush.msra.mxu2 %v2394_v9 }
  0x2c   :  { %634 = vmatpush.msrb.mxu1 %v2433_v19  ;;  %557 = vmatpush.msrb.mxu3 %v2394_v9 }
  0x2d   :  { %782 = vmatpush.msra.mxu0 %v2433_v19  ;;  %994 = vmatpush.msra.mxu2 %v2400_v10 }
  0x2e   :  { %558 = vmatpush.msrb.mxu3 %v2400_v10 }
  0x2f   :  { %995 = vmatpush.msra.mxu2 %v2433_v19 }
  0x30   :  { %1898 = vmatmul.msk.f32.gmra.mxu2 %vm399_vm8, %v391_v51  ;;  %559 = vmatpush.msrb.mxu3 %v2433_v19 }
  0x91   :  { %v2491_v52 = vpop.permute.xlu0 %512 }
  0x9a   :  { %v162_v32 = vpop.f32.mrf.mxu0 }
  0x9b   :  { %v163_v33 = vadd.f32 %v1960_v31, %v162_v32 }
  0x9d   :  { %v165_v34 = vmax.f32 %v163_v33, 0.0 }
  0x9f   :  { %1895 = vmatmul.msk.f32.vlgmr.msra.gmra.mxu1 %vm175_vm9, %v165_v34 }
  0xa0   :  { %919 = vmatpush.msra.mxu1 %v2389_v8 }
  0xa2   :  { %920 = vmatpush.msra.mxu1 %v2394_v9  ;;  %v487_v53 = vpop.f32.mrf.mxu0 }
  0xa3   :  { %v515_v54 = vadd.f32 %v2491_v52, %v487_v53 }
  0xa4   :  { %921 = vmatpush.msra.mxu1 %v2400_v10 }
  0xa5   :  { %517 = vrot.lane.b32.xlu0 %v515_v54, %s2249_s7 }
  0xa6   :  { %922 = vmatpush.msra.mxu1 %v2433_v19 }
  0xab   :  { %v426_v62 = vpop.f32.mrf.mxu2 }
 0x11c   :  { %v196_v56 = vpop.f32.mrf.mxu1 }
 0x11d   :  { %v197_v57 = vadd.f32 %v1962_v55, %v196_v56 }
 0x11f   :  { %v199_v58 = vmax.f32 %v197_v57, 0.0 }
 0x121   :  { %1900 = vmatmul.msk.f32.vlgmr.msra.gmra.mxu3 %vm438_vm10, %v199_v58 }
 0x122   :  { %846 = vmatpush.msra.mxu3 %v2389_v8 }
 0x124   :  { %847 = vmatpush.msra.mxu3 %v2394_v9 }
 0x126   :  { %848 = vmatpush.msra.mxu3 %v2400_v10 }
 0x128   :  { %849 = vmatpush.msra.mxu3 %v2433_v19  ;;  %v518_v19 = vpop.permute.xlu0 %517 }
 0x1a4   :  { %v462_v60 = vpop.f32.mrf.mxu3 }
 0x1a5   :  { %v2506_v61 = vadd.f32 %v1963_v59, %v462_v60 }
 0x1a7   :  { %v465_v63 = vadd.f32 %v2506_v61, %v426_v62  ;;  %v536_v0 = vrot.slane %v2506_v61, 6  ;;  %v610_v1 = vrot.slane %v2506_v61, 4  ;;  %v685_v2 = vrot.slane %v2506_v61, 2 }
 0x1a9   :  { %v490_v3 = vadd.f32 %v487_v53, %v465_v63  ;;  %v2514_v4 = vadd.f32 %v536_v0, %v426_v62  ;;  %v2518_v5 = vadd.f32 %v610_v1, %v426_v62  ;;  %v2522_v6 = vadd.f32 %v685_v2, %v426_v62 }
 0x1ab   :  { %v1901_v7 = vmul.f32 -1.442695, %v490_v3 }
 0x1ad   :  { %1966 = vpow2.f32 %v1901_v7 }
 0x1b3   :  { %v1967_v8 = vpop.eup %1966 }
 0x1b4   :  { %v494_v9 = vadd.f32 1.0, %v1967_v8 }
 0x1b6   :  { %1968 = vrcp.f32 %v494_v9  ;;  %v506_v13 = vand.u32 2147483648, %v494_v9  ;;  %v504_v17 = vand.u32 2147483647, %v494_v9  ;;  %vm500_vm12 = vweird.f32 %v494_v9 }
 0x1b8   :  { %v507_v20 = vor.u32 1.1754944e-38, %v506_v13  ;;  %vm505_vm14 = vcmp.eq.f32.partialorder %v504_v17, 8.507059e+37 }
 0x1bc   :  { %v1969_v10 = vpop.eup %1968 }
 0x1bd   :  { %v496_v11 = vmul.f32 %v1969_v10, %v494_v9  ;;  %vm501_vm11 = vweird.f32 %v1969_v10 }
 0x1be   :  { %vm502_vm13 = vmor %vm500_vm12, %vm501_vm11 }
 0x1bf   :  { %v497_v12 = vsub.f32 1.0, %v496_v11 }
 0x1c1   :  { %v498_v14 = vmul.f32 %v1969_v10, %v497_v12 }
 0x1c3   :  { %v499_v18 = vadd.f32 %v1969_v10, %v498_v14 }
 0x1c5   :  { %v503_v21 = vsel %vm502_vm13, %v1969_v10, %v499_v18 }
 0x1c6   :  { %v508_v22 = vsel %vm505_vm14, %v507_v20, %v503_v21 }
 0x1c7   :  { %v520_v23 = vmul.f32 %v518_v19, %v508_v22  ;;  %v527_v27 = vsub.f32 1.0, %v508_v22  ;;  %v533_v30 = vmul.f32 0.0, %v508_v22 }
 0x1c9   :  { %522 = vrot.lane.b32.xlu1 %v520_v23, %s2249_s7 }
 0x23b   :  { %v523_v24 = vpop.permute.xlu1 %522 }
 0x23c   :  { %v525_v25 = vadd.f32 %v523_v24, %v465_v63 }
 0x23e   :  { %1970 = vtanh.f32 %v525_v25 }
 0x244   :  { %v1971_v26 = vpop.eup %1970 }
 0x245   :  { %529 = vrot.lane.b32.xlu1 %v1971_v26, %s2251_s9 }
 0x2b7   :  { %v530_v29 = vpop.permute.xlu1 %529 }
 0x2b8   :  { %v532_v31 = vmul.f32 %v530_v29, %v527_v27 }
 0x2ba   :  { %v2526_v32 = vadd.f32 %v533_v30, %v532_v31 }
 0x2bc   :  { %540 = vrot.lane.b32.xlu2 %v2526_v32, %s2251_s9  ;;  %v606_v59 = vrot.slane %v2526_v32, 6 }
 0x316   :  { %v541_v33 = vpop.permute.xlu2 %540 }
 0x317   :  { %1902 = vmatmul.msk.f32.vlgmr.msrb.gmra.mxu3 %vm466_vm15, %v541_v33 }
 0x39a   :  { %v561_v34 = vpop.f32.mrf.mxu3 }
 0x39b   :  { %v587_v35 = vadd.f32 %v561_v34, %v2491_v52  ;;  %v565_v37 = vrot.slane %v561_v34, 6 }
 0x39d   :  { %v589_v36 = vrot.slane %v587_v35, 6  ;;  %v567_v38 = vadd.f32 %v565_v37, %v2514_v4 }
 0x39f   :  { %590 = vrot.lane.b32.xlu2 %v589_v36, %s2249_s7  ;;  %v1903_v39 = vmul.f32 -1.442695, %v567_v38 }
 0x3a1   :  { %1972 = vpow2.f32 %v1903_v39 }
 0x3a7   :  { %v1973_v40 = vpop.eup %1972 }
 0x3a8   :  { %v571_v41 = vadd.f32 1.0, %v1973_v40 }
 0x3aa   :  { %1974 = vrcp.f32 %v571_v41  ;;  %v583_v47 = vand.u32 2147483648, %v571_v41  ;;  %vm577_vm10 = vweird.f32 %v571_v41  ;;  %v581_v48 = vand.u32 2147483647, %v571_v41 }
 0x3ac   :  { %v584_v50 = vor.u32 1.1754944e-38, %v583_v47  ;;  %vm582_vm12 = vcmp.eq.f32.partialorder %v581_v48, 8.507059e+37 }
 0x3b0   :  { %v1975_v42 = vpop.eup %1974 }
 0x3b1   :  { %v573_v43 = vmul.f32 %v1975_v42, %v571_v41  ;;  %vm578_vm9 = vweird.f32 %v1975_v42 }
 0x3b2   :  { %vm579_vm11 = vmor %vm577_vm10, %vm578_vm9 }
 0x3b3   :  { %v574_v44 = vsub.f32 1.0, %v573_v43 }
 0x3b5   :  { %v575_v45 = vmul.f32 %v1975_v42, %v574_v44 }
 0x3b7   :  { %v576_v46 = vadd.f32 %v1975_v42, %v575_v45 }
 0x3b9   :  { %v580_v49 = vsel %vm579_vm11, %v1975_v42, %v576_v46 }
 0x3ba   :  { %v585_v53 = vsel %vm582_vm12, %v584_v50, %v580_v49 }
 0x3bb   :  { %v600_v58 = vsub.f32 1.0, %v585_v53  ;;  %v608_v63 = vmul.f32 %v606_v59, %v585_v53 }
 0x3f9   :  { %v591_v51 = vpop.permute.xlu2 %590 }
 0x3fa   :  { %v593_v54 = vmul.f32 %v591_v51, %v585_v53 }
 0x3fc   :  { %595 = vrot.lane.b32.xlu0 %v593_v54, %s2249_s7 }
 0x46e   :  { %v596_v55 = vpop.permute.xlu0 %595 }
 0x46f   :  { %v598_v56 = vadd.f32 %v596_v55, %v2514_v4 }
 0x471   :  { %1976 = vtanh.f32 %v598_v56 }
 0x477   :  { %v1977_v57 = vpop.eup %1976 }
 0x478   :  { %602 = vrot.lane.b32.xlu1 %v1977_v57, %s2251_s9 }
 0x4ea   :  { %v603_v60 = vpop.permute.xlu1 %602 }
 0x4eb   :  { %v605_v62 = vmul.f32 %v603_v60, %v600_v58 }
 0x4ed   :  { %v609_v3 = vadd.f32 %v608_v63, %v605_v62 }
 0x4ef   :  { %v614_v7 = vrot.slane %v609_v3, 2  ;;  %v681_v36 = vrot.slane %v609_v3, 6  ;;  %v1046_v41 = vsel %vm3084_vm0, %v2526_v32, %v609_v3 }
 0x4f1   :  { %615 = vrot.lane.b32.xlu2 %v614_v7, %s2251_s9 }
 0x54b   :  { %v616_v8 = vpop.permute.xlu2 %615 }
 0x54c   :  { %1904 = vmatmul.msk.f32.vlgmr.msrb.gmra.mxu1 %vm466_vm15, %v616_v8 }
 0x5c9   :  { %v636_v9 = vpop.f32.mrf.mxu1 }
 0x5ca   :  { %v662_v4 = vadd.f32 %v636_v9, %v2491_v52  ;;  %v640_v11 = vrot.slane %v636_v9, 4 }
 0x5cc   :  { %v664_v10 = vrot.slane %v662_v4, 4  ;;  %v642_v12 = vadd.f32 %v640_v11, %v2518_v5 }
 0x5ce   :  { %665 = vrot.lane.b32.xlu0 %v664_v10, %s2249_s7  ;;  %v1905_v13 = vmul.f32 -1.442695, %v642_v12 }
 0x5d0   :  { %1978 = vpow2.f32 %v1905_v13 }
 0x5d6   :  { %v1979_v14 = vpop.eup %1978 }
 0x5d7   :  { %v646_v17 = vadd.f32 1.0, %v1979_v14 }
 0x5d9   :  { %1980 = vrcp.f32 %v646_v17  ;;  %v658_v23 = vand.u32 2147483648, %v646_v17  ;;  %vm652_vm14 = vweird.f32 %v646_v17  ;;  %v656_v24 = vand.u32 2147483647, %v646_v17 }
 0x5db   :  { %v659_v26 = vor.u32 1.1754944e-38, %v658_v23  ;;  %vm657_vm10 = vcmp.eq.f32.partialorder %v656_v24, 8.507059e+37 }
 0x5df   :  { %v1981_v18 = vpop.eup %1980 }
 0x5e0   :  { %v648_v19 = vmul.f32 %v1981_v18, %v646_v17  ;;  %vm653_vm13 = vweird.f32 %v1981_v18 }
 0x5e1   :  { %vm654_vm9 = vmor %vm652_vm14, %vm653_vm13 }
 0x5e2   :  { %v649_v20 = vsub.f32 1.0, %v648_v19 }
 0x5e4   :  { %v650_v21 = vmul.f32 %v1981_v18, %v649_v20 }
 0x5e6   :  { %v651_v22 = vadd.f32 %v1981_v18, %v650_v21 }
 0x5e8   :  { %v655_v25 = vsel %vm654_vm9, %v1981_v18, %v651_v22 }
 0x5e9   :  { %v660_v29 = vsel %vm657_vm10, %v659_v26, %v655_v25 }
 0x5ea   :  { %v675_v35 = vsub.f32 1.0, %v660_v29  ;;  %v683_v38 = vmul.f32 %v681_v36, %v660_v29 }
 0x640   :  { %v666_v27 = vpop.permute.xlu0 %665 }
 0x641   :  { %v668_v30 = vmul.f32 %v666_v27, %v660_v29 }
 0x643   :  { %670 = vrot.lane.b32.xlu1 %v668_v30, %s2249_s7 }
 0x6b5   :  { %v671_v31 = vpop.permute.xlu1 %670 }
 0x6b6   :  { %v673_v33 = vadd.f32 %v671_v31, %v2518_v5  ;;  %v2551_v5 = vpop.f32.mrf.mxu2 }
 0x6b7   :  { %v760_v22 = vadd.f32 %v2506_v61, %v2551_v5 }
 0x6b8   :  { %1982 = vtanh.f32 %v673_v33 }
 0x6be   :  { %v1983_v34 = vpop.eup %1982 }
 0x6bf   :  { %677 = vrot.lane.b32.xlu2 %v1983_v34, %s2251_s9 }
 0x719   :  { %v678_v37 = vpop.permute.xlu2 %677 }
 0x71a   :  { %v680_v39 = vmul.f32 %v678_v37, %v675_v35 }
 0x71c   :  { %v684_v40 = vadd.f32 %v683_v38, %v680_v39 }
 0x71e   :  { %v689_v42 = vrot.slane %v684_v40, 4  ;;  %v1047_v43 = vsel %vm3083_vm7, %v1046_v41, %v684_v40  ;;  %v756_v11 = vrot.slane %v684_v40, 6  ;;  %v1055_v41 = vld [vmem:[%s3074_s11 + $0x18] sm:$0xff] }
 0x71f   :  { %1087 = vmatpush.msrb.mxu0 %v1055_v41 }
 0x720   :  { %690 = vrot.lane.b32.xlu0 %v689_v42, %s2251_s9  ;;  %v1054_v42 = vld [vmem:[%s3074_s11 + $0x10] sm:$0xff] }
 0x721   :  { %1088 = vmatpush.msrb.mxu0 %v1054_v42 }
 0x792   :  { %v691_v44 = vpop.permute.xlu0 %690 }
 0x793   :  { %1906 = vmatmul.msk.f32.vlgmr.msrb.gmra.mxu2 %vm466_vm15, %v691_v44  ;;  %v1052_v44 = vld [vmem:[%s3074_s11] sm:$0xff] }
 0x816   :  { %v711_v45 = vpop.f32.mrf.mxu2 }
 0x817   :  { %v737_v46 = vadd.f32 %v711_v45, %v2491_v52  ;;  %v715_v48 = vrot.slane %v711_v45, 2 }
 0x819   :  { %v739_v47 = vrot.slane %v737_v46, 2  ;;  %v717_v49 = vadd.f32 %v715_v48, %v2522_v6 }
 0x81b   :  { %740 = vrot.lane.b32.xlu1 %v739_v47, %s2249_s7  ;;  %v1907_v32 = vmul.f32 -1.442695, %v717_v49 }
 0x81d   :  { %1984 = vpow2.f32 %v1907_v32 }
 0x823   :  { %v1985_v50 = vpop.eup %1984 }
 0x824   :  { %v721_v51 = vadd.f32 1.0, %v1985_v50 }
 0x826   :  { %1986 = vrcp.f32 %v721_v51  ;;  %v733_v58 = vand.u32 2147483648, %v721_v51  ;;  %vm727_vm12 = vweird.f32 %v721_v51  ;;  %v731_v59 = vand.u32 2147483647, %v721_v51 }
 0x828   :  { %v734_v62 = vor.u32 1.1754944e-38, %v733_v58  ;;  %vm732_vm14 = vcmp.eq.f32.partialorder %v731_v59, 8.507059e+37  ;;  %v1965_v58 = vld [vmem:[%s3077_s14] ss:$0 sm:$0xff] }
 0x82c   :  { %v1987_v53 = vpop.eup %1986 }
 0x82d   :  { %v723_v54 = vmul.f32 %v1987_v53, %v721_v51  ;;  %vm728_vm11 = vweird.f32 %v1987_v53 }
 0x82e   :  { %vm729_vm13 = vmor %vm727_vm12, %vm728_vm11 }
 0x82f   :  { %v724_v55 = vsub.f32 1.0, %v723_v54  ;;  %v2586_v54 = vld [vmem:[#allocation10 + $0x18] sm:$0xff] }
 0x830   :  { %1110 = vmatpush.msrb.mxu3 %v2586_v54  ;;  %1180 = vmatpush.msrb.mxu1 %v2586_v54 }
 0x831   :  { %v725_v56 = vmul.f32 %v1987_v53, %v724_v55  ;;  %v2588_v55 = vld [vmem:[#allocation10 + $0x10] sm:$0xff]  ;;  %1252 = vmatpush.msrb.mxu2 %v2586_v54 }
 0x832   :  { %1111 = vmatpush.msrb.mxu3 %v2588_v55  ;;  %1181 = vmatpush.msrb.mxu1 %v2588_v55 }
 0x833   :  { %v726_v57 = vadd.f32 %v1987_v53, %v725_v56  ;;  %v2592_v56 = vld [vmem:[#allocation10 + $0x8] sm:$0xff]  ;;  %1253 = vmatpush.msrb.mxu2 %v2588_v55 }
 0x834   :  { %1112 = vmatpush.msrb.mxu3 %v2592_v56  ;;  %1182 = vmatpush.msrb.mxu1 %v2592_v56 }
 0x835   :  { %v730_v60 = vsel %vm729_vm13, %v1987_v53, %v726_v57  ;;  %v2598_v57 = vld [vmem:[#allocation10] sm:$0xff]  ;;  %1254 = vmatpush.msrb.mxu2 %v2592_v56 }
 0x836   :  { %v735_v3 = vsel %vm732_vm14, %v734_v62, %v730_v60  ;;  %1113 = vmatpush.msrb.mxu3 %v2598_v57  ;;  %1183 = vmatpush.msrb.mxu1 %v2598_v57 }
 0x837   :  { %v750_v10 = vsub.f32 1.0, %v735_v3  ;;  %v758_v13 = vmul.f32 %v756_v11, %v735_v3  ;;  %1255 = vmatpush.msrb.mxu2 %v2598_v57 }
 0x88d   :  { %v741_v63 = vpop.permute.xlu1 %740 }
 0x88e   :  { %v743_v7 = vmul.f32 %v741_v63, %v735_v3 }
 0x890   :  { %745 = vrot.lane.b32.xlu2 %v743_v7, %s2249_s7 }
 0x8ea   :  { %v746_v8 = vpop.permute.xlu2 %745 }
 0x8eb   :  { %v748_v9 = vadd.f32 %v746_v8, %v2522_v6 }
 0x8ed   :  { %1988 = vtanh.f32 %v748_v9  ;;  %v828_v9 = vadd.f32 %v536_v0, %v2551_v5 }
 0x8f3   :  { %v1989_v4 = vpop.eup %1988 }
 0x8f4   :  { %752 = vrot.lane.b32.xlu0 %v1989_v4, %s2251_s9 }
 0x966   :  { %v753_v12 = vpop.permute.xlu0 %752 }
 0x967   :  { %v755_v14 = vmul.f32 %v753_v12, %v750_v10 }
 0x969   :  { %v759_v17 = vadd.f32 %v758_v13, %v755_v14  ;;  %v2636_v13 = vld [vmem:[%s3076_s13] ss:$0 sm:$0xff]  ;;  %s2252_s13 = smov 102  }
 0x96b   :  { %v762_v18 = vrot.slane %v759_v17, 6  ;;  %v1048_v19 = vsel %vm387_vm2, %v1047_v43, %v759_v17  ;;  %v1053_v43 = vld [vmem:[%s3074_s11 + $0x8] sm:$0xff] }
 0x96c   :  { %1089 = vmatpush.msrb.mxu0 %v1053_v43 }
 0x96d   :  { %763 = vrot.lane.b32.xlu1 %v762_v18, %s2251_s9 }
 0x96e   :  { %1090 = vmatpush.msrb.mxu0 %v1052_v44 }
 0x9df   :  { %v764_v20 = vpop.permute.xlu1 %763 }
 0x9e0   :  { %1908 = vmatmul.msk.f32.vlgmr.msra.gmra.mxu0 %vm466_vm15, %v764_v20 }
 0x9e1   :  { %1534 = vmatpush.msra.mxu0 %v2586_v54 }
 0x9e3   :  { %1535 = vmatpush.msra.mxu0 %v2588_v55 }
 0x9e5   :  { %1536 = vmatpush.msra.mxu0 %v2592_v56 }
 0x9e7   :  { %1537 = vmatpush.msra.mxu0 %v2598_v57 }
 0xa5d   :  { %v784_v21 = vpop.f32.mrf.mxu0 }
 0xa5e   :  { %v807_v6 = vadd.f32 %v784_v21, %v2491_v52  ;;  %v787_v23 = vadd.f32 %v784_v21, %v760_v22 }
 0xa60   :  { %809 = vrot.lane.b32.xlu2 %v807_v6, %s2249_s7  ;;  %v1909_v24 = vmul.f32 -1.442695, %v787_v23 }
 0xa62   :  { %1990 = vpow2.f32 %v1909_v24 }
 0xa68   :  { %v1991_v25 = vpop.eup %1990 }
 0xa69   :  { %v791_v26 = vadd.f32 1.0, %v1991_v25 }
 0xa6b   :  { %1992 = vrcp.f32 %v791_v26  ;;  %v803_v34 = vand.u32 2147483648, %v791_v26  ;;  %vm797_vm10 = vweird.f32 %v791_v26  ;;  %v801_v35 = vand.u32 2147483647, %v791_v26 }
 0xa6d   :  { %v804_v37 = vor.u32 1.1754944e-38, %v803_v34  ;;  %vm802_vm12 = vcmp.eq.f32.partialorder %v801_v35, 8.507059e+37 }
 0xa71   :  { %v1993_v27 = vpop.eup %1992 }
 0xa72   :  { %v793_v29 = vmul.f32 %v1993_v27, %v791_v26  ;;  %vm798_vm9 = vweird.f32 %v1993_v27 }
 0xa73   :  { %vm799_vm11 = vmor %vm797_vm10, %vm798_vm9 }
 0xa74   :  { %v794_v30 = vsub.f32 1.0, %v793_v29 }
 0xa76   :  { %v795_v31 = vmul.f32 %v1993_v27, %v794_v30 }
 0xa78   :  { %v796_v33 = vadd.f32 %v1993_v27, %v795_v31 }
 0xa7a   :  { %v800_v36 = vsel %vm799_vm11, %v1993_v27, %v796_v33 }
 0xa7b   :  { %v805_v39 = vsel %vm802_vm12, %v804_v37, %v800_v36 }
 0xa7c   :  { %v819_v49 = vsub.f32 1.0, %v805_v39  ;;  %v826_v50 = vmul.f32 %v805_v39, %v762_v18 }
 0xaba   :  { %v810_v38 = vpop.permute.xlu2 %809 }
 0xabb   :  { %v812_v40 = vmul.f32 %v810_v38, %v805_v39 }
 0xabd   :  { %814 = vrot.lane.b32.xlu0 %v812_v40, %s2249_s7 }
 0xac5   :  { %1067 = vrot.lane.b32.xlu0 %v1048_v19, %s2251_s9 }
 0xb2f   :  { %v815_v45 = vpop.permute.xlu0 %814 }
 0xb30   :  { %v817_v46 = vadd.f32 %v815_v45, %v760_v22 }
 0xb32   :  { %1994 = vtanh.f32 %v817_v46 }
 0xb37   :  { %v1068_v47 = vpop.permute.xlu0 %1067 }
 0xb38   :  { %v1995_v48 = vpop.eup %1994  ;;  %1916 = vmatmul.msk.f32.vlgmr.msrb.gmra.mxu0 %vm466_vm15, %v1068_v47 }
 0xb39   :  { %821 = vrot.lane.b32.xlu1 %v1995_v48, %s2251_s9 }
 0xb41   :  { %1140 = vrot.lane.b32.xlu1 %v1965_v58, %s2249_s7 }
 0xbab   :  { %v822_v32 = vpop.permute.xlu1 %821 }
 0xbac   :  { %v824_v51 = vmul.f32 %v822_v32, %v819_v49 }
 0xbae   :  { %v2582_v53 = vadd.f32 %v826_v50, %v824_v51 }
 0xbb0   :  { %830 = vrot.lane.b32.xlu2 %v2582_v53, %s2251_s9  ;;  %v896_v58 = vrot.slane %v2582_v53, 6 }
 0xbb3   :  { %v2626_v3 = vpop.permute.xlu1 %1140 }
 0xbb5   :  { %v1092_v14 = vpop.f32.mrf.mxu0 }
 0xbb6   :  { %v2639_v18 = vadd.f32 %v2636_v13, %v1092_v14 }
 0xc0a   :  { %v831_v59 = vpop.permute.xlu2 %830 }
 0xc0b   :  { %1910 = vmatmul.msk.f32.vlgmr.msra.gmra.mxu3 %vm466_vm15, %v831_v59 }
 0xc0c   :  { %1324 = vmatpush.msra.mxu3 %v2586_v54 }
 0xc0e   :  { %1325 = vmatpush.msra.mxu3 %v2588_v55 }
 0xc10   :  { %1326 = vmatpush.msra.mxu3 %v2592_v56 }
 0xc12   :  { %1327 = vmatpush.msra.mxu3 %v2598_v57 }
 0xc13   :  { %1114 = vmatmul.f32.vlgmr.msrb.gmra.mxu3 %v2250_v28 }
 0xc14   :  { %1606 = vmatpush.msrb.mxu3 %v2586_v54 }
 0xc16   :  { %1607 = vmatpush.msrb.mxu3 %v2588_v55 }
 0xc18   :  { %1608 = vmatpush.msrb.mxu3 %v2592_v56 }
 0xc1a   :  { %1609 = vmatpush.msrb.mxu3 %v2598_v57 }
 0xc8e   :  { %v851_v60 = vpop.f32.mrf.mxu3 }
 0xc8f   :  { %v877_v62 = vadd.f32 %v851_v60, %v2491_v52  ;;  %v855_v28 = vrot.slane %v851_v60, 6 }
 0xc91   :  { %v879_v63 = vrot.slane %v877_v62, 6  ;;  %v857_v4 = vadd.f32 %v855_v28, %v828_v9 }
 0xc93   :  { %880 = vrot.lane.b32.xlu2 %v879_v63, %s2249_s7  ;;  %v1911_v10 = vmul.f32 -1.442695, %v857_v4 }
 0xc95   :  { %1996 = vpow2.f32 %v1911_v10 }
 0xc96   :  { %v1115_v7 = vpop.f32.mrf.mxu3 }
 0xc97   :  { %v1143_v8 = vadd.f32 %v2626_v3, %v1115_v7  ;;  %v1118_v19 = vadd.f32 %v1115_v7, %v2639_v18 }
 0xc99   :  { %1145 = vrot.lane.b32.xlu0 %v1143_v8, %s2249_s7  ;;  %v1918_v0 = vmul.f32 -1.442695, %v1118_v19 }
 0xc9b   :  { %v1997_v11 = vpop.eup %1996 }
 0xc9c   :  { %v861_v12 = vadd.f32 1.0, %v1997_v11 }
 0xc9e   :  { %1998 = vrcp.f32 %v861_v12  ;;  %v873_v23 = vand.u32 2147483648, %v861_v12  ;;  %vm867_vm14 = vweird.f32 %v861_v12  ;;  %v871_v25 = vand.u32 2147483647, %v861_v12 }
 0xc9f   :  { %2000 = vpow2.f32 %v1918_v0 }
 0xca0   :  { %v874_v29 = vor.u32 1.1754944e-38, %v873_v23  ;;  %vm872_vm10 = vcmp.eq.f32.partialorder %v871_v25, 8.507059e+37 }
 0xca4   :  { %v1999_v17 = vpop.eup %1998 }
 0xca5   :  { %v863_v20 = vmul.f32 %v1999_v17, %v861_v12  ;;  %vm868_vm13 = vweird.f32 %v1999_v17  ;;  %v2001_v24 = vpop.eup %2000 }
 0xca6   :  { %vm869_vm9 = vmor %vm867_vm14, %vm868_vm13  ;;  %v1122_v27 = vadd.f32 1.0, %v2001_v24 }
 0xca7   :  { %v864_v21 = vsub.f32 1.0, %v863_v20 }
 0xca8   :  { %2002 = vrcp.f32 %v1122_v27  ;;  %v1134_v39 = vand.u32 2147483648, %v1122_v27  ;;  %vm1128_vm12 = vweird.f32 %v1122_v27  ;;  %v1132_v40 = vand.u32 2147483647, %v1122_v27 }
 0xca9   :  { %v865_v6 = vmul.f32 %v1999_v17, %v864_v21 }
 0xcaa   :  { %v1135_v42 = vor.u32 1.1754944e-38, %v1134_v39  ;;  %vm1133_vm14 = vcmp.eq.f32.partialorder %v1132_v40, 8.507059e+37 }
 0xcab   :  { %v866_v22 = vadd.f32 %v1999_v17, %v865_v6 }
 0xcad   :  { %v870_v26 = vsel %vm869_vm9, %v1999_v17, %v866_v22  ;;  %v900_v22 = vadd.f32 %v610_v1, %v2551_v5 }
 0xcae   :  { %v875_v31 = vsel %vm872_vm10, %v874_v29, %v870_v26  ;;  %v2003_v34 = vpop.eup %2002 }
 0xcaf   :  { %v1124_v35 = vmul.f32 %v2003_v34, %v1122_v27  ;;  %vm1129_vm11 = vweird.f32 %v2003_v34  ;;  %v890_v51 = vsub.f32 1.0, %v875_v31  ;;  %v898_v60 = vmul.f32 %v896_v58, %v875_v31 }
 0xcb0   :  { %vm1130_vm13 = vmor %vm1128_vm12, %vm1129_vm11 }
 0xcb1   :  { %v1125_v36 = vsub.f32 1.0, %v1124_v35 }
 0xcb3   :  { %v1126_v37 = vmul.f32 %v2003_v34, %v1125_v36 }
 0xcb5   :  { %v1127_v38 = vadd.f32 %v2003_v34, %v1126_v37 }
 0xcb7   :  { %v1131_v41 = vsel %vm1130_vm13, %v2003_v34, %v1127_v38 }
 0xcb8   :  { %v1136_v43 = vsel %vm1133_vm14, %v1135_v42, %v1131_v41 }
 0xcb9   :  { %v1155_v7 = vsub.f32 1.0, %v1136_v43 }
 0xced   :  { %v881_v30 = vpop.permute.xlu2 %880 }
 0xcee   :  { %v883_v33 = vmul.f32 %v881_v30, %v875_v31 }
 0xcf0   :  { %885 = vrot.lane.b32.xlu1 %v883_v33, %s2249_s7 }
 0xd0b   :  { %v1146_v44 = vpop.permute.xlu0 %1145 }
 0xd0c   :  { %v1148_v45 = vmul.f32 %v1146_v44, %v1136_v43 }
 0xd0e   :  { %1150 = vrot.lane.b32.xlu2 %v1148_v45, %s2249_s7 }
 0xd62   :  { %v886_v46 = vpop.permute.xlu1 %885 }
 0xd63   :  { %v888_v47 = vadd.f32 %v886_v46, %v828_v9  ;;  %v1161_v9 = vmul.f32 0.0, %v1136_v43 }
 0xd65   :  { %2004 = vtanh.f32 %v888_v47 }
 0xd68   :  { %v1151_v48 = vpop.permute.xlu2 %1150 }
 0xd69   :  { %v1153_v49 = vadd.f32 %v1151_v48, %v2639_v18 }
 0xd6b   :  { %v2005_v32 = vpop.eup %2004  ;;  %2006 = vtanh.f32 %v1153_v49 }
 0xd6c   :  { %892 = vrot.lane.b32.xlu0 %v2005_v32, %s2251_s9 }
 0xd71   :  { %v2007_v50 = vpop.eup %2006 }
 0xd72   :  { %1157 = vrot.lane.b32.xlu1 %v2007_v50, %s2251_s9 }
 0xdde   :  { %v893_v59 = vpop.permute.xlu0 %892 }
 0xddf   :  { %v895_v62 = vmul.f32 %v893_v59, %v890_v51 }
 0xde1   :  { %v2648_v63 = vadd.f32 %v898_v60, %v895_v62 }
 0xde3   :  { %v902_v8 = vrot.slane %v2648_v63, 2 }
 0xde4   :  { %v1158_v28 = vpop.permute.xlu1 %1157 }
 0xde5   :  { %v1160_v4 = vmul.f32 %v1158_v28, %v1155_v7  ;;  %903 = vrot.lane.b32.xlu2 %v902_v8, %s2251_s9 }
 0xde7   :  { %v2652_v10 = vadd.f32 %v1161_v9, %v1160_v4 }
 0xde9   :  { %1164 = vrot.lane.b32.xlu0 %v2652_v10, %s2251_s9 }
 0xe3f   :  { %v904_v11 = vpop.permute.xlu2 %903 }
 0xe40   :  { %1912 = vmatmul.msk.f32.vlgmr.msra.gmra.mxu1 %vm466_vm15, %v904_v11 }
 0xe41   :  { %1396 = vmatpush.msra.mxu1 %v2586_v54 }
 0xe43   :  { %1397 = vmatpush.msra.mxu1 %v2588_v55 }
 0xe45   :  { %1398 = vmatpush.msra.mxu1 %v2592_v56 }
 0xe47   :  { %1399 = vmatpush.msra.mxu1 %v2598_v57 }
 0xe5b   :  { %v1165_v12 = vpop.permute.xlu0 %1164 }
 0xe5c   :  { %1919 = vmatmul.msk.f32.vlgmr.msrb.gmra.mxu1 %vm466_vm15, %v1165_v12 }
 0xebd   :  { %v924_v14 = vpop.f32.mrf.mxu1 }
 0xebe   :  { %v950_v17 = vadd.f32 %v924_v14, %v2491_v52  ;;  %v928_v6 = vrot.slane %v924_v14, 4  ;;  %v969_v14 = vrot.slane %v2648_v63, 6 }
 0xec0   :  { %v952_v19 = vrot.slane %v950_v17, 4  ;;  %v930_v23 = vadd.f32 %v928_v6, %v900_v22 }
 0xec2   :  { %953 = vrot.lane.b32.xlu1 %v952_v19, %s2249_s7  ;;  %v1913_v25 = vmul.f32 -1.442695, %v930_v23 }
 0xec4   :  { %2008 = vpow2.f32 %v1913_v25 }
 0xeca   :  { %v2009_v29 = vpop.eup %2008 }
 0xecb   :  { %v934_v30 = vadd.f32 1.0, %v2009_v29 }
 0xecd   :  { %v946_v42 = vand.u32 2147483648, %v934_v30  ;;  %vm940_vm10 = vweird.f32 %v934_v30  ;;  %v944_v43 = vand.u32 2147483647, %v934_v30 }
 0xecf   :  { %v947_v46 = vor.u32 1.1754944e-38, %v946_v42  ;;  %vm945_vm13 = vcmp.eq.f32.partialorder %v944_v43, 8.507059e+37 }
 0xed9   :  { %v1185_v20 = vpop.f32.mrf.mxu1 }
 0xeda   :  { %v1211_v0 = vadd.f32 %v1185_v20, %v2626_v3  ;;  %v1189_v24 = vrot.slane %v1185_v20, 6 }
 0xedc   :  { %v1213_v21 = vrot.slane %v1211_v0, 6  ;;  %v1191_v26 = vadd.f32 %v1189_v24, %v2639_v18  ;;  %v1230_v24 = vrot.slane %v2652_v10, 6 }
 0xede   :  { %1214 = vrot.lane.b32.xlu2 %v1213_v21, %s2249_s7  ;;  %v1920_v27 = vmul.f32 -1.442695, %v1191_v26  ;;  %v1049_v21 = vsel %vm3084_vm0, %v2582_v53, %v2648_v63 }
 0xee0   :  { %2010 = vpow2.f32 %v1920_v27 }
 0xee1   :  { %2012 = vrcp.f32 %v934_v30 }
 0xee6   :  { %v2011_v31 = vpop.eup %2010 }
 0xee7   :  { %v1195_v33 = vadd.f32 1.0, %v2011_v31  ;;  %v2013_v34 = vpop.eup %2012 }
 0xee8   :  { %v936_v35 = vmul.f32 %v2013_v34, %v934_v30  ;;  %vm941_vm9 = vweird.f32 %v2013_v34 }
 0xee9   :  { %2014 = vrcp.f32 %v1195_v33  ;;  %vm942_vm11 = vmor %vm940_vm10, %vm941_vm9  ;;  %v1207_v47 = vand.u32 2147483648, %v1195_v33  ;;  %vm1201_vm14 = vweird.f32 %v1195_v33  ;;  %v1205_v48 = vand.u32 2147483647, %v1195_v33 }
 0xeea   :  { %v937_v37 = vsub.f32 1.0, %v936_v35 }
 0xeeb   :  { %v1208_v58 = vor.u32 1.1754944e-38, %v1207_v47  ;;  %vm1206_vm6 = vcmp.eq.f32.partialorder %v1205_v48, 8.507059e+37 }
 0xeec   :  { %v938_v1 = vmul.f32 %v2013_v34, %v937_v37 }
 0xeee   :  { %v939_v40 = vadd.f32 %v2013_v34, %v938_v1 }
 0xeef   :  { %v2015_v36 = vpop.eup %2014 }
 0xef0   :  { %v1197_v38 = vmul.f32 %v2015_v36, %v1195_v33  ;;  %v943_v44 = vsel %vm942_vm11, %v2013_v34, %v939_v40  ;;  %vm1202_vm12 = vweird.f32 %v2015_v36 }
 0xef1   :  { %v948_v32 = vsel %vm945_vm13, %v947_v46, %v943_v44  ;;  %vm1203_vm1 = vmor %vm1201_vm14, %vm1202_vm12 }
 0xef2   :  { %v1198_v39 = vsub.f32 1.0, %v1197_v38  ;;  %v963_v12 = vsub.f32 1.0, %v948_v32  ;;  %v971_v19 = vmul.f32 %v969_v14, %v948_v32 }
 0xef4   :  { %v1199_v41 = vmul.f32 %v2015_v36, %v1198_v39 }
 0xef6   :  { %v1200_v45 = vadd.f32 %v2015_v36, %v1199_v41 }
 0xef8   :  { %v1204_v51 = vsel %vm1203_vm1, %v2015_v36, %v1200_v45 }
 0xef9   :  { %v1209_v60 = vsel %vm1206_vm6, %v1208_v58, %v1204_v51 }
 0xefa   :  { %v1224_v23 = vsub.f32 1.0, %v1209_v60  ;;  %v1232_v26 = vmul.f32 %v1230_v24, %v1209_v60 }
 0xf34   :  { %v954_v49 = vpop.permute.xlu1 %953 }
 0xf35   :  { %v956_v50 = vmul.f32 %v954_v49, %v948_v32 }
 0xf37   :  { %958 = vrot.lane.b32.xlu0 %v956_v50, %s2249_s7 }
 0xf38   :  { %v1215_v59 = vpop.permute.xlu2 %1214 }
 0xf39   :  { %v1217_v62 = vmul.f32 %v1215_v59, %v1209_v60 }
 0xf3b   :  { %1219 = vrot.lane.b32.xlu1 %v1217_v62, %s2249_s7 }
 0xfa9   :  { %v959_v7 = vpop.permute.xlu0 %958 }
 0xfaa   :  { %v961_v8 = vadd.f32 %v959_v7, %v900_v22 }
 0xfac   :  { %2016 = vtanh.f32 %v961_v8 }
 0xfad   :  { %v1220_v28 = vpop.permute.xlu1 %1219 }
 0xfae   :  { %v1222_v9 = vadd.f32 %v1220_v28, %v2639_v18 }
 0xfb0   :  { %2018 = vtanh.f32 %v1222_v9 }
 0xfb2   :  { %v2017_v4 = vpop.eup %2016 }
 0xfb3   :  { %965 = vrot.lane.b32.xlu2 %v2017_v4, %s2251_s9 }
 0xfb6   :  { %v2019_v11 = vpop.eup %2018 }
 0xfb7   :  { %1226 = vrot.lane.b32.xlu0 %v2019_v11, %s2251_s9 }
0x100d   :  { %v966_v17 = vpop.permute.xlu2 %965 }
0x100e   :  { %v968_v20 = vmul.f32 %v966_v17, %v963_v12 }
0x1010   :  { %v2676_v0 = vadd.f32 %v971_v19, %v968_v20 }
0x1012   :  { %v975_v6 = vrot.slane %v2676_v0, 4  ;;  %v2684_v22 = vsel %vm3083_vm7, %v1049_v21, %v2676_v0 }
0x1014   :  { %976 = vrot.lane.b32.xlu1 %v975_v6, %s2251_s9 }
0x1029   :  { %v1227_v25 = vpop.permute.xlu0 %1226 }
0x102a   :  { %v1229_v27 = vmul.f32 %v1227_v25, %v1224_v23 }
0x102c   :  { %v2688_v29 = vadd.f32 %v1232_v26, %v1229_v27 }
0x102e   :  { %v1235_v30 = vrot.slane %v2688_v29, 2  ;;  %v1302_v59 = vrot.slane %v2688_v29, 6 }
0x1030   :  { %1236 = vrot.lane.b32.xlu2 %v1235_v30, %s2251_s9 }
0x1086   :  { %v977_v53 = vpop.permute.xlu1 %976 }
0x1087   :  { %1914 = vmatmul.msk.f32.vlgmr.msra.gmra.mxu2 %vm466_vm15, %v977_v53 }
0x1088   :  { %1462 = vmatpush.msra.mxu2 %v2586_v54 }
0x108a   :  { %1463 = vmatpush.msra.mxu2 %v2588_v55  ;;  %v1237_v63 = vpop.permute.xlu2 %1236 }
0x108c   :  { %1464 = vmatpush.msra.mxu2 %v2592_v56 }
0x108e   :  { %1465 = vmatpush.msra.mxu2 %v2598_v57 }
0x108f   :  { %1921 = vmatmul.msk.f32.vlgmr.msrb.gmra.mxu2 %vm466_vm15, %v1237_v63 }
0x110a   :  { %v997_v31 = vpop.f32.mrf.mxu2 }
0x110b   :  { %v1023_v50 = vadd.f32 %v997_v31, %v2491_v52  ;;  %v1001_v4 = vrot.slane %v997_v31, 2  ;;  %v973_v52 = vadd.f32 %v685_v2, %v2551_v5 }
0x110d   :  { %v1025_v51 = vrot.slane %v1023_v50, 2  ;;  %v1003_v11 = vadd.f32 %v1001_v4, %v973_v52  ;;  %v1042_v50 = vrot.slane %v2676_v0, 6 }
0x110f   :  { %v1915_v12 = vmul.f32 -1.442695, %v1003_v11 }
0x1112   :  { %v1257_v33 = vpop.f32.mrf.mxu2 }
0x1113   :  { %v1283_v34 = vadd.f32 %v1257_v33, %v2626_v3  ;;  %v1261_v36 = vrot.slane %v1257_v33, 4 }
0x1115   :  { %v1285_v35 = vrot.slane %v1283_v34, 4  ;;  %v1263_v37 = vadd.f32 %v1261_v36, %v2639_v18 }
0x1117   :  { %1286 = vrot.lane.b32.xlu0 %v1285_v35, %s2249_s7  ;;  %v1922_v54 = vmul.f32 -1.442695, %v1263_v37 }
0x1119   :  { %2020 = vpow2.f32 %v1922_v54 }
0x111f   :  { %v2021_v55 = vpop.eup %2020 }
0x1120   :  { %v1267_v38 = vadd.f32 1.0, %v2021_v55 }
0x1122   :  { %2022 = vrcp.f32 %v1267_v38  ;;  %v1279_v41 = vand.u32 2147483648, %v1267_v38  ;;  %vm1273_vm6 = vweird.f32 %v1267_v38  ;;  %v1277_v42 = vand.u32 2147483647, %v1267_v38 }
0x1124   :  { %v1280_v44 = vor.u32 1.1754944e-38, %v1279_v41  ;;  %vm1278_vm10 = vcmp.eq.f32.partialorder %v1277_v42, 8.507059e+37 }
0x1128   :  { %v2023_v56 = vpop.eup %2022 }
0x1129   :  { %v1269_v1 = vmul.f32 %v2023_v56, %v1267_v38  ;;  %vm1274_vm1 = vweird.f32 %v2023_v56 }
0x112a   :  { %vm1275_vm9 = vmor %vm1273_vm6, %vm1274_vm1 }
0x112b   :  { %v1270_v57 = vsub.f32 1.0, %v1269_v1 }
0x112d   :  { %v1271_v39 = vmul.f32 %v2023_v56, %v1270_v57 }
0x112f   :  { %v1272_v40 = vadd.f32 %v2023_v56, %v1271_v39 }
0x1131   :  { %v1276_v43 = vsel %vm1275_vm9, %v2023_v56, %v1272_v40 }
0x1132   :  { %v1281_v46 = vsel %vm1278_vm10, %v1280_v44, %v1276_v43 }
0x1133   :  { %v1296_v58 = vsub.f32 1.0, %v1281_v46  ;;  %v1304_v62 = vmul.f32 %v1302_v59, %v1281_v46 }
0x1189   :  { %v1287_v45 = vpop.permute.xlu0 %1286 }
0x118a   :  { %v1289_v47 = vmul.f32 %v1287_v45, %v1281_v46 }
0x118c   :  { %1291 = vrot.lane.b32.xlu1 %v1289_v47, %s2249_s7 }
0x11fe   :  { %v1292_v48 = vpop.permute.xlu1 %1291 }
0x11ff   :  { %v1294_v49 = vadd.f32 %v1292_v48, %v2639_v18 }
0x1201   :  { %2024 = vtanh.f32 %v1294_v49 }
0x1202   :  { %2026 = vpow2.f32 %v1915_v12 }
0x1207   :  { %v2025_v32 = vpop.eup %2024 }
0x1208   :  { %1298 = vrot.lane.b32.xlu2 %v2025_v32, %s2251_s9  ;;  %v2027_v14 = vpop.eup %2026 }
0x1209   :  { %v1007_v17 = vadd.f32 1.0, %v2027_v14 }
0x120b   :  { %2028 = vrcp.f32 %v1007_v17  ;;  %v1019_v27 = vand.u32 2147483648, %v1007_v17  ;;  %vm1013_vm12 = vweird.f32 %v1007_v17  ;;  %v1017_v61 = vand.u32 2147483647, %v1007_v17 }
0x120d   :  { %v1020_v5 = vor.u32 1.1754944e-38, %v1019_v27  ;;  %vm1018_vm14 = vcmp.eq.f32.partialorder %v1017_v61, 8.507059e+37 }
0x1210   :  { %1026 = vrot.lane.b32.xlu2 %v1025_v51, %s2249_s7 }
0x1211   :  { %v2029_v19 = vpop.eup %2028 }
0x1212   :  { %v1009_v20 = vmul.f32 %v2029_v19, %v1007_v17  ;;  %vm1014_vm11 = vweird.f32 %v2029_v19 }
0x1213   :  { %vm1015_vm13 = vmor %vm1013_vm12, %vm1014_vm11 }
0x1214   :  { %v1010_v21 = vsub.f32 1.0, %v1009_v20 }
0x1216   :  { %v1011_v6 = vmul.f32 %v2029_v19, %v1010_v21 }
0x1218   :  { %v1012_v25 = vadd.f32 %v2029_v19, %v1011_v6 }
0x121a   :  { %v1016_v2 = vsel %vm1015_vm13, %v2029_v19, %v1012_v25 }
0x121b   :  { %v1021_v53 = vsel %vm1018_vm14, %v1020_v5, %v1016_v2 }
0x121c   :  { %v1036_v32 = vsub.f32 1.0, %v1021_v53 }
0x1262   :  { %v1299_v60 = vpop.permute.xlu2 %1298 }
0x1263   :  { %v1301_v7 = vmul.f32 %v1299_v60, %v1296_v58  ;;  %v1044_v58 = vmul.f32 %v1042_v50, %v1021_v53 }
0x1265   :  { %v2707_v8 = vadd.f32 %v1304_v62, %v1301_v7 }
0x1267   :  { %v1307_v28 = vrot.slane %v2707_v8, 4 }
0x1269   :  { %1308 = vrot.lane.b32.xlu0 %v1307_v28, %s2251_s9  ;;  %v1374_v28 = vrot.slane %v2707_v8, 6 }
0x126a   :  { %v1027_v30 = vpop.permute.xlu2 %1026 }
0x126b   :  { %v1029_v63 = vmul.f32 %v1027_v30, %v1021_v53 }
0x12db   :  { %v1309_v9 = vpop.permute.xlu0 %1308 }
0x12dc   :  { %1923 = vmatmul.msk.f32.vlgmr.msra.gmra.mxu3 %vm466_vm15, %v1309_v9 }
0x135f   :  { %v1329_v23 = vpop.f32.mrf.mxu3 }
0x1360   :  { %v1355_v24 = vadd.f32 %v1329_v23, %v2626_v3  ;;  %v1333_v31 = vrot.slane %v1329_v23, 2 }
0x1362   :  { %v1357_v26 = vrot.slane %v1355_v24, 2  ;;  %v1335_v33 = vadd.f32 %v1333_v31, %v2639_v18 }
0x1364   :  { %1358 = vrot.lane.b32.xlu1 %v1357_v26, %s2249_s7  ;;  %v1924_v34 = vmul.f32 -1.442695, %v1335_v33 }
0x1366   :  { %2030 = vpow2.f32 %v1924_v34 }
0x136c   :  { %1031 = vrot.lane.b32.xlu1 %v1029_v63, %s2249_s7  ;;  %v2031_v35 = vpop.eup %2030 }
0x136d   :  { %v1339_v36 = vadd.f32 1.0, %v2031_v35 }
0x136f   :  { %2032 = vrcp.f32 %v1339_v36  ;;  %v1351_v1 = vand.u32 2147483648, %v1339_v36  ;;  %vm1345_vm6 = vweird.f32 %v1339_v36  ;;  %v1349_v57 = vand.u32 2147483647, %v1339_v36 }
0x1371   :  { %v1352_v40 = vor.u32 1.1754944e-38, %v1351_v1  ;;  %vm1350_vm10 = vcmp.eq.f32.partialorder %v1349_v57, 8.507059e+37 }
0x1375   :  { %v2033_v37 = vpop.eup %2032 }
0x1376   :  { %v1341_v54 = vmul.f32 %v2033_v37, %v1339_v36  ;;  %vm1346_vm1 = vweird.f32 %v2033_v37 }
0x1377   :  { %vm1347_vm9 = vmor %vm1345_vm6, %vm1346_vm1 }
0x1378   :  { %v1342_v55 = vsub.f32 1.0, %v1341_v54 }
0x137a   :  { %v1343_v38 = vmul.f32 %v2033_v37, %v1342_v55 }
0x137c   :  { %v1344_v56 = vadd.f32 %v2033_v37, %v1343_v38 }
0x137e   :  { %v1348_v39 = vsel %vm1347_vm9, %v2033_v37, %v1344_v56 }
0x137f   :  { %v1353_v42 = vsel %vm1350_vm10, %v1352_v40, %v1348_v39 }
0x1380   :  { %v1368_v7 = vsub.f32 1.0, %v1353_v42  ;;  %v1376_v9 = vmul.f32 %v1374_v28, %v1353_v42 }
0x13d6   :  { %v1359_v41 = vpop.permute.xlu1 %1358 }
0x13d7   :  { %v1361_v43 = vmul.f32 %v1359_v41, %v1353_v42 }
0x13d9   :  { %1363 = vrot.lane.b32.xlu0 %v1361_v43, %s2249_s7 }
0x13de   :  { %v1032_v44 = vpop.permute.xlu1 %1031 }
0x13df   :  { %v1034_v45 = vadd.f32 %v1032_v44, %v973_v52 }
0x13e1   :  { %2034 = vtanh.f32 %v1034_v45 }
0x13e7   :  { %v2035_v46 = vpop.eup %2034 }
0x13e8   :  { %1038 = vrot.lane.b32.xlu0 %v2035_v46, %s2251_s9 }
0x144b   :  { %v1364_v47 = vpop.permute.xlu0 %1363 }
0x144c   :  { %v1366_v48 = vadd.f32 %v1364_v47, %v2639_v18 }
0x144e   :  { %2036 = vtanh.f32 %v1366_v48 }
0x1454   :  { %v2037_v49 = vpop.eup %2036 }
0x1455   :  { %1370 = vrot.lane.b32.xlu2 %v2037_v49, %s2251_s9 }
0x145a   :  { %v1039_v51 = vpop.permute.xlu0 %1038 }
0x145b   :  { %v1041_v59 = vmul.f32 %v1039_v51, %v1036_v32 }
0x145d   :  { %v1045_v60 = vadd.f32 %v1044_v58, %v1041_v59 }
0x145f   :  { %v1051_v62 = vsel %vm387_vm2, %v2684_v22, %v1045_v60 }
0x1460   :  { %1069 = vrot.lane.b32.xlu2 %v1051_v62, %s2251_s9 }
0x14af   :  { %v1371_v18 = vpop.permute.xlu2 %1370 }
0x14b0   :  { %v1373_v4 = vmul.f32 %v1371_v18, %v1368_v7 }
0x14b2   :  { %v2728_v52 = vadd.f32 %v1376_v9, %v1373_v4 }
0x14b4   :  { %v1379_v11 = vrot.slane %v2728_v52, 6 }
0x14b6   :  { %1380 = vrot.lane.b32.xlu1 %v1379_v11, %s2251_s9 }
0x14ba   :  { %v1070_v0 = vpop.permute.xlu2 %1069 }
0x14bb   :  { %1917 = vmatmul.msk.f32.gmra.mxu0 %vm466_vm15, %v1070_v0 }
0x1528   :  { %v1381_v12 = vpop.permute.xlu1 %1380 }
0x1529   :  { %1925 = vmatmul.msk.f32.vlgmr.msra.gmra.mxu1 %vm466_vm15, %v1381_v12 }
0x1538   :  { %v1095_v17 = vpop.f32.mrf.mxu0 }
0x1539   :  { %v2737_v19 = vadd.f32 %v2636_v13, %v1095_v17 }
0x15a6   :  { %v1401_v22 = vpop.f32.mrf.mxu1 }
0x15a7   :  { %v1424_v14 = vadd.f32 %v1401_v22, %v2626_v3  ;;  %v1404_v20 = vadd.f32 %v1401_v22, %v2737_v19 }
0x15a9   :  { %1426 = vrot.lane.b32.xlu0 %v1424_v14, %s2249_s7  ;;  %v1926_v21 = vmul.f32 -1.442695, %v1404_v20 }
0x15ab   :  { %2038 = vpow2.f32 %v1926_v21 }
0x15b1   :  { %v2039_v6 = vpop.eup %2038 }
0x15b2   :  { %v1408_v23 = vadd.f32 1.0, %v2039_v6 }
0x15b4   :  { %2040 = vrcp.f32 %v1408_v23  ;;  %v1420_v2 = vand.u32 2147483648, %v1408_v23  ;;  %vm1414_vm11 = vweird.f32 %v1408_v23  ;;  %v1418_v5 = vand.u32 2147483647, %v1408_v23 }
0x15b6   :  { %v1421_v13 = vor.u32 1.1754944e-38, %v1420_v2  ;;  %vm1419_vm13 = vcmp.eq.f32.partialorder %v1418_v5, 8.507059e+37 }
0x15ba   :  { %v2041_v24 = vpop.eup %2040 }
0x15bb   :  { %v1410_v25 = vmul.f32 %v2041_v24, %v1408_v23  ;;  %vm1415_vm2 = vweird.f32 %v2041_v24 }
0x15bc   :  { %vm1416_vm12 = vmor %vm1414_vm11, %vm1415_vm2 }
0x15bd   :  { %v1411_v26 = vsub.f32 1.0, %v1410_v25 }
0x15bf   :  { %v1412_v27 = vmul.f32 %v2041_v24, %v1411_v26 }
0x15c1   :  { %v1413_v61 = vadd.f32 %v2041_v24, %v1412_v27 }
0x15c3   :  { %v1417_v30 = vsel %vm1416_vm12, %v2041_v24, %v1413_v61 }
0x15c4   :  { %v1422_v63 = vsel %vm1419_vm13, %v1421_v13, %v1417_v30 }
0x15c5   :  { %v1436_v36 = vsub.f32 1.0, %v1422_v63  ;;  %v1443_v54 = vmul.f32 %v1422_v63, %v1379_v11 }
0x161b   :  { %v1427_v53 = vpop.permute.xlu0 %1426 }
0x161c   :  { %v1429_v31 = vmul.f32 %v1427_v53, %v1422_v63 }
0x161e   :  { %1431 = vrot.lane.b32.xlu1 %v1429_v31, %s2249_s7 }
0x1690   :  { %v1432_v33 = vpop.permute.xlu1 %1431 }
0x1691   :  { %v1434_v34 = vadd.f32 %v1432_v33, %v2737_v19 }
0x1693   :  { %2042 = vtanh.f32 %v1434_v34 }
0x1699   :  { %v2043_v35 = vpop.eup %2042 }
0x169a   :  { %1438 = vrot.lane.b32.xlu2 %v2043_v35, %s2251_s9 }
0x16f4   :  { %v1439_v37 = vpop.permute.xlu2 %1438 }
0x16f5   :  { %v1441_v55 = vmul.f32 %v1439_v37, %v1436_v36 }
0x16f7   :  { %v2743_v38 = vadd.f32 %v1443_v54, %v1441_v55 }
0x16f9   :  { %1446 = vrot.lane.b32.xlu0 %v2743_v38, %s2251_s9  ;;  %v1512_v4 = vrot.slane %v2743_v38, 6 }
0x176b   :  { %v1447_v56 = vpop.permute.xlu0 %1446 }
0x176c   :  { %1927 = vmatmul.msk.f32.vlgmr.msra.gmra.mxu2 %vm466_vm15, %v1447_v56 }
0x17ef   :  { %v1467_v1 = vpop.f32.mrf.mxu2 }
0x17f0   :  { %v1493_v57 = vadd.f32 %v1467_v1, %v2626_v3  ;;  %v1471_v40 = vrot.slane %v1467_v1, 6 }
0x17f2   :  { %v1495_v39 = vrot.slane %v1493_v57, 6  ;;  %v1473_v41 = vadd.f32 %v1471_v40, %v2737_v19 }
0x17f4   :  { %1496 = vrot.lane.b32.xlu1 %v1495_v39, %s2249_s7  ;;  %v1928_v42 = vmul.f32 -1.442695, %v1473_v41 }
0x17f6   :  { %2044 = vpow2.f32 %v1928_v42 }
0x17fc   :  { %v2045_v43 = vpop.eup %2044 }
0x17fd   :  { %v1477_v44 = vadd.f32 1.0, %v2045_v43 }
0x17ff   :  { %2046 = vrcp.f32 %v1477_v44  ;;  %v1489_v32 = vand.u32 2147483648, %v1477_v44  ;;  %vm1483_vm1 = vweird.f32 %v1477_v44  ;;  %v1487_v50 = vand.u32 2147483647, %v1477_v44 }
0x1801   :  { %v1490_v58 = vor.u32 1.1754944e-38, %v1489_v32  ;;  %vm1488_vm9 = vcmp.eq.f32.partialorder %v1487_v50, 8.507059e+37 }
0x1805   :  { %v2047_v45 = vpop.eup %2046 }
0x1806   :  { %v1479_v46 = vmul.f32 %v2047_v45, %v1477_v44  ;;  %vm1484_vm14 = vweird.f32 %v2047_v45 }
0x1807   :  { %vm1485_vm6 = vmor %vm1483_vm1, %vm1484_vm14 }
0x1808   :  { %v1480_v47 = vsub.f32 1.0, %v1479_v46 }
0x180a   :  { %v1481_v48 = vmul.f32 %v2047_v45, %v1480_v47  ;;  %v1696_v47 = vrot.slane %v2728_v52, 3 }
0x180c   :  { %v1482_v49 = vadd.f32 %v2047_v45, %v1481_v48  ;;  %v1675_v48 = vrot.slane %v2688_v29, 1  ;;  %v2784_v29 = vld [vmem:[%s3086_s12 + $0x8] sm:$0xff] }
0x180e   :  { %v1486_v51 = vsel %vm1485_vm6, %v2047_v45, %v1482_v49  ;;  %v1685_v49 = vrot.slane %v2707_v8, 2 }
0x180f   :  { %v1491_v60 = vsel %vm1488_vm9, %v1490_v58, %v1486_v51 }
0x1810   :  { %v1506_v9 = vsub.f32 1.0, %v1491_v60  ;;  %v1514_v12 = vmul.f32 %v1512_v4, %v1491_v60 }
0x1866   :  { %v1497_v59 = vpop.permute.xlu1 %1496 }
0x1867   :  { %v1499_v62 = vmul.f32 %v1497_v59, %v1491_v60 }
0x1869   :  { %1501 = vrot.lane.b32.xlu2 %v1499_v62, %s2249_s7  ;;  %v2798_v62 = vld [vmem:[%s3086_s12] sm:$0xff]  ;;  %s2254_s12 = smov 38  }
0x186a   :  { %vm212_vm13 = vcmp.gt.f32.partialorder %v2798_v62, %v2423_v15 }
0x18c3   :  { %v1502_v7 = vpop.permute.xlu2 %1501 }
0x18c4   :  { %v1504_v28 = vadd.f32 %v1502_v7, %v2737_v19 }
0x18c6   :  { %2048 = vtanh.f32 %v1504_v28 }
0x18cc   :  { %v2049_v18 = vpop.eup %2048 }
0x18cd   :  { %1508 = vrot.lane.b32.xlu0 %v2049_v18, %s2251_s9  ;;  %v2808_v18 = vsel %vm212_vm13, %v2798_v62, %v2423_v15 }
0x193f   :  { %v1509_v11 = vpop.permute.xlu0 %1508 }
0x1940   :  { %v1511_v0 = vmul.f32 %v1509_v11, %v1506_v9  ;;  %v228_v11 = vrot.slane %v2808_v18, 7 }
0x1942   :  { %v2755_v22 = vadd.f32 %v1514_v12, %v1511_v0 }
0x1944   :  { %v1517_v14 = vrot.slane %v2755_v22, 2  ;;  %v1584_v34 = vrot.slane %v2755_v22, 6 }
0x1946   :  { %1518 = vrot.lane.b32.xlu1 %v1517_v14, %s2251_s9 }
0x19b8   :  { %v1519_v17 = vpop.permute.xlu1 %1518 }
0x19b9   :  { %1929 = vmatmul.msk.f32.vlgmr.msra.gmra.mxu0 %vm466_vm15, %v1519_v17 }
0x1a36   :  { %v1539_v20 = vpop.f32.mrf.mxu0 }
0x1a37   :  { %v1543_v21 = vrot.slane %v1539_v20, 4  ;;  %v1565_v6 = vadd.f32 %v1539_v20, %v2626_v3 }
0x1a39   :  { %v1545_v23 = vadd.f32 %v1543_v21, %v2737_v19  ;;  %v1567_v24 = vrot.slane %v1565_v6, 4 }
0x1a3b   :  { %v1930_v25 = vmul.f32 -1.442695, %v1545_v23  ;;  %1568 = vrot.lane.b32.xlu2 %v1567_v24, %s2249_s7 }
0x1a3d   :  { %2050 = vpow2.f32 %v1930_v25 }
0x1a43   :  { %v2051_v26 = vpop.eup %2050 }
0x1a44   :  { %v1549_v27 = vadd.f32 1.0, %v2051_v26 }
0x1a46   :  { %2052 = vrcp.f32 %v1549_v27  ;;  %v1561_v30 = vand.u32 2147483648, %v1549_v27  ;;  %v1559_v53 = vand.u32 2147483647, %v1549_v27  ;;  %vm1555_vm2 = vweird.f32 %v1549_v27 }
0x1a48   :  { %v1562_v31 = vor.u32 1.1754944e-38, %v1561_v30  ;;  %vm1560_vm12 = vcmp.eq.f32.partialorder %v1559_v53, 8.507059e+37  ;;  %v1706_v30 = vrot.slane %v2743_v38, 4 }
0x1a4c   :  { %v2053_v61 = vpop.eup %2052 }
0x1a4d   :  { %v1551_v2 = vmul.f32 %v2053_v61, %v1549_v27  ;;  %vm1556_vm10 = vweird.f32 %v2053_v61 }
0x1a4e   :  { %vm1557_vm11 = vmor %vm1555_vm2, %vm1556_vm10  ;;  %vm2822_vm2 = vcmp.gt.f32.partialorder %v2798_v62, %v228_v11 }
0x1a4f   :  { %v1552_v5 = vsub.f32 1.0, %v1551_v2  ;;  %v2833_v26 = vsel %vm2822_vm2, %v2798_v62, %v228_v11 }
0x1a50   :  { %vm242_vm0 = vcmp.gt.f32.partialorder %v2833_v26, 0.0 }
0x1a51   :  { %v1553_v13 = vmul.f32 %v2053_v61, %v1552_v5 }
0x1a53   :  { %v1554_v63 = vadd.f32 %v2053_v61, %v1553_v13 }
0x1a55   :  { %v1558_v33 = vsel %vm1557_vm11, %v2053_v61, %v1554_v63  ;;  %v250_v61 = vrot.slane %v2833_v26, 7 }
0x1a56   :  { %v1563_v35 = vsel %vm1560_vm12, %v1562_v31, %v1558_v33 }
0x1a57   :  { %v1586_v36 = vmul.f32 %v1584_v34, %v1563_v35  ;;  %v1578_v57 = vsub.f32 1.0, %v1563_v35  ;;  %vm2848_vm12 = vcmp.gt.f32.partialorder %v2798_v62, %v250_v61 }
0x1a58   :  { %v2858_v53 = vsel %vm2848_vm12, %v2798_v62, %v250_v61  ;;  %v2256_v61 = vmov 0  }
0x1a59   :  { %v262_v31 = vmax.f32 %v2858_v53, 0.0 }
0x1a95   :  { %v1569_v37 = vpop.permute.xlu2 %1568 }
0x1a96   :  { %v1571_v54 = vmul.f32 %v1569_v37, %v1563_v35 }
0x1a98   :  { %1573 = vrot.lane.b32.xlu0 %v1571_v54, %s2249_s7 }
0x1b0a   :  { %v1574_v55 = vpop.permute.xlu0 %1573 }
0x1b0b   :  { %v1576_v56 = vadd.f32 %v1574_v55, %v2737_v19  ;;  %v218_v55 = vmax.f32 %v2808_v18, 0.0 }
0x1b0d   :  { %2054 = vtanh.f32 %v1576_v56 }
0x1b13   :  { %v2055_v1 = vpop.eup %2054 }
0x1b14   :  { %1580 = vrot.lane.b32.xlu1 %v2055_v1, %s2251_s9 }
0x1b86   :  { %v1581_v39 = vpop.permute.xlu1 %1580 }
0x1b87   :  { %v1583_v40 = vmul.f32 %v1581_v39, %v1578_v57 }
0x1b89   :  { %v2767_v41 = vadd.f32 %v1586_v36, %v1583_v40 }
0x1b8b   :  { %v1589_v42 = vrot.slane %v2767_v41, 4  ;;  %v1656_v33 = vrot.slane %v2767_v41, 6  ;;  %v240_v41 = vmax.f32 %v2833_v26, 0.0 }
0x1b8d   :  { %1590 = vrot.lane.b32.xlu2 %v1589_v42, %s2251_s9 }
0x1be7   :  { %v1591_v43 = vpop.permute.xlu2 %1590 }
0x1be8   :  { %1931 = vmatmul.msk.f32.vlgmr.msrb.gmra.mxu3 %vm466_vm15, %v1591_v43  ;;  %vm213_vm15 = vcmp.gt.f32.partialorder %v2784_v29, %v2426_v16 }
0x1be9   :  { %v2793_v60 = vsel %vm213_vm15, %v2784_v29, %v2426_v16  ;;  %v217_v15 = vsel %vm213_vm15, 1, %v2256_v61 }
0x1bea   :  { %v229_v28 = vrot.slane %v2793_v60, 7  ;;  %v219_v37 = vmax.f32 %v2793_v60, 0.0  ;;  %vm221_vm7 = vcmp.gt.f32.partialorder %v2793_v60, 0.0 }
0x1bec   :  { %vm2812_vm6 = vcmp.gt.f32.partialorder %v2784_v29, %v229_v28  ;;  %v1671_v54 = vrot.slane %v219_v37, 7 }
0x1bed   :  { %v2819_v20 = vsel %vm2812_vm6, %v2784_v29, %v229_v28 }
0x1bee   :  { %v251_v25 = vrot.slane %v2819_v20, 7  ;;  %v241_v57 = vmax.f32 %v2819_v20, 0.0  ;;  %vm243_vm15 = vcmp.gt.f32.partialorder %v2819_v20, 0.0 }
0x1bf0   :  { %vm2837_vm11 = vcmp.gt.f32.partialorder %v2784_v29, %v251_v25  ;;  %v1682_v40 = vrot.slane %v241_v57, 7 }
0x1bf1   :  { %v2845_v2 = vsel %vm2837_vm11, %v2784_v29, %v251_v25 }
0x1bf2   :  { %v263_v13 = vmax.f32 %v2845_v2, 0.0 }
0x1bf4   :  { %v1692_v63 = vrot.slane %v263_v13, 7 }
0x1c6b   :  { %v1611_v44 = vpop.f32.mrf.mxu3 }
0x1c6c   :  { %v1637_v45 = vadd.f32 %v1611_v44, %v2626_v3  ;;  %v1615_v32 = vrot.slane %v1611_v44, 2  ;;  %v1683_v44 = vsel %vm356_vm4, %v1682_v40, %v240_v41 }
0x1c6e   :  { %v1639_v46 = vrot.slane %v1637_v45, 2  ;;  %v1617_v50 = vadd.f32 %v1615_v32, %v2737_v19  ;;  %v273_v32 = vrot.slane %v2845_v2, 7 }
0x1c70   :  { %1640 = vrot.lane.b32.xlu0 %v1639_v46, %s2249_s7  ;;  %v1932_v3 = vmul.f32 -1.442695, %v1617_v50  ;;  %v272_v50 = vrot.slane %v2858_v53, 7  ;;  %vm2880_vm4 = vcmp.gt.f32.partialorder %v2784_v29, %v273_v32 }
0x1c72   :  { %2056 = vpow2.f32 %v1932_v3 }
0x1c78   :  { %1697 = vrot.lane.b32.xlu0 %v1696_v47, %s2252_s13  ;;  %v2057_v51 = vpop.eup %2056 }
0x1c79   :  { %v1621_v58 = vadd.f32 1.0, %v2057_v51 }
0x1c7b   :  { %2058 = vrcp.f32 %v1621_v58  ;;  %v1633_v4 = vand.u32 2147483648, %v1621_v58  ;;  %vm1627_vm1 = vweird.f32 %v1621_v58  ;;  %v1631_v0 = vand.u32 2147483647, %v1621_v58 }
0x1c7d   :  { %v1634_v17 = vor.u32 1.1754944e-38, %v1633_v4  ;;  %vm1632_vm10 = vcmp.eq.f32.partialorder %v1631_v0, 8.507059e+37 }
0x1c80   :  { %1676 = vrot.lane.b32.xlu0 %v1675_v48, %s2252_s13 }
0x1c81   :  { %v2059_v52 = vpop.eup %2058 }
0x1c82   :  { %v1623_v59 = vmul.f32 %v2059_v52, %v1621_v58  ;;  %vm1628_vm14 = vweird.f32 %v2059_v52 }
0x1c83   :  { %vm1629_vm9 = vmor %vm1627_vm1, %vm1628_vm14  ;;  %vm1693_vm14 = vcmask 1044484   ;;  %vm1672_vm1 = vcmask 1042434  }
0x1c84   :  { %v1624_v8 = vsub.f32 1.0, %v1623_v59  ;;  %v1694_v35 = vsel %vm1693_vm14, %v1692_v63, %v262_v31  ;;  %v1673_v1 = vsel %vm1672_vm1, %v1671_v54, %v218_v55  ;;  %v237_v55 = vrot.slane %v217_v15, 7 }
0x1c86   :  { %v1625_v7 = vmul.f32 %v2059_v52, %v1624_v8  ;;  %v239_v60 = vsel %vm2812_vm6, 2, %v237_v55 }
0x1c87   :  { %v245_v26 = vadd.s32 7, %v239_v60 }
0x1c88   :  { %1686 = vrot.lane.b32.xlu0 %v1685_v49, %s2252_s13  ;;  %v1626_v9 = vadd.f32 %v2059_v52, %v1625_v7  ;;  %v1717_v49 = vrot.slane %v2755_v22, 5 }
0x1c89   :  { %v247_v12 = vsel %vm243_vm15, %v245_v26, 2  ;;  %vm203_vm15 = vcmp.gt.f32.partialorder %v2784_v29, 0.0 }
0x1c8a   :  { %v1630_v14 = vsel %vm1629_vm9, %v2059_v52, %v1626_v9  ;;  %vm2890_vm9 = vcmp.gt.f32.partialorder %v2798_v62, %v272_v50 }
0x1c8b   :  { %v2826_v23 = vsel %vm1632_vm10, %v1634_v17, %v1630_v14  ;;  %v2898_v58 = vsel %vm2890_vm9, %v2798_v62, %v272_v50 }
0x1c8c   :  { %v294_v59 = vrot.slane %v2898_v58, 7  ;;  %v284_v11 = vmax.f32 %v2898_v58, 0.0  ;;  %v1650_v63 = vsub.f32 1.0, %v2826_v23  ;;  %v1658_v31 = vmul.f32 %v1656_v33, %v2826_v23 }
0x1c8d   :  { %vm286_vm6 = vcmp.gt.f32.partialorder %v2898_v58, 0.0 }
0x1c8e   :  { %vm2913_vm14 = vcmp.gt.f32.partialorder %v2798_v62, %v294_v59 }
0x1c8f   :  { %v2922_v0 = vsel %vm2913_vm14, %v2798_v62, %v294_v59 }
0x1c90   :  { %v316_v17 = vrot.slane %v2922_v0, 7 }
0x1ce2   :  { %v1641_v6 = vpop.permute.xlu0 %1640 }
0x1ce3   :  { %v1643_v24 = vmul.f32 %v1641_v6, %v2826_v23 }
0x1ce5   :  { %1645 = vrot.lane.b32.xlu1 %v1643_v24, %s2249_s7  ;;  %s2258_s7 = smov 12  }
0x1cea   :  { %v1698_v34 = vpop.permute.xlu0 %1697 }
0x1ceb   :  { %v1700_v38 = vsel %vm399_vm8, %v1694_v35, %v1698_v34 }
0x1cec   :  { %v1754_v36 = vrot.slane %v1700_v38, 3 }
0x1ced   :  { %1707 = vrot.lane.b32.xlu1 %v1706_v30, %s2252_s13  ;;  %v216_v30 = vsel %vm212_vm13, 1, %v2256_v61  ;;  %vm220_vm13 = vcmp.gt.f32.partialorder %v2808_v18, 0.0 }
0x1cee   :  { %v222_v34 = vadd.s32 7, %v216_v30 }
0x1cf0   :  { %v224_v23 = vsel %vm220_vm13, %v222_v34, 1  ;;  %vm1775_vm13 = vcmask 1040384  }
0x1cf2   :  { %v1677_v56 = vpop.permute.xlu0 %1676 }
0x1cf3   :  { %v1679_v39 = vsel %vm399_vm8, %v1673_v1, %v1677_v56  ;;  %v1810_v56 = vrot.slane %v224_v23, 1 }
0x1cf4   :  { %v1744_v42 = vrot.slane %v1679_v39, 1 }
0x1cf5   :  { %1727 = vrot.lane.b32.xlu1 %v1656_v33, %s2252_s13  ;;  %v236_v33 = vrot.slane %v216_v30, 7 }
0x1cf7   :  { %v238_v39 = vsel %vm2822_vm2, 2, %v236_v33  ;;  %vm265_vm2 = vcmp.gt.f32.partialorder %v2845_v2, 0.0 }
0x1cf8   :  { %v244_v18 = vadd.s32 7, %v238_v39  ;;  %v258_v40 = vrot.slane %v238_v39, 7 }
0x1cfa   :  { %v1687_v43 = vpop.permute.xlu0 %1686  ;;  %v260_v21 = vsel %vm2848_vm12, 3, %v258_v40  ;;  %vm308_vm12 = vcmp.gt.f32.partialorder %v2922_v0, 0.0 }
0x1cfb   :  { %v1689_v45 = vsel %vm399_vm8, %v1683_v44, %v1687_v43  ;;  %v259_v43 = vrot.slane %v239_v60, 7  ;;  %v246_v44 = vsel %vm242_vm0, %v244_v18, 2  ;;  %vm1714_vm0 = vcmask 1046534  }
0x1cfc   :  { %v1749_v46 = vrot.slane %v1689_v45, 2 }
0x1cfd   :  { %1755 = vrot.lane.b32.xlu1 %v1754_v36, %s2253_s5  ;;  %v223_v36 = vadd.s32 7, %v217_v15 }
0x1cff   :  { %v225_v57 = vsel %vm221_vm7, %v223_v36, 1  ;;  %vm264_vm7 = vcmp.gt.f32.partialorder %v2858_v53, 0.0 }
0x1d00   :  { %v1811_v16 = vsel %vm352_vm3, %v225_v57, %v1810_v56 }
0x1d01   :  { %1812 = vrot.lane.b32.xlu0 %v1811_v16, %s2257_s18 }
0x1d05   :  { %1665 = vrot.lane.b32.xlu1 %v2652_v10, %s2252_s13 }
0x1d0d   :  { %1745 = vrot.lane.b32.xlu1 %v1744_v42, %s2254_s12  ;;  %v306_v42 = vmax.f32 %v2922_v0, 0.0 }
0x1d15   :  { %1750 = vrot.lane.b32.xlu1 %v1749_v46, %s2255_s17  ;;  %v1814_v46 = vrot.slane %v246_v44, 2 }
0x1d57   :  { %v1646_v47 = vpop.permute.xlu1 %1645 }
0x1d58   :  { %v1648_v48 = vadd.f32 %v1646_v47, %v2737_v19  ;;  %v2887_v19 = vsel %vm2880_vm4, %v2784_v29, %v273_v32  ;;  %v261_v47 = vsel %vm2837_vm11, 3, %v259_v43  ;;  %v280_v32 = vrot.slane %v260_v21, 7 }
0x1d59   :  { %v295_v22 = vrot.slane %v2887_v19, 7  ;;  %v285_v8 = vmax.f32 %v2887_v19, 0.0  ;;  %v281_v5 = vrot.slane %v261_v47, 7  ;;  %vm287_vm11 = vcmp.gt.f32.partialorder %v2887_v19, 0.0 }
0x1d5a   :  { %2060 = vtanh.f32 %v1648_v48  ;;  %v1815_v48 = vrot.slane %v247_v12, 1  ;;  %v282_v20 = vsel %vm2890_vm9, 4, %v280_v32 }
0x1d5b   :  { %vm2901_vm10 = vcmp.gt.f32.partialorder %v2784_v29, %v295_v22  ;;  %v1703_v4 = vrot.slane %v285_v8, 7  ;;  %v283_v8 = vsel %vm2880_vm4, 4, %v281_v5 }
0x1d5c   :  { %v2910_v7 = vsel %vm2901_vm10, %v2784_v29, %v295_v22  ;;  %v1816_v53 = vsel %vm352_vm3, %v1815_v48, %v1814_v46  ;;  %v289_v3 = vadd.s32 7, %v283_v8 }
0x1d5d   :  { %v317_v9 = vrot.slane %v2910_v7, 7  ;;  %v1704_v24 = vsel %vm361_vm5, %v1703_v4, %v284_v11  ;;  %v307_v25 = vmax.f32 %v2910_v7, 0.0  ;;  %vm2947_vm5 = vcmp.gt.f32.partialorder %v2798_v62, %v316_v17  ;;  %1817 = vrot.lane.b32.xlu0 %v1816_v53, %s2258_s7 }
0x1d5e   :  { %v2982_v59 = vsel %vm2947_vm5, %v2798_v62, %v316_v17  ;;  %v302_v11 = vrot.slane %v282_v20, 7  ;;  %vm309_vm4 = vcmp.gt.f32.partialorder %v2910_v7, 0.0 }
0x1d5f   :  { %vm2925_vm1 = vcmp.gt.f32.partialorder %v2784_v29, %v317_v9  ;;  %v1708_v6 = vpop.permute.xlu1 %1707  ;;  %v1713_v54 = vrot.slane %v307_v25, 7  ;;  %v328_v38 = vmax.f32 %v2982_v59, 0.0 }
0x1d60   :  { %v2061_v10 = vpop.eup %2060  ;;  %v2939_v13 = vsel %vm2925_vm1, %v2784_v29, %v317_v9  ;;  %v2944_v35 = vsel %vm399_vm8, %v1704_v24, %v1708_v6  ;;  %v288_v6 = vadd.s32 7, %v282_v20  ;;  %v303_v24 = vrot.slane %v283_v8, 7 }
0x1d61   :  { %1652 = vrot.lane.b32.xlu2 %v2061_v10, %s2251_s9  ;;  %v266_v10 = vadd.s32 7, %v260_v21  ;;  %v1759_v22 = vrot.slane %v2944_v35, 4  ;;  %v329_v27 = vmax.f32 %v2939_v13, 0.0  ;;  %v1715_v9 = vsel %vm1714_vm0, %v1713_v54, %v306_v42  ;;  %s2265_s9 = smov 10  }
0x1d62   :  { %v339_v25 = vrot.slane %v2939_v13, 7  ;;  %v304_v17 = vsel %vm2913_vm14, 5, %v302_v11  ;;  %v305_v30 = vsel %vm2901_vm10, 5, %v303_v24  ;;  %v290_v52 = vsel %vm286_vm6, %v288_v6, 4 }
0x1d63   :  { %v268_v50 = vsel %vm264_vm7, %v266_v10, 3  ;;  %v311_v34 = vadd.s32 7, %v305_v30  ;;  %v324_v35 = vrot.slane %v304_v17, 7  ;;  %v325_v15 = vrot.slane %v305_v30, 7 }
0x1d64   :  { %v1819_v4 = vrot.slane %v268_v50, 3  ;;  %vm2997_vm9 = vcmp.gt.f32.partialorder %v2784_v29, %v339_v25  ;;  %v1724_v7 = vrot.slane %v329_v27, 7  ;;  %v1824_v18 = vrot.slane %v290_v52, 4 }
0x1d65   :  { %v345_v33 = vsel %vm2997_vm9, %v2784_v29, %v339_v25  ;;  %v326_v55 = vsel %vm2947_vm5, 6, %v324_v35  ;;  %v327_v56 = vsel %vm2925_vm1, 6, %v325_v15  ;;  %vm3111_vm14 = vcmask 1047559  }
0x1d66   :  { %v346_v57 = vrot.slane %v326_v55, 7  ;;  %v347_v39 = vrot.slane %v327_v56, 7  ;;  %v1725_v43 = vsel %vm3111_vm14, %v1724_v7, %v328_v38  ;;  %v332_v32 = vadd.s32 7, %v326_v55 }
0x1d67   :  { %v1728_v26 = vpop.permute.xlu1 %1727  ;;  %v333_v5 = vadd.s32 7, %v327_v56  ;;  %vm330_vm1 = vcmp.gt.f32.partialorder %v2982_v59, 0.0  ;;  %vm331_vm5 = vcmp.gt.f32.partialorder %v2939_v13, 0.0  ;;  %v1733_v27 = vrot.slane %v345_v33, 7 }
0x1d68   :  { %v349_v42 = vsel %vm2997_vm9, 7, %v347_v39  ;;  %v1730_v12 = vsel %vm399_vm8, %v1725_v43, %v1728_v26  ;;  %v334_v53 = vsel %vm330_vm1, %v332_v32, 6  ;;  %v201_v30 = vmax.f32 %v2784_v29, 0.0 }
0x1d69   :  { %1718 = vrot.lane.b32.xlu2 %v1717_v49, %s2252_s13  ;;  %v267_v49 = vadd.s32 7, %v261_v47  ;;  %v1769_v48 = vrot.slane %v1730_v12, 6  ;;  %v335_v50 = vsel %vm331_vm5, %v333_v5, 6  ;;  %vm202_vm7 = vcmp.gt.f32.partialorder %v2798_v62, 0.0 }
0x1d6a   :  { %v1835_v20 = vrot.slane %v335_v50, 5  ;;  %v200_v35 = vmax.f32 %v2798_v62, 0.0  ;;  %vm1790_vm0 = vcmask 506880   ;;  %vm1792_vm6 = vcmask 818176  }
0x1d6b   :  { %v269_v2 = vsel %vm265_vm2, %v267_v49, 3  ;;  %vm1788_vm2 = vcmask 195584   ;;  %vm1803_vm9 = vcmask 1043458   ;;  %vm1847_vm14 = vcmask 146432  }
0x1d6c   :  { %v1820_v51 = vrot.slane %v269_v2, 2  ;;  %v1834_v2 = vrot.slane %v334_v53, 6  ;;  %vm1805_vm5 = vcmask 390148  }
0x1d6e   :  { %v1821_v0 = vsel %vm352_vm3, %v1820_v51, %v1819_v4 }
0x1d6f   :  { %1822 = vrot.lane.b32.xlu0 %v1821_v0, %s2260_s29  ;;  %v1756_v13 = vpop.permute.xlu1 %1755 }
0x1d77   :  { %v1666_v25 = vpop.permute.xlu1 %1665 }
0x1dbb   :  { %v1653_v37 = vpop.permute.xlu2 %1652 }
0x1dbc   :  { %v1655_v1 = vmul.f32 %v1653_v37, %v1650_v63  ;;  %v310_v63 = vadd.s32 7, %v304_v17  ;;  %v313_v37 = vsel %vm309_vm4, %v311_v34, 5  ;;  %v1662_v34 = vrot.slane %v201_v30, 7 }
0x1dbd   :  { %v1830_v58 = vrot.slane %v313_v37, 4  ;;  %vm1845_vm4 = vcmask 97280  }
0x1dbe   :  { %v1659_v41 = vadd.f32 %v1658_v31, %v1655_v1  ;;  %v338_v31 = vrot.slane %v2982_v59, 7  ;;  %v312_v23 = vsel %vm308_vm12, %v310_v63, 5  ;;  %v291_v1 = vsel %vm287_vm11, %v289_v3, 4  ;;  %v1813_v59 = vpop.permute.xlu0 %1812  ;;  %v1746_v63 = vpop.permute.xlu1 %1745 }
0x1dbf   :  { %v1829_v54 = vrot.slane %v312_v23, 5  ;;  %v1825_v19 = vrot.slane %v291_v1, 3  ;;  %v1663_v0 = vsel %vm352_vm3, %v1662_v34, %v200_v35  ;;  %vm1782_vm11 = vcmask 310272  }
0x1dc0   :  { %v1737_v45 = vrot.slane %v1659_v41, 7  ;;  %vm3018_vm10 = vcmp.gt.f32.partialorder %v2798_v62, %v338_v31  ;;  %v1668_v33 = vsel %vm399_vm8, %v1663_v0, %v1666_v25  ;;  %vm1784_vm12 = vcmask 621568  }
0x1dc1   :  { %v1831_v14 = vsel %vm352_vm3, %v1830_v58, %v1829_v54  ;;  %v348_v41 = vsel %vm3018_vm10, 7, %v346_v57  ;;  %v1826_v44 = vsel %vm352_vm3, %v1825_v19, %v1824_v18  ;;  %v344_v49 = vsel %vm3018_vm10, %v2798_v62, %v338_v31 }
0x1dc2   :  { %1738 = vrot.lane.b32.xlu2 %v1737_v45, %s2252_s13  ;;  %1832 = vrot.lane.b32.xlu1 %v1831_v14, %s2261_s8  ;;  %v350_v21 = vadd.s32 7, %v348_v41  ;;  %v351_v45 = vadd.s32 7, %v349_v42  ;;  %v205_v31 = vsel %vm203_vm15, 7, %v2256_v61  ;;  %vm1786_vm10 = vcmask 932864  }
0x1dc3   :  { %v1719_v28 = vpop.permute.xlu2 %1718  ;;  %1827 = vrot.lane.b32.xlu0 %v1826_v44, %s2259_s10  ;;  %v1808_v15 = vrot.slane %v205_v31, 7 }
0x1dc4   :  { %v1721_v16 = vsel %vm399_vm8, %v1715_v9, %v1719_v28  ;;  %v1839_v46 = vrot.slane %v350_v21, 7  ;;  %v1840_v47 = vrot.slane %v351_v45, 6  ;;  %v204_v28 = vsel %vm202_vm7, 7, %v2256_v61 }
0x1dc5   :  { %v1764_v40 = vrot.slane %v1721_v16, 5  ;;  %v1809_v29 = vsel %vm352_vm3, %v1808_v15, %v204_v28  ;;  %v1783_v61 = vsel %vm1782_vm11, %v1668_v33, %v1746_v63  ;;  %vm3115_vm7 = vcmask 1043456  }
0x1dc6   :  { %v1841_v10 = vsel %vm352_vm3, %v1840_v47, %v1839_v46  ;;  %v1751_v37 = vpop.permute.xlu1 %1750  ;;  %v1844_v55 = vsel %vm399_vm8, %v1809_v29, %v1813_v59  ;;  %vm1854_vm11 = vcmask 343040  }
0x1dc7   :  { %v1785_v56 = vsel %vm1784_vm12, %v1783_v61, %v1751_v37  ;;  %vm1856_vm12 = vcmask 386048  }
0x1dc8   :  { %v1787_v60 = vsel %vm1786_vm10, %v1785_v56, %v1756_v13 }
0x1dca   :  { %1760 = vrot.lane.b32.xlu2 %v1759_v22, %s2259_s10  ;;  %v1836_v22 = vsel %vm352_vm3, %v1835_v20, %v1834_v2  ;;  %vm3112_vm3 = vcmask 1041408  }
0x1dcb   :  { %1842 = vrot.lane.b32.xlu0 %v1841_v10, %s2264_s19  ;;  %vm1804_vm1 = vmor %vm1803_vm9, %vm3112_vm3 }
0x1dcc   :  { %vm3114_vm15 = vmmov %vm3112_vm3 }
0x1dcf   :  { %v1818_v17 = vpop.permute.xlu0 %1817 }
0x1dd0   :  { %v1846_v58 = vsel %vm1845_vm4, %v1844_v55, %v1818_v17 }
0x1dd2   :  { %1765 = vrot.lane.b32.xlu2 %v1764_v40, %s2262_s30 }
0x1dda   :  { %1770 = vrot.lane.b32.xlu2 %v1769_v48, %s2263_s3 }
0x1de1   :  { %v1823_v36 = vpop.permute.xlu0 %1822 }
0x1de2   :  { %v1848_v7 = vsel %vm1847_vm14, %v1846_v58, %v1823_v36 }
0x1e1c   :  { %v1739_v8 = vpop.permute.xlu2 %1738 }
0x1e1d   :  { %v1741_v9 = vsel %vm399_vm8, %v344_v49, %v1739_v8  ;;  %v1742_v4 = vsel %vm399_vm8, %v1733_v27, %v1739_v8  ;;  %vm3113_vm8 = vcmask 80896  }
0x1e1e   :  { %v1776_v11 = vrot.slane %v1741_v9, 7  ;;  %v1777_v51 = vrot.slane %v1742_v4, 7 }
0x1e20   :  { %v1778_v6 = vsel %vm1775_vm13, %v1776_v11, %v1777_v51  ;;  %vm1806_vm13 = vmor %vm1805_vm5, %vm1804_vm1 }
0x1e21   :  { %1779 = vrot.lane.b32.xlu2 %v1778_v6, %s2265_s9 }
0x1e24   :  { %v1761_v24 = vpop.permute.xlu2 %1760 }
0x1e25   :  { %v1789_v23 = vsel %vm1788_vm2, %v1756_v13, %v1761_v24 }
0x1e29   :  { %1837 = vrot.lane.b32.xlu2 %v1836_v22, %s2266_s20 }
0x1e2c   :  { %v1766_v3 = vpop.permute.xlu2 %1765 }
0x1e2d   :  { %v1791_v62 = vsel %vm1790_vm0, %v1789_v23, %v1766_v3  ;;  %vm1850_vm0 = vcmask 244736  }
0x1e34   :  { %v1771_v52 = vpop.permute.xlu2 %1770  ;;  %v1833_v40 = vpop.permute.xlu1 %1832 }
0x1e35   :  { %v1793_v54 = vsel %vm1792_vm6, %v1791_v62, %v1771_v52  ;;  %v1828_v57 = vpop.permute.xlu0 %1827  ;;  %vm1852_vm6 = vcmask 293888  }
0x1e36   :  { %v1798_v1 = vrot.slane %v1793_v54, 6  ;;  %v1849_v19 = vsel %vm1788_vm2, %v1848_v7, %v1828_v57 }
0x1e37   :  { %v1851_v42 = vsel %vm1850_vm0, %v1849_v19, %v1833_v40 }
0x1e38   :  { %v1800_v14 = vsel %vm3114_vm15, %v1787_v60, %v1798_v1 }
0x1e3d   :  { %v1843_v41 = vpop.permute.xlu0 %1842 }
0x1e7b   :  { %v1780_v39 = vpop.permute.xlu2 %1779 }
0x1e7c   :  { %v1794_v16 = vsel %vm3113_vm8, %v1771_v52, %v1780_v39 }
0x1e7d   :  { %v1799_v38 = vrot.slane %v1794_v16, 4 }
0x1e7f   :  { %v1801_v18 = vsel %vm3115_vm7, %v1800_v14, %v1799_v38 }
0x1e80   :  { %1807 = vst.msk [vmem:[#allocation11] sm:$0x3f] %vm1806_vm13, %v1801_v18 }
0x1e81   :  { %1868 = dma.vmem_to_hbm [thread:$0]  %s1864_s21, 96, %s1866_s26, [#allocation4]  }
0x1e83   :  { %v1838_v26 = vpop.permute.xlu2 %1837 }
0x1e84   :  { %v1853_v43 = vsel %vm1852_vm6, %v1851_v42, %v1838_v26 }
0x1e85   :  { %v1855_v44 = vsel %vm1854_vm11, %v1853_v43, %v1843_v41 }
0x1e86   :  { %1857 = vst.msk [vmem:[#allocation12] sm:$0x3] %vm1856_vm12, %v1855_v44 }
0x1e87   :  { %1879 = dma.vmem_to_hbm [thread:$0]  %s1875_s23, 32, %s1877_s25, [#allocation13]  }
0x1e88   :  { %2238 = dma.done.wait [#allocation4], 96  }
0x1e89   :  { %2239 = vsyncadd [#allocation4], 4294967200 }
0x1e8a   :  { %2240 = dma.done.wait [#allocation13], 32  }
0x1e8b   :  { %2241 = vsyncadd [#allocation13], 4294967264 }
0x1e8c   :  { %1888 = vsyncpa [#allocation3], 1 }
0x1e8d   :  { %1889 = vsyncpa [#allocation6], 1 }
0x1e8e   :  { %1890 = vsyncpa [#allocation9], 1 }
0x1e8f   :  { %1891 = vsyncpa [#allocation4], 1 }
0x1e90   :  { %1892 = vsyncpa [#allocation13], 1 }

</bundles_post_ra>
